<compile_context>
chip_gen: v7x
topology: tpu7x:2x2x1
jax: 0.10.0
libtpu: 0.0.40
codegen_flags: <defaults>
</compile_context>

<pallas_src>
import jax
import jax.numpy as jnp
from jax.experimental import pallas as pl
from jax.experimental.pallas import tpu as pltpu

# ---- problem sizes (small, consistent with the module's 256*6 classifier input) ----
B = 2            # batch
C_IN = 4         # input channels (small mel-band count)
L = 24           # input length
K = 3            # conv kernel size
PAD = 1          # conv padding
L_PAD = L + 2 * PAD
OC = 256         # conv output channels (classifier needs 256 * 6)
POOL = 4         # maxpool window/stride -> output length 6
L_OUT = L // POOL            # 6
WIN = POOL + K - 1           # padded-input rows needed per pooled output row
FEAT = OC * L_OUT            # 1536 == 256 * 6
H1 = 1024
H2 = 1024
NCLS = 12


# ---------------------------------------------------------------------------
# Fused kernel, grid=(L_OUT,):
#   step l:  conv+bias+ReLU+MaxPool for pooled row l (registers only)
#            h_scr += feat_l @ W1[l]        (W1 chunk streamed by BlockSpec)
#   step L_OUT-1 additionally runs the w2/w3 MLP tail and writes the logits.
# ---------------------------------------------------------------------------
def vggmel_kernel(x_ref, wct_ref, bc_ref, w1_ref, b1_ref, w2_ref, b2_ref,
                  w3_ref, b3_ref, o_ref, h_scr):
    # x_ref   : (B, L_PAD, C_IN)    f32  (channels-last, pre-padded)
    # wct_ref : (K, C_IN, OC)       f32  (== torch conv weight transposed)
    # bc_ref  : (1, OC)             f32
    # w1_ref  : (1, OC, H1)         bf16 (chunk l of the (L_OUT, OC, H1) weight)
    # w2_ref  : (H1, H2) bf16 ; w3_ref : (H2, NCLS) bf16 ; b*_ref : (1, N) f32
    # o_ref   : (B, NCLS)           f32
    # h_scr   : (B, H1)             f32  first-Linear accumulator (persists)
    l = pl.program_id(0)

    @pl.when(l == 0)
    def _init():
        h_scr[...] = jnp.zeros_like(h_scr)

    # ---- features for pooled output row l only (all in registers) ----
    # conv output rows t = l*POOL + p need padded-input rows
    # [l*POOL, l*POOL + POOL + K - 1); conv is K shifted tiny MXU matmuls.
    start = pl.multiple_of(l * POOL, POOL)
    wins = [x_ref[b, pl.ds(start, WIN), :] for b in range(B)]   # (WIN, C_IN) each
    acc = jnp.zeros((B * POOL, OC), jnp.float32)
    for k in range(K):
        lhs_k = jnp.concatenate([w[k:k + POOL, :] for w in wins], axis=0)
        acc += jnp.dot(lhs_k, wct_ref[k],
                       preferred_element_type=jnp.float32)      # (B*POOL, OC)
    acc = jnp.maximum(acc + bc_ref[...], 0.0)                   # bias + ReLU
    # MaxPool1d(POOL): reduce each batch's POOL rows -> (B, OC), registers only.
    feat = jnp.concatenate(
        [acc[b * POOL:(b + 1) * POOL, :].max(axis=0, keepdims=True)
         for b in range(B)], axis=0)                            # (B, OC)

    # ---- first Linear, streamed over l:  h += feat_l @ W1[l] ----
    h_scr[...] += jnp.dot(feat.astype(jnp.bfloat16), w1_ref[0],
                          preferred_element_type=jnp.float32)

    # ---- MLP tail on the last reduction step ----
    @pl.when(l == pl.num_programs(0) - 1)
    def _tail():
        h = jnp.maximum(h_scr[...] + b1_ref[...], 0.0)
        h = jnp.dot(h.astype(jnp.bfloat16), w2_ref[...],
                    preferred_element_type=jnp.float32)
        h = jnp.maximum(h + b2_ref[...], 0.0)
        out = jnp.dot(h.astype(jnp.bfloat16), w3_ref[...],
                      preferred_element_type=jnp.float32)
        o_ref[...] = out + b3_ref[...]


def vggmel_forward(x, params):
    """x: (B, C_IN, L) f32, NCL layout (PyTorch Conv1d convention)."""
    (wct, bc, w1p, b1, w2, b2, w3, b3) = params

    # Tiny host-side layout plumbing (<1 KiB): channels-last so OC lands on the
    # lane axis in-kernel, plus the PAD=1 zero pad.
    x_cl = jnp.transpose(x, (0, 2, 1))                          # (B, L, C_IN)
    x_cl = jnp.pad(x_cl, ((0, 0), (PAD, PAD), (0, 0)))          # (B, L_PAD, C_IN)

    flops = 2 * (B * L * K * C_IN * OC
                 + B * FEAT * H1 + B * H1 * H2 + B * H2 * NCLS)
    bytes_accessed = (B * L_PAD * C_IN * 4
                      + K * C_IN * OC * 4 + OC * 4
                      + FEAT * H1 * 2 + H1 * 4
                      + H1 * H2 * 2 + H2 * 4
                      + H2 * NCLS * 2 + NCLS * 4
                      + B * NCLS * 4)

    out = pl.pallas_call(
        vggmel_kernel,
        out_shape=jax.ShapeDtypeStruct((B, NCLS), jnp.float32),
        grid_spec=pltpu.PrefetchScalarGridSpec(
            num_scalar_prefetch=0,
            grid=(L_OUT,),
            in_specs=[
                pl.BlockSpec((B, L_PAD, C_IN), lambda l: (0, 0, 0)),
                pl.BlockSpec((K, C_IN, OC), lambda l: (0, 0, 0)),
                pl.BlockSpec((1, OC), lambda l: (0, 0)),
                pl.BlockSpec((1, OC, H1), lambda l: (l, 0, 0)),   # streamed w1
                pl.BlockSpec((1, H1), lambda l: (0, 0)),
                pl.BlockSpec((H1, H2), lambda l: (0, 0)),
                pl.BlockSpec((1, H2), lambda l: (0, 0)),
                pl.BlockSpec((H2, NCLS), lambda l: (0, 0)),
                pl.BlockSpec((1, NCLS), lambda l: (0, 0)),
            ],
            out_specs=pl.BlockSpec((B, NCLS), lambda l: (0, 0)),
            scratch_shapes=[
                pltpu.VMEM((B, H1), jnp.float32),   # first-Linear accumulator
            ],
        ),
        cost_estimate=pl.CostEstimate(flops=flops, transcendentals=0,
                                      bytes_accessed=bytes_accessed),
        # Resident footprint ~5.5 MiB (w2 double-buffered dominates) — well
        # inside the default scoped VMEM limit on v5e/v6e/v7x.
        compiler_params=pltpu.CompilerParams(
            dimension_semantics=("arbitrary",)),   # reduction over L_OUT
    )(x_cl, wct, bc, w1p, b1, w2, b2, w3, b3)
    return out


def init_params(key):
    """Parameters are stored in kernel-friendly layouts.

    Mapping from a PyTorch checkpoint (one-time, host-side):
      wct  = wc_torch.transpose(2, 1, 0)                        # (K, C_IN, OC)
      w1p  = W1_torch.T.reshape(OC, L_OUT, H1).transpose(1,0,2) # (L_OUT, OC, H1)
      w2   = W2_torch.T ;  w3 = W3_torch.T                      # (in, out)
    so that the fused kernel computes exactly torch's
      classifier(x.view(B, -1)) with x of shape (B, 256, 6).
    MLP weights are bf16 (the MLP is weight-DMA-bound); accumulation is f32.
    Activations are cast to bf16 at each Linear (small ~1e-2 relative drift
    vs. an all-f32 PyTorch reference).
    """
    ks = jax.random.split(key, 8)
    scale = 0.05
    wct = scale * jax.random.normal(ks[0], (K, C_IN, OC), jnp.float32)
    bc = scale * jax.random.normal(ks[1], (1, OC), jnp.float32)
    w1p = (scale * jax.random.normal(ks[2], (L_OUT, OC, H1), jnp.float32)
           ).astype(jnp.bfloat16)
    b1 = scale * jax.random.normal(ks[3], (1, H1), jnp.float32)
    w2 = (scale * jax.random.normal(ks[4], (H1, H2), jnp.float32)
          ).astype(jnp.bfloat16)
    b2 = scale * jax.random.normal(ks[5], (1, H2), jnp.float32)
    w3 = (scale * jax.random.normal(ks[6], (H2, NCLS), jnp.float32)
          ).astype(jnp.bfloat16)
    b3 = scale * jax.random.normal(ks[7], (1, NCLS), jnp.float32)
    return (wct, bc, w1p, b1, w2, b2, w3, b3)


if __name__ == "__main__":
    key = jax.random.PRNGKey(0)
    k_x, k_p = jax.random.split(key)
    x = jax.random.normal(k_x, (B, C_IN, L), jnp.float32)   # NCL layout
    params = init_params(k_p)

    out = jax.jit(vggmel_forward)(x, params)
    out = jax.block_until_ready(out)
    assert out.shape == (B, NCLS), out.shape
    assert out.dtype == jnp.float32
    print("KERNEL_OK")
</pallas_src>

<mosaic_0001>
module attributes {stable_mosaic.version = 11 : i64} {
  func.func @vggmel_kernel(%arg0: i32, %arg1: memref<2x26x4xf32, #tpu.memory_space<vmem>>, %arg2: memref<3x4x256xf32, #tpu.memory_space<vmem>>, %arg3: memref<1x256xf32, #tpu.memory_space<vmem>>, %arg4: memref<1x256x1024xbf16, #tpu.memory_space<vmem>>, %arg5: memref<1x1024xf32, #tpu.memory_space<vmem>>, %arg6: memref<1024x1024xbf16, #tpu.memory_space<vmem>>, %arg7: memref<1x1024xf32, #tpu.memory_space<vmem>>, %arg8: memref<1024x12xbf16, #tpu.memory_space<vmem>>, %arg9: memref<1x12xf32, #tpu.memory_space<vmem>>, %arg10: memref<2x12xf32, #tpu.memory_space<vmem>>, %arg11: memref<2x1024xf32, #tpu.memory_space<vmem>>) attributes {dimension_semantics = [#tpu.dimension_semantics<arbitrary>], iteration_bounds = array<i64: 6>, scalar_prefetch = 0 : i64, scratch_operands = 1 : i64, tpu.core_type = #tpu.core_type<tc>, window_params = [{pipeline_mode = #tpu.pipeline_mode<synchronous>, transform_indices = @transform_0, window_bounds = array<i64: 2, 26, 4>}, {pipeline_mode = #tpu.pipeline_mode<synchronous>, transform_indices = @transform_1, window_bounds = array<i64: 3, 4, 256>}, {pipeline_mode = #tpu.pipeline_mode<synchronous>, transform_indices = @transform_2, window_bounds = array<i64: 1, 256>}, {transform_indices = @transform_3, window_bounds = array<i64: 1, 256, 1024>}, {pipeline_mode = #tpu.pipeline_mode<synchronous>, transform_indices = @transform_4, window_bounds = array<i64: 1, 1024>}, {pipeline_mode = #tpu.pipeline_mode<synchronous>, transform_indices = @transform_5, window_bounds = array<i64: 1024, 1024>}, {pipeline_mode = #tpu.pipeline_mode<synchronous>, transform_indices = @transform_6, window_bounds = array<i64: 1, 1024>}, {pipeline_mode = #tpu.pipeline_mode<synchronous>, transform_indices = @transform_7, window_bounds = array<i64: 1024, 12>}, {pipeline_mode = #tpu.pipeline_mode<synchronous>, transform_indices = @transform_8, window_bounds = array<i64: 1, 12>}, {pipeline_mode = #tpu.pipeline_mode<synchronous>, transform_indices = @transform_9, window_bounds = array<i64: 2, 12>}]} {
    %c0_i32 = arith.constant 0 : i32
    %0 = arith.cmpi eq, %arg0, %c0_i32 : i32
    %1 = arith.extui %0 : i1 to i32
    %c0_i32_0 = arith.constant 0 : i32
    %2 = arith.cmpi ne, %1, %c0_i32_0 : i32
    scf.if %2 {
      %cst_28 = arith.constant 0.000000e+00 : f32
      %55 = vector.broadcast %cst_28 : f32 to vector<2x1024xf32>
      %c0_29 = arith.constant 0 : index
      %c0_30 = arith.constant 0 : index
      %56 = vector.load %arg11[%c0_29, %c0_30] : memref<2x1024xf32, #tpu.memory_space<vmem>>, vector<2x1024xf32>
      tpu.vector_store %arg11[%c0_29, %c0_30], %55 {strides = array<i32>} : memref<2x1024xf32, #tpu.memory_space<vmem>>, vector<2x1024xf32>,
    } else {
    }
    %c4_i32 = arith.constant 4 : i32
    %3 = arith.muli %arg0, %c4_i32 : i32
    %4 = tpu.assume_multiple %3, 4 : i32
    %c0 = arith.constant 0 : index
    %5 = arith.index_cast %4 : i32 to index
    %c0_1 = arith.constant 0 : index
    %6 = vector.load %arg1[%c0, %5, %c0_1] : memref<2x26x4xf32, #tpu.memory_space<vmem>>, vector<1x6x4xf32>
    %7 = vector.shape_cast %6 : vector<1x6x4xf32> to vector<6x4xf32>
    %c1 = arith.constant 1 : index
    %8 = arith.index_cast %4 : i32 to index
    %c0_2 = arith.constant 0 : index
    %9 = vector.load %arg1[%c1, %8, %c0_2] : memref<2x26x4xf32, #tpu.memory_space<vmem>>, vector<1x6x4xf32>
    %10 = vector.shape_cast %9 : vector<1x6x4xf32> to vector<6x4xf32>
    %cst = arith.constant 0.000000e+00 : f32
    %11 = vector.broadcast %cst : f32 to vector<8x256xf32>
    %12 = vector.extract_strided_slice %7 {offsets = [0, 0], sizes = [4, 4], strides = [1, 1]} : vector<6x4xf32> to vector<4x4xf32>
    %13 = vector.extract_strided_slice %10 {offsets = [0, 0], sizes = [4, 4], strides = [1, 1]} : vector<6x4xf32> to vector<4x4xf32>
    %14 = tpu.concatenate %12, %13 in 0 : vector<4x4xf32>, vector<4x4xf32> -> vector<8x4xf32>
    %c0_3 = arith.constant 0 : index
    %c0_4 = arith.constant 0 : index
    %c0_5 = arith.constant 0 : index
    %15 = vector.load %arg2[%c0_3, %c0_4, %c0_5] : memref<3x4x256xf32, #tpu.memory_space<vmem>>, vector<1x4x256xf32>
    %16 = vector.shape_cast %15 : vector<1x4x256xf32> to vector<4x256xf32>
    %cst_6 = arith.constant dense<0.000000e+00> : vector<8x256xf32>
    %17 = tpu.matmul %14, %16, %cst_6 {dimension_numbers = #tpu.dot_dimension_numbers<[1], [0], [0], [1], [0, 0, 1, 1], [], []>} : vector<8x4xf32>, vector<4x256xf32>, vector<8x256xf32> -> vector<8x256xf32>
    %18 = arith.addf %11, %17 : vector<8x256xf32>
    %19 = vector.extract_strided_slice %7 {offsets = [1, 0], sizes = [4, 4], strides = [1, 1]} : vector<6x4xf32> to vector<4x4xf32>
    %20 = vector.extract_strided_slice %10 {offsets = [1, 0], sizes = [4, 4], strides = [1, 1]} : vector<6x4xf32> to vector<4x4xf32>
    %21 = tpu.concatenate %19, %20 in 0 : vector<4x4xf32>, vector<4x4xf32> -> vector<8x4xf32>
    %c1_7 = arith.constant 1 : index
    %c0_8 = arith.constant 0 : index
    %c0_9 = arith.constant 0 : index
    %22 = vector.load %arg2[%c1_7, %c0_8, %c0_9] : memref<3x4x256xf32, #tpu.memory_space<vmem>>, vector<1x4x256xf32>
    %23 = vector.shape_cast %22 : vector<1x4x256xf32> to vector<4x256xf32>
    %cst_10 = arith.constant dense<0.000000e+00> : vector<8x256xf32>
    %24 = tpu.matmul %21, %23, %cst_10 {dimension_numbers = #tpu.dot_dimension_numbers<[1], [0], [0], [1], [0, 0, 1, 1], [], []>} : vector<8x4xf32>, vector<4x256xf32>, vector<8x256xf32> -> vector<8x256xf32>
    %25 = arith.addf %18, %24 : vector<8x256xf32>
    %26 = vector.extract_strided_slice %7 {offsets = [2, 0], sizes = [4, 4], strides = [1, 1]} : vector<6x4xf32> to vector<4x4xf32>
    %27 = vector.extract_strided_slice %10 {offsets = [2, 0], sizes = [4, 4], strides = [1, 1]} : vector<6x4xf32> to vector<4x4xf32>
    %28 = tpu.concatenate %26, %27 in 0 : vector<4x4xf32>, vector<4x4xf32> -> vector<8x4xf32>
    %c2 = arith.constant 2 : index
    %c0_11 = arith.constant 0 : index
    %c0_12 = arith.constant 0 : index
    %29 = vector.load %arg2[%c2, %c0_11, %c0_12] : memref<3x4x256xf32, #tpu.memory_space<vmem>>, vector<1x4x256xf32>
    %30 = vector.shape_cast %29 : vector<1x4x256xf32> to vector<4x256xf32>
    %cst_13 = arith.constant dense<0.000000e+00> : vector<8x256xf32>
    %31 = tpu.matmul %28, %30, %cst_13 {dimension_numbers = #tpu.dot_dimension_numbers<[1], [0], [0], [1], [0, 0, 1, 1], [], []>} : vector<8x4xf32>, vector<4x256xf32>, vector<8x256xf32> -> vector<8x256xf32>
    %32 = arith.addf %25, %31 : vector<8x256xf32>
    %c0_14 = arith.constant 0 : index
    %c0_15 = arith.constant 0 : index
    %33 = vector.load %arg3[%c0_14, %c0_15] : memref<1x256xf32, #tpu.memory_space<vmem>>, vector<1x256xf32>
    %34 = vector.broadcast %33 : vector<1x256xf32> to vector<8x256xf32>
    %35 = arith.addf %32, %34 : vector<8x256xf32>
    %cst_16 = arith.constant 0.000000e+00 : f32
    %36 = vector.broadcast %cst_16 : f32 to vector<8x256xf32>
    %37 = arith.maximumf %35, %36 : vector<8x256xf32>
    %38 = vector.extract_strided_slice %37 {offsets = [0, 0], sizes = [4, 256], strides = [1, 1]} : vector<8x256xf32> to vector<4x256xf32>
    %cst_17 = arith.constant dense<0xFF800000> : vector<256xf32>
    %39 = vector.multi_reduction <maximumf>, %38, %cst_17 [0] : vector<4x256xf32> to vector<256xf32>
    %40 = vector.shape_cast %39 : vector<256xf32> to vector<1x256xf32>
    %41 = vector.extract_strided_slice %37 {offsets = [4, 0], sizes = [4, 256], strides = [1, 1]} : vector<8x256xf32> to vector<4x256xf32>
    %cst_18 = arith.constant dense<0xFF800000> : vector<256xf32>
    %42 = vector.multi_reduction <maximumf>, %41, %cst_18 [0] : vector<4x256xf32> to vector<256xf32>
    %43 = vector.shape_cast %42 : vector<256xf32> to vector<1x256xf32>
    %44 = tpu.concatenate %40, %43 in 0 : vector<1x256xf32>, vector<1x256xf32> -> vector<2x256xf32>
    %c0_19 = arith.constant 0 : index
    %c0_20 = arith.constant 0 : index
    %45 = vector.load %arg11[%c0_19, %c0_20] : memref<2x1024xf32, #tpu.memory_space<vmem>>, vector<2x1024xf32>
    %46 = arith.truncf %44 : vector<2x256xf32> to vector<2x256xbf16>
    %c0_21 = arith.constant 0 : index
    %c0_22 = arith.constant 0 : index
    %c0_23 = arith.constant 0 : index
    %47 = vector.load %arg4[%c0_21, %c0_22, %c0_23] : memref<1x256x1024xbf16, #tpu.memory_space<vmem>>, vector<1x256x1024xbf16>
    %48 = vector.shape_cast %47 : vector<1x256x1024xbf16> to vector<256x1024xbf16>
    %cst_24 = arith.constant dense<0.000000e+00> : vector<2x1024xf32>
    %49 = tpu.matmul %46, %48, %cst_24 {dimension_numbers = #tpu.dot_dimension_numbers<[1], [0], [0], [1], [0, 0, 1, 1], [], []>} : vector<2x256xbf16>, vector<256x1024xbf16>, vector<2x1024xf32> -> vector<2x1024xf32>
    %50 = arith.addf %45, %49 : vector<2x1024xf32>
    %c0_25 = arith.constant 0 : index
    %c0_26 = arith.constant 0 : index
    %51 = vector.load %arg11[%c0_25, %c0_26] : memref<2x1024xf32, #tpu.memory_space<vmem>>, vector<2x1024xf32>
    tpu.vector_store %arg11[%c0_25, %c0_26], %50 {strides = array<i32>} : memref<2x1024xf32, #tpu.memory_space<vmem>>, vector<2x1024xf32>,
    %c5_i32 = arith.constant 5 : i32
    %52 = arith.cmpi eq, %arg0, %c5_i32 : i32
    %53 = arith.extui %52 : i1 to i32
    %c0_i32_27 = arith.constant 0 : i32
    %54 = arith.cmpi ne, %53, %c0_i32_27 : i32
    scf.if %54 {
      %c0_28 = arith.constant 0 : index
      %c0_29 = arith.constant 0 : index
      %55 = vector.load %arg11[%c0_28, %c0_29] : memref<2x1024xf32, #tpu.memory_space<vmem>>, vector<2x1024xf32>
      %c0_30 = arith.constant 0 : index
      %c0_31 = arith.constant 0 : index
      %56 = vector.load %arg5[%c0_30, %c0_31] : memref<1x1024xf32, #tpu.memory_space<vmem>>, vector<1x1024xf32>
      %57 = vector.broadcast %56 : vector<1x1024xf32> to vector<2x1024xf32>
      %58 = arith.addf %55, %57 : vector<2x1024xf32>
      %cst_32 = arith.constant 0.000000e+00 : f32
      %59 = vector.broadcast %cst_32 : f32 to vector<2x1024xf32>
      %60 = arith.maximumf %58, %59 : vector<2x1024xf32>
      %61 = arith.truncf %60 : vector<2x1024xf32> to vector<2x1024xbf16>
      %c0_33 = arith.constant 0 : index
      %c0_34 = arith.constant 0 : index
      %62 = vector.load %arg6[%c0_33, %c0_34] : memref<1024x1024xbf16, #tpu.memory_space<vmem>>, vector<1024x1024xbf16>
      %cst_35 = arith.constant dense<0.000000e+00> : vector<2x1024xf32>
      %63 = tpu.matmul %61, %62, %cst_35 {dimension_numbers = #tpu.dot_dimension_numbers<[1], [0], [0], [1], [0, 0, 1, 1], [], []>} : vector<2x1024xbf16>, vector<1024x1024xbf16>, vector<2x1024xf32> -> vector<2x1024xf32>
      %c0_36 = arith.constant 0 : index
      %c0_37 = arith.constant 0 : index
      %64 = vector.load %arg7[%c0_36, %c0_37] : memref<1x1024xf32, #tpu.memory_space<vmem>>, vector<1x1024xf32>
      %65 = vector.broadcast %64 : vector<1x1024xf32> to vector<2x1024xf32>
      %66 = arith.addf %63, %65 : vector<2x1024xf32>
      %cst_38 = arith.constant 0.000000e+00 : f32
      %67 = vector.broadcast %cst_38 : f32 to vector<2x1024xf32>
      %68 = arith.maximumf %66, %67 : vector<2x1024xf32>
      %69 = arith.truncf %68 : vector<2x1024xf32> to vector<2x1024xbf16>
      %c0_39 = arith.constant 0 : index
      %c0_40 = arith.constant 0 : index
      %70 = vector.load %arg8[%c0_39, %c0_40] : memref<1024x12xbf16, #tpu.memory_space<vmem>>, vector<1024x12xbf16>
      %cst_41 = arith.constant dense<0.000000e+00> : vector<2x12xf32>
      %71 = tpu.matmul %69, %70, %cst_41 {dimension_numbers = #tpu.dot_dimension_numbers<[1], [0], [0], [1], [0, 0, 1, 1], [], []>} : vector<2x1024xbf16>, vector<1024x12xbf16>, vector<2x12xf32> -> vector<2x12xf32>
      %c0_42 = arith.constant 0 : index
      %c0_43 = arith.constant 0 : index
      %72 = vector.load %arg9[%c0_42, %c0_43] : memref<1x12xf32, #tpu.memory_space<vmem>>, vector<1x12xf32>
      %73 = vector.broadcast %72 : vector<1x12xf32> to vector<2x12xf32>
      %74 = arith.addf %71, %73 : vector<2x12xf32>
      %c0_44 = arith.constant 0 : index
      %c0_45 = arith.constant 0 : index
      %75 = vector.load %arg10[%c0_44, %c0_45] : memref<2x12xf32, #tpu.memory_space<vmem>>, vector<2x12xf32>
      tpu.vector_store %arg10[%c0_44, %c0_45], %74 {strides = array<i32>} : memref<2x12xf32, #tpu.memory_space<vmem>>, vector<2x12xf32>,
    } else {
    }
    return
  }
  func.func @transform_0(%arg0: i32) -> (i32, i32, i32) {
    %c0_i32 = arith.constant 0 : i32
    %c0_i32_0 = arith.constant 0 : i32
    %c0_i32_1 = arith.constant 0 : i32
    %c0_i32_2 = arith.constant 0 : i32
    return %c0_i32, %c0_i32_0, %c0_i32_1 : i32, i32, i32
  }
  func.func @transform_1(%arg0: i32) -> (i32, i32, i32) {
    %c0_i32 = arith.constant 0 : i32
    %c0_i32_0 = arith.constant 0 : i32
    %c0_i32_1 = arith.constant 0 : i32
    %c0_i32_2 = arith.constant 0 : i32
    return %c0_i32, %c0_i32_0, %c0_i32_1 : i32, i32, i32
  }
  func.func @transform_2(%arg0: i32) -> (i32, i32) {
    %c0_i32 = arith.constant 0 : i32
    %c0_i32_0 = arith.constant 0 : i32
    %c0_i32_1 = arith.constant 0 : i32
    return %c0_i32, %c0_i32_0 : i32, i32
  }
  func.func @transform_3(%arg0: i32) -> (i32, i32, i32) {
    %c0_i32 = arith.constant 0 : i32
    %c0_i32_0 = arith.constant 0 : i32
    %c0_i32_1 = arith.constant 0 : i32
    return %arg0, %c0_i32, %c0_i32_0 : i32, i32, i32
  }
  func.func @transform_4(%arg0: i32) -> (i32, i32) {
    %c0_i32 = arith.constant 0 : i32
    %c0_i32_0 = arith.constant 0 : i32
    %c0_i32_1 = arith.constant 0 : i32
    return %c0_i32, %c0_i32_0 : i32, i32
  }
  func.func @transform_5(%arg0: i32) -> (i32, i32) {
    %c0_i32 = arith.constant 0 : i32
    %c0_i32_0 = arith.constant 0 : i32
    %c0_i32_1 = arith.constant 0 : i32
    return %c0_i32, %c0_i32_0 : i32, i32
  }
  func.func @transform_6(%arg0: i32) -> (i32, i32) {
    %c0_i32 = arith.constant 0 : i32
    %c0_i32_0 = arith.constant 0 : i32
    %c0_i32_1 = arith.constant 0 : i32
    return %c0_i32, %c0_i32_0 : i32, i32
  }
  func.func @transform_7(%arg0: i32) -> (i32, i32) {
    %c0_i32 = arith.constant 0 : i32
    %c0_i32_0 = arith.constant 0 : i32
    %c0_i32_1 = arith.constant 0 : i32
    return %c0_i32, %c0_i32_0 : i32, i32
  }
  func.func @transform_8(%arg0: i32) -> (i32, i32) {
    %c0_i32 = arith.constant 0 : i32
    %c0_i32_0 = arith.constant 0 : i32
    %c0_i32_1 = arith.constant 0 : i32
    return %c0_i32, %c0_i32_0 : i32, i32
  }
  func.func @transform_9(%arg0: i32) -> (i32, i32) {
    %c0_i32 = arith.constant 0 : i32
    %c0_i32_0 = arith.constant 0 : i32
    %c0_i32_1 = arith.constant 0 : i32
    return %c0_i32, %c0_i32_0 : i32, i32
  }
}

</mosaic_0001>

<bundles_post_ra>
// kernel: vggmel_forward.1
= control target key start
LH: loop header
LB: loop body
LE: loop exit
PB: predicated region body
PF: predicated region fallthrough
CT: control target
= control target key end

     0   :  { %s8716_s0 = inlined_call_operand.vmem [shape: f32[2,26,4], index: 0, kind: input, shape index: {}]   ;;  %s8717_s1 = inlined_call_operand.hbm [shape: f32[3,4,256], index: 1, kind: input, shape index: {}]   ;;  %s8718_s2 = inlined_call_operand.hbm [shape: f32[1,256], index: 2, kind: input, shape index: {}]   ;;  %s8719_s3 = inlined_call_operand.hbm [shape: bf16[6,256,1024], index: 3, kind: input, shape index: {}]   ;;  %s8720_s4 = inlined_call_operand.hbm [shape: f32[1,1024], index: 4, kind: input, shape index: {}]   ;;  %s8721_s5 = inlined_call_operand.hbm [shape: bf16[1024,1024], index: 5, kind: input, shape index: {}]   ;;  %s8722_s6 = inlined_call_operand.hbm [shape: f32[1,1024], index: 6, kind: input, shape index: {}]   ;;  %s8723_s7 = inlined_call_operand.vmem [shape: bf16[1024,12], index: 7, kind: input, shape index: {}]   ;;  %s8724_s8 = inlined_call_operand.hbm [shape: f32[1,12], index: 8, kind: input, shape index: {}]   ;;  %s8725_s9 = inlined_call_operand.hbm [shape: f32[2,12], index: 9, kind: output, shape index: {}]  }
   0x1   :  { %8729 = sst [smem:[#allocation23_spill]] %s8717_s1 }
   0x2   :  { %8730 = sst [smem:[#allocation24_spill]] %s8718_s2 }
   0x3   :  { %8731 = sst [smem:[#allocation25_spill]] %s8725_s9 }
   0x4   :  { %14 = vsyncpa [#allocation4], 0 }
   0x5   :  { %15 = vsyncpa [#allocation7], 0 }
   0x6   :  { %16 = vsyncpa [#allocation11], 0 }
   0x7   :  { %17 = vsyncpa [#allocation14], 0 }
   0x8   :  { %18 = vsyncpa [#allocation5], 0  ;;  %s7865_s30 = smov 0   ;;  %s7867_s10 = smov 0  }
   0x9   :  { %s7869_s11 = smov 0   ;;  %s7871_s12 = smov 0  }
   0xa LB: > { %s7800_s13 = smov [#allocation3]   ;;  %s7886_s15 = sadd.s32 4294967295, %s7798_s12   ;;  %s7798_s12 = sphi %s7871_s12, %s8756_s12   ;;  %s7794_s11 = sphi %s7869_s11, %s8755_s11   ;;  %s7790_s10 = sphi %s7867_s10, %s8754_s10   ;;  %s7786_s30 = sphi %s7865_s30, %s8753_s30  }
   0xb   : > { %s259_s14 = sshll.u32 %s7800_s13, 4  ;;  %p6444_p0 = scmp.ge.s32.totalorder %s7798_s12, 1  ;;  %s7892_s14 = int_to_ptr.vmem [resolvable:$true] %s259_s14 }
   0xc   : > { %p8727_p1 = scmp.eq.s32.totalorder %s7886_s15, 0  ;;  %p244_p2 = scmp.lt.s32.totalorder %s7798_s12, 7 }
   0xd   : > { %s7801_s17 = smov [#allocation6]   ;;  %s7802_s20 = smov [#allocation10]  }
   0xe   : > { %p7894_p4 = pnand %p6444_p0, %p244_p2  ;;  %s273_s18 = sshll.u32 %s7801_s17, 4  ;;  %s7906_s18 = int_to_ptr.vmem [resolvable:$true] %s273_s18 }
   0xf   : > { %s294_s21 = sshll.u32 %s7802_s20, 4  ;;  %s8734_s1 = sld [smem:[#allocation23_spill]]  ;;  %s7908_s21 = int_to_ptr.vmem [resolvable:$true] %s294_s21 }
  0x10   : > { %s8732_s16 = scalar_select %p7894_p4, 1, 0 }
  0x11   : > { %p7365_p5 = pneg %p7894_p4 }
  0x13   : > { %p7902_p6 = pnand %p7365_p5, %p8727_p1 }
  0x15   : > { %s7516_s24 = scalar_lea.hbm %s8734_s1, 384  ;;  %p7918_p8 = pneg %p7902_p6 }
  0x16   : > { %p7517_p7 = scmp.ne.s32.totalorder %s8734_s1, %s7516_s24  ;;  %p7523_p11 = scmp.lt.u32.totalorder %s7516_s24, %s8734_s1 }
  0x18   : > { %p7519_p9 = pnand %p7918_p8, %p7517_p7 }
  0x1a   : > { %p7520_p10 = pneg %p7519_p9 }
  0x1c   : > { %p7525_p12 = pnand %p7523_p11, %p7520_p10 }
  0x1e   : > { %7528 = shalt.err (!%p7525_p12)
}
  0x1f   : > { %s7529_s13 = scalar_lea.vmem %s7892_s14, 384  ;;  %p7537_p5 = scmp.lt.s32.totalorder %s7892_s14, %s7892_s14 }
  0x20   : > { %p7530_p13 = scmp.ne.s32.totalorder %s7892_s14, %s7529_s13  ;;  %p7538_p3 = scmp.lt.s32.totalorder %s7529_s13, %s7529_s13 }
  0x22   : > { %p7532_p0 = pnand %p7530_p13, %p7918_p8  ;;  %p7539_p7 = por %p7538_p3, %p7537_p5 }
  0x24   : > { %p7533_p2 = pneg %p7532_p0 }
  0x26   : > { %p7540_p9 = pnand %p7539_p7, %p7533_p2 }
  0x28   : > { %7543 = shalt.err (!%p7540_p9)
}
  0x29   : > { %s7803_s17 = smov 128   ;;  %s7804_s20 = smov 8  }
  0x2a   : > { %7368 = dma.hbm_to_vmem [thread:$0]  (!%p7902_p6), %s8734_s1, 384, %s7892_s14, [#allocation4], %s7803_s17, %s7803_s17, %s7804_s20  }
  0x2b   : > { %s8736_s2 = sld [smem:[#allocation24_spill]] }
  0x31   : > { %s7544_s26 = scalar_lea.hbm %s8736_s2, 32 }
  0x32   : > { %p7545_p3 = scmp.ne.s32.totalorder %s8736_s2, %s7544_s26  ;;  %p7551_p12 = scmp.lt.u32.totalorder %s7544_s26, %s8736_s2 }
  0x34   : > { %p7547_p10 = pnand %p7545_p3, %p7918_p8 }
  0x36   : > { %p7548_p11 = pneg %p7547_p10 }
  0x38   : > { %p7553_p13 = pnand %p7551_p12, %p7548_p11 }
  0x3a   : > { %7556 = shalt.err (!%p7553_p13)
}
  0x3b   : > { %s7557_s14 = scalar_lea.vmem %s7906_s18, 32  ;;  %p7565_p7 = scmp.lt.s32.totalorder %s7906_s18, %s7906_s18 }
  0x3c   : > { %p7558_p0 = scmp.ne.s32.totalorder %s7906_s18, %s7557_s14  ;;  %p7566_p9 = scmp.lt.s32.totalorder %s7557_s14, %s7557_s14 }
  0x3e   : > { %p7560_p2 = pnand %p7558_p0, %p7918_p8  ;;  %p7567_p3 = por %p7566_p9, %p7565_p7 }
  0x40   : > { %p7561_p5 = pneg %p7560_p2 }
  0x42   : > { %p7568_p10 = pnand %p7567_p3, %p7561_p5 }
  0x44   : > { %7571 = shalt.err (!%p7568_p10)
}
  0x45   : > { %7371 = dma.hbm_to_vmem [thread:$0]  (!%p7902_p6), %s8736_s2, 32, %s7906_s18, [#allocation7]  }
  0x46   : > { %s7572_s23 = scalar_lea.hbm %s8721_s5, 65536 }
  0x47   : > { %p7573_p11 = scmp.ne.s32.totalorder %s8721_s5, %s7572_s23  ;;  %p7579_p0 = scmp.lt.u32.totalorder %s7572_s23, %s8721_s5 }
  0x49   : > { %p7575_p12 = pnand %p7573_p11, %p7918_p8 }
  0x4b   : > { %p7576_p13 = pneg %p7575_p12 }
  0x4d   : > { %p7581_p2 = pnand %p7579_p0, %p7576_p13 }
  0x4f   : > { %7584 = shalt.err (!%p7581_p2)
}
  0x50   : > { %s7585_s18 = scalar_lea.vmem %s7908_s21, 65536  ;;  %p7593_p3 = scmp.lt.s32.totalorder %s7908_s21, %s7908_s21 }
  0x51   : > { %p7586_p5 = scmp.ne.s32.totalorder %s7908_s21, %s7585_s18  ;;  %p7594_p10 = scmp.lt.s32.totalorder %s7585_s18, %s7585_s18 }
  0x53   : > { %p7588_p7 = pnand %p7586_p5, %p7918_p8  ;;  %p7595_p11 = por %p7594_p10, %p7593_p3 }
  0x55   : > { %p7589_p9 = pneg %p7588_p7 }
  0x57   : > { %p7596_p12 = pnand %p7595_p11, %p7589_p9 }
  0x59   : > { %7599 = shalt.err (!%p7596_p12)
}
  0x5a   : > { %s7805_s29 = smov 512   ;;  %s7806_s13 = smov 32  }
  0x5b   : > { %7377 = dma.hbm_to_vmem [thread:$0]  (!%p7902_p6), %s8721_s5, 65536, %s7908_s21, [#allocation11], %s7805_s29, %s7805_s29, %s7806_s13  }
  0x5c   : > { %s7807_s17 = smov [#allocation9]   ;;  %s7808_s22 = smov [#allocation12]  }
  0x5d   : > { %s284_s20 = sshll.u32 %s7807_s17, 4  ;;  %s308_s23 = sshll.u32 %s7808_s22, 4  ;;  %s285_s20 = int_to_ptr.vmem [resolvable:$true] %s284_s20  ;;  %s309_s23 = int_to_ptr.vmem [resolvable:$true] %s308_s23 }
  0x5e   : > { %s7600_s26 = scalar_lea.hbm %s8720_s4, 128 }
  0x5f   : > { %p7601_p13 = scmp.ne.s32.totalorder %s8720_s4, %s7600_s26  ;;  %p7607_p5 = scmp.lt.u32.totalorder %s7600_s26, %s8720_s4 }
  0x61   : > { %p7603_p0 = pnand %p7601_p13, %p7918_p8 }
  0x63   : > { %p7604_p2 = pneg %p7603_p0 }
  0x65   : > { %p7609_p7 = pnand %p7607_p5, %p7604_p2 }
  0x67   : > { %7612 = shalt.err (!%p7609_p7)
}
  0x68   : > { %s7613_s21 = scalar_lea.vmem %s285_s20, 128  ;;  %p7621_p11 = scmp.lt.s32.totalorder %s285_s20, %s285_s20 }
  0x69   : > { %p7614_p9 = scmp.ne.s32.totalorder %s285_s20, %s7613_s21  ;;  %p7622_p12 = scmp.lt.s32.totalorder %s7613_s21, %s7613_s21 }
  0x6b   : > { %p7616_p3 = pnand %p7614_p9, %p7918_p8  ;;  %p7623_p1 = por %p7622_p12, %p7621_p11 }
  0x6d   : > { %p7617_p10 = pneg %p7616_p3 }
  0x6f   : > { %p7624_p4 = pnand %p7623_p1, %p7617_p10 }
  0x71   : > { %7627 = shalt.err (!%p7624_p4)
}
  0x72   : > { %7374 = dma.hbm_to_vmem [thread:$0]  (!%p7902_p6), %s8720_s4, 128, %s285_s20, [#allocation7]  }
  0x73   : > { %s7628_s17 = scalar_lea.hbm %s8722_s6, 128 }
  0x74   : > { %p7629_p13 = scmp.ne.s32.totalorder %s8722_s6, %s7628_s17  ;;  %p7635_p4 = scmp.lt.u32.totalorder %s7628_s17, %s8722_s6 }
  0x76   : > { %p7631_p0 = pnand %p7629_p13, %p7918_p8 }
  0x78   : > { %p7632_p1 = pneg %p7631_p0 }
  0x7a   : > { %p7637_p2 = pnand %p7635_p4, %p7632_p1 }
  0x7c   : > { %7640 = shalt.err (!%p7637_p2)
}
  0x7d   : > { %s7641_s28 = scalar_lea.vmem %s309_s23, 128  ;;  %p7649_p3 = scmp.lt.s32.totalorder %s309_s23, %s309_s23 }
  0x7e   : > { %p7642_p5 = scmp.ne.s32.totalorder %s309_s23, %s7641_s28  ;;  %p7650_p10 = scmp.lt.s32.totalorder %s7641_s28, %s7641_s28 }
  0x80   : > { %p7644_p7 = pnand %p7642_p5, %p7918_p8  ;;  %p7651_p11 = por %p7650_p10, %p7649_p3 }
  0x82   : > { %p7645_p9 = pneg %p7644_p7 }
  0x84   : > { %p7652_p12 = pnand %p7651_p11, %p7645_p9 }
  0x86   : > { %7655 = shalt.err (!%p7652_p12)
}
  0x87   : > { %7380 = dma.hbm_to_vmem [thread:$0]  (!%p7902_p6), %s8722_s6, 128, %s309_s23, [#allocation11]  }
  0x88   : > { %s7809_s21 = smov [#allocation13]   ;;  %s7656_s2 = scalar_lea.hbm %s8724_s8, 16 }
  0x89   : > { %s322_s14 = sshll.u32 %s7809_s21, 4  ;;  %p7657_p13 = scmp.ne.s32.totalorder %s8724_s8, %s7656_s2  ;;  %s323_s14 = int_to_ptr.vmem [resolvable:$true] %s322_s14 }
  0x8a   : > { %p7663_p4 = scmp.lt.u32.totalorder %s7656_s2, %s8724_s8 }
  0x8b   : > { %p7659_p0 = pnand %p7657_p13, %p7918_p8 }
  0x8d   : > { %p7660_p1 = pneg %p7659_p0 }
  0x8f   : > { %p7665_p2 = pnand %p7663_p4, %p7660_p1 }
  0x91   : > { %7668 = shalt.err (!%p7665_p2)
}
  0x92   : > { %s7669_s23 = scalar_lea.vmem %s323_s14, 16  ;;  %s7676_s26 = scalar_lea.vmem %s323_s14, 32 }
  0x93   : > { %p7670_p5 = scmp.ne.s32.totalorder %s323_s14, %s7669_s23  ;;  %p7677_p3 = scmp.lt.s32.totalorder %s323_s14, %s323_s14 }
  0x94   : > { %p7678_p10 = scmp.lt.s32.totalorder %s7676_s26, %s7669_s23 }
  0x95   : > { %p7672_p7 = pnand %p7670_p5, %p7918_p8 }
  0x96   : > { %p7679_p11 = por %p7678_p10, %p7677_p3 }
  0x97   : > { %p7673_p9 = pneg %p7672_p7 }
  0x99   : > { %p7680_p12 = pnand %p7679_p11, %p7673_p9 }
  0x9b   : > { %7683 = shalt.err (!%p7680_p12)
}
  0x9c   : > { %7383 = dma.hbm_to_vmem [thread:$0]  (!%p7902_p6), %s8724_s8, 16, %s323_s14, [#allocation14]  }
  0x9d   : > { %s8043_s27 = sadd.s32 1, %s7798_s12   ;;  %s94_s19 = sadd.s32 1, %s7794_s11 }
  0x9e   : > { %s91_s18 = ssub.s32 %s7798_s12, %s8043_s27  ;;  %p101_p8 = scmp.ne.s32.totalorder %s7794_s11, %s7790_s10 }
  0x9f   : > { %p92_p13 = scmp.eq.s32.totalorder %s91_s18, 0  ;;  %p102_p0 = scmp.eq.s32.totalorder %s7798_s12, 0 }
  0xa0   : > { %p107_p1 = scmp.ne.s32.totalorder %s7790_s10, %s7786_s30  ;;  %p7394_p4 = scmp.lt.s32.totalorder %s7798_s12, 6 }
  0xa1   : > { %s8055_s21 = scalar_select %p92_p13, %s7794_s11, %s94_s19  }
  0xa2   : > { %p103_p2 = por %p102_p0, %p101_p8  ;;  %p8737_p5 = scmp.eq.s32.totalorder %s7886_s15, 0 }
  0xa3   : > { %s333_s1 = sand.u32 1, %s7798_s12   ;;  %s335_s14 = sand.u32 1, %s7794_s11  }
  0xa4   : > { %p8059_p7 = por %p8737_p5, %p107_p1  ;;  %s6452_s2 = sshll.u32 %s335_s14, 10 }
  0xa5   : > { %s7186_s17 = sshll.u32 %s7798_s12, 14  ;;  %s337_s30 = scalar_lea.vmem [#allocation8], %s6452_s2 }
  0xa6   : > { %s8069_s25 = scalar_lea.hbm %s8719_s3, %s7186_s17  ;;  %s344_s23 = sshll.u32 %s337_s30, 4  ;;  %s8071_s23 = int_to_ptr.vmem [resolvable:$true] %s344_s23 }
  0xa7   : > { %p8073_p6 = pnand %p7394_p4, %p103_p2  ;;  %s8077_s12 = scalar_lea.sflag [#allocation4], %s333_s1 }
  0xa8   : > { %s7684_s28 = scalar_lea.hbm %s8069_s25, 16384  ;;  %s7689_s18 = scalar_lea.hbm %s8719_s3, 98304 }
  0xa9   : > { %p7685_p9 = scmp.ne.s32.totalorder %s8069_s25, %s7684_s28  ;;  %p7686_p3 = pneg %p8073_p6 }
  0xaa   : > { %p7690_p12 = scmp.lt.u32.totalorder %s8069_s25, %s8719_s3  ;;  %p7691_p8 = scmp.lt.u32.totalorder %s7689_s18, %s7684_s28 }
  0xab   : > { %p7687_p10 = pnand %p7686_p3, %p7685_p9  ;;  %p7693_p0 = scmp.lt.u32.totalorder %s7684_s28, %s8069_s25 }
  0xac   : > { %p7692_p13 = por %p7691_p8, %p7690_p12 }
  0xad   : > { %p7688_p11 = pneg %p7687_p10 }
  0xae   : > { %p7694_p1 = por %p7693_p0, %p7692_p13 }
  0xb0   : > { %p7695_p4 = pnand %p7694_p1, %p7688_p11 }
  0xb2   : > { %7698 = shalt.err (!%p7695_p4)
}
  0xb3   : > { %s7699_s1 = scalar_lea.vmem %s8071_s23, 16384  ;;  %s7810_s17 = smov [#allocation8]  }
  0xb4   : > { %p7700_p2 = scmp.ne.s32.totalorder %s8071_s23, %s7699_s1  ;;  %s7704_s22 = sshll.u32 %s7810_s17, 4  ;;  %s7705_s22 = int_to_ptr.vmem [resolvable:$false] %s7704_s22 }
  0xb5   : > { %s7706_s24 = scalar_lea.vmem %s7705_s22, 32768  ;;  %p7707_p10 = scmp.lt.s32.totalorder %s8071_s23, %s7705_s22 }
  0xb6   : > { %p7702_p5 = pnand %p7700_p2, %p7686_p3  ;;  %p7708_p12 = scmp.lt.s32.totalorder %s7706_s24, %s7699_s1 }
  0xb8   : > { %p7703_p9 = pneg %p7702_p5  ;;  %p7709_p8 = por %p7708_p12, %p7707_p10 }
  0xba   : > { %p7710_p13 = pnand %p7709_p8, %p7703_p9 }
  0xbc   : > { %7713 = shalt.err (!%p7710_p13)
}
  0xbd   : > { %7387 = dma.hbm_to_vmem [thread:$0]  (!%p8073_p6), %s8069_s25, 16384, %s8071_s23, %s8077_s12, %s7805_s29, %s7805_s29, %s7806_s13  }
  0xbe   : > { %p8740_p3 = scmp.ne.s32.totalorder %s8732_s16, 0 }
  0xbf   : > { %p8741_p11 = scmp.eq.s32.totalorder (!%p8740_p3), %s7886_s15, 0 }
  0xc0   : > { %356 = sbr.rel (%p8740_p3) target bundleno = 1720 (0x6b8), region = 56 }
  0xc7   : > { %7757 = dma.done.wait (%p8741_p11), [#allocation4], 384   ;;  %p8742_p0 = pmov %p8741_p11 }
  0xc9   : > { %7759 = vsyncadd (%p8742_p0), [#allocation4], 4294966912  ;;  %p8743_p1 = pmov %p8742_p0 }
  0xca   : > { %p8744_p4 = pmov %p8742_p0 }
  0xcb   : > { %7761 = dma.done.wait (%p8743_p1), [#allocation7], 32  }
  0xcc   : > { %7763 = vsyncadd (%p8744_p4), [#allocation7], 4294967264  ;;  %s366_s30 = sand.u32 1, %s7886_s15   ;;  %s368_s29 = sand.u32 1, %s7790_s10  }
  0xcd   : > { %s6458_s13 = sshll.u32 %s368_s29, 10  ;;  %s367_s16 = scalar_lea.sflag [#allocation4], %s366_s30 }
  0xce   : > { %s8120_s25 = scalar_lea.vmem [#allocation8], %s6458_s13 }
  0xcf   : > { %7765 = dma.done.wait (%p8059_p7), %s367_s16, 16384  }
  0xd0   : > { %7767 = vsyncadd (%p8059_p7), %s367_s16, 4294950912  ;;  %p8745_p6 = pmov %p8742_p0 }
  0xd1   : > { %p8746_p2 = pmov %p8742_p0 }
  0xd2   : > { %7769 = dma.done.wait (%p8745_p6), [#allocation7], 128  }
  0xd3   : > { %7771 = vsyncadd (%p8746_p2), [#allocation7], 4294967168  ;;  %p8747_p5 = pmov %p8742_p0 }
  0xd4   : > { %p8748_p9 = pmov %p8742_p0 }
  0xd5   : > { %7773 = dma.done.wait (%p8747_p5), [#allocation11], 65664  }
  0xd6   : > { %7775 = vsyncadd (%p8748_p9), [#allocation11], 4294901632  ;;  %p8749_p10 = pmov %p8742_p0 }
  0xd7   : > { %p8750_p12 = pmov %p8742_p0 }
  0xd8   : > { %7777 = dma.done.wait (%p8749_p10), [#allocation14], 16  }
  0xd9   : > { %7779 = vsyncadd (%p8750_p12), [#allocation14], 4294967280  ;;  %p8751_p7 = scmp.ne.s32.totalorder %s7886_s15, 0 }
  0xda   : > { %v7811_v0 = vmov (!%p8751_p7), 0.0  }
  0xdb   : > { %420 = sbr.rel (%p8751_p7) target bundleno = 226 (0xe2), region = 88  ;;  %421 = vst [vmem:[#allocation2] sm:$0xff] (!%p8751_p7), %v7811_v0  ;;  %422 = vst [vmem:[#allocation2 + $0x8] sm:$0xff] (!%p8751_p7), %v7811_v0 }
  0xe2 PF: > { %vm432_vm0 = vcmask 1043456   ;;  %v434_v1 = vld [vmem:[#allocation3] sm:$0xff]  ;;  %v610_v2 = vld [vmem:[#allocation3 + $0x10] sm:$0xff]  ;;  %s6464_s9 = sshll.u32 %s7886_s15, 2  ;;  %v7812_v4 = vmov 0.0   ;;  %v442_v6 = vld [vmem:[#allocation3 + $0x8] sm:$0xff] }
  0xe3   : > { %v525_v3 = vcombine.high %v434_v1, %v434_v1  ;;  %597 = vmatprep.mubr.f32.mxu0 %v7812_v4  ;;  %v612_v5 = vcombine.high %v610_v2, %v610_v2  ;;  %s424_s12 = scalar_lea.vmem %s8716_s0, %s6464_s9  ;;  %517 = vmatprep.mubr.f32.mxu1 %v7812_v4  ;;  %v745_v7 = vld [vmem:[%s8120_s25] sm:$0xff]  ;;  %v444_v11 = vcombine.high %v442_v6, %v442_v6  ;;  %v746_v13 = vld [vmem:[%s8120_s25 + $0x8] sm:$0xff]  ;;  %vm445_vm1 = vcmask 31744   ;;  %p6604_p8 = scmp.ne.s32.totalorder %s7886_s15, 5 }
  0xe4   : > { %v749_v8 = vld [vmem:[%s8120_s25 + $0x20] sm:$0xff]  ;;  %v750_v16 = vld [vmem:[%s8120_s25 + $0x28] sm:$0xff]  ;;  %vm723_vm2 = vcmask 1047556   ;;  %vm738_vm3 = vcmask 1040384   ;;  %vm6322_vm4 = vcmask (!%p6604_p8), 91136  }
  0xe5   : > { %v425_v9 = vld [vmem:[%s424_s12] sm:$0x3f]  ;;  %v6477_v12 = vcombine.high %v745_v7, %v749_v8  ;;  %6470 = vmatprep.subr.msk.mxu0 %vm432_vm0, %v525_v3  ;;  %6467 = vmatprep.subr.msk.mxu1 %vm432_vm0, %v444_v11  ;;  %v6479_v19 = vcombine.high %v746_v13, %v750_v16  ;;  %v6476_v22 = vcombine.low %v745_v7, %v749_v8 }
  0xe6   : > { %v6466_v10 = vld [vmem:[%s424_s12 + $0x20] sm:$0x3f]  ;;  %v436_v15 = vrot.slane %v425_v9, 1  ;;  %6471 = vmatpush1.msk.msra.mxu0 %vm432_vm0, %v434_v1  ;;  %6468 = vmatpush1.msk.msra.mxu1 %vm432_vm0, %v442_v6  ;;  %v604_v25 = vrot.slane %v425_v9, 2  ;;  %v6478_v34 = vcombine.low %v746_v13, %v750_v16 }
  0xe7   : > { %v430_v14 = vrot.slane %v6466_v10, 4  ;;  %v753_v17 = vld [vmem:[%s8120_s25 + $0x40] sm:$0xff]  ;;  %v438_v18 = vrot.slane %v6466_v10, 5  ;;  %6473 = vmatprep.subr.msk.mxu0 %vm432_vm0, %v612_v5  ;;  %1513 = vmatprep.subr.bf16.mxu1 %v6477_v12  ;;  %v606_v26 = vrot.slane %v6466_v10, 6  ;;  %v754_v30 = vld [vmem:[%s8120_s25 + $0x48] sm:$0xff] }
  0xe8   : > { %v757_v20 = vld [vmem:[%s8120_s25 + $0x60] sm:$0xff]  ;;  %v758_v31 = vld [vmem:[%s8120_s25 + $0x68] sm:$0xff] }
  0xe9   : > { %v433_v21 = vsel %vm432_vm0, %v425_v9, %v430_v14  ;;  %v440_v23 = vsel %vm432_vm0, %v436_v15, %v438_v18  ;;  %v6485_v24 = vcombine.high %v753_v17, %v757_v20  ;;  %v761_v27 = vld [vmem:[%s8120_s25 + $0x80] sm:$0xff]  ;;  %v6484_v29 = vcombine.low %v753_v17, %v757_v20  ;;  %v762_v39 = vld [vmem:[%s8120_s25 + $0x88] sm:$0xff] }
  0xea   : > { %6472 = vmatmul.mubr.msk.f32.vlgmr.msra.gmra.mrb[0].mxu0 %vm445_vm1, %v433_v21  ;;  %6469 = vmatmul.mubr.msk.f32.vlgmr.msra.gmra.mrb[0].mxu1 %vm445_vm1, %v440_v23  ;;  %v765_v28 = vld [vmem:[%s8120_s25 + $0xa0] sm:$0xff]  ;;  %v608_v33 = vsel %vm432_vm0, %v604_v25, %v606_v26  ;;  %v6487_v37 = vcombine.high %v754_v30, %v758_v31  ;;  %v766_v40 = vld [vmem:[%s8120_s25 + $0xa8] sm:$0xff]  ;;  %v6486_v42 = vcombine.low %v754_v30, %v758_v31 }
  0xeb   : > { %6474 = vmatpush1.msk.msra.mxu0 %vm432_vm0, %v610_v2  ;;  %684 = vmatprep.mubr.f32.mxu0 %v7812_v4  ;;  %v6493_v32 = vcombine.high %v761_v27, %v765_v28  ;;  %v769_v35 = vld [vmem:[%s8120_s25 + $0xc0] sm:$0xff]  ;;  %v6492_v38 = vcombine.low %v761_v27, %v765_v28  ;;  %v6495_v45 = vcombine.high %v762_v39, %v766_v40  ;;  %v770_v47 = vld [vmem:[%s8120_s25 + $0xc8] sm:$0xff] }
  0xec   : > { %1554 = vmatprep.subr.bf16.mxu0 %v6479_v19  ;;  %1514 = vmatpush1.bf16.msra.mxu1 %v6476_v22  ;;  %v773_v36 = vld [vmem:[%s8120_s25 + $0xe0] sm:$0xff]  ;;  %v774_v48 = vld [vmem:[%s8120_s25 + $0xe8] sm:$0xff]  ;;  %v6494_v50 = vcombine.low %v762_v39, %v766_v40 }
  0xed   : > { %1515 = vmatprep.subr.bf16.mxu1 %v6485_v24  ;;  %v6501_v41 = vcombine.high %v769_v35, %v773_v36  ;;  %v777_v43 = vld [vmem:[%s8120_s25 + $0x100] sm:$0xff]  ;;  %v6500_v46 = vcombine.low %v769_v35, %v773_v36  ;;  %v6503_v53 = vcombine.high %v770_v47, %v774_v48  ;;  %v778_v55 = vld [vmem:[%s8120_s25 + $0x108] sm:$0xff]  ;;  %v6502_v58 = vcombine.low %v770_v47, %v774_v48 }
  0xee   : > { %v781_v44 = vld [vmem:[%s8120_s25 + $0x120] sm:$0xff]  ;;  %v782_v56 = vld [vmem:[%s8120_s25 + $0x128] sm:$0xff] }
  0xef   : > { %v6509_v49 = vcombine.high %v777_v43, %v781_v44  ;;  %v785_v51 = vld [vmem:[%s8120_s25 + $0x140] sm:$0xff]  ;;  %v6508_v54 = vcombine.low %v777_v43, %v781_v44  ;;  %v6511_v61 = vcombine.high %v778_v55, %v782_v56  ;;  %v786_v63 = vld [vmem:[%s8120_s25 + $0x148] sm:$0xff]  ;;  %v6510_v2 = vcombine.low %v778_v55, %v782_v56 }
  0xf0   : > { %1516 = vmatpush1.bf16.msra.mxu1 %v6484_v29  ;;  %v789_v52 = vld [vmem:[%s8120_s25 + $0x160] sm:$0xff]  ;;  %v790_v0 = vld [vmem:[%s8120_s25 + $0x168] sm:$0xff] }
  0xf1   : > { %1517 = vmatprep.subr.bf16.mxu1 %v6493_v32  ;;  %v6517_v57 = vcombine.high %v785_v51, %v789_v52  ;;  %v793_v59 = vld [vmem:[%s8120_s25 + $0x180] sm:$0xff]  ;;  %v6516_v62 = vcombine.low %v785_v51, %v789_v52  ;;  %v6519_v5 = vcombine.high %v786_v63, %v790_v0  ;;  %v794_v7 = vld [vmem:[%s8120_s25 + $0x188] sm:$0xff]  ;;  %v6518_v10 = vcombine.low %v786_v63, %v790_v0 }
  0xf2   : > { %6475 = vmatmul.mubr.msk.f32.vlgmr.msra.gmra.mrb[0].mxu0 %vm445_vm1, %v608_v33  ;;  %v797_v60 = vld [vmem:[%s8120_s25 + $0x1a0] sm:$0xff]  ;;  %v798_v8 = vld [vmem:[%s8120_s25 + $0x1a8] sm:$0xff] }
  0xf3   : > { %1555 = vmatpush1.bf16.msra.mxu0 %v6478_v34  ;;  %v6525_v1 = vcombine.high %v793_v59, %v797_v60  ;;  %v801_v3 = vld [vmem:[%s8120_s25 + $0x1c0] sm:$0xff]  ;;  %v6524_v6 = vcombine.low %v793_v59, %v797_v60  ;;  %v6527_v13 = vcombine.high %v794_v7, %v798_v8  ;;  %v802_v15 = vld [vmem:[%s8120_s25 + $0x1c8] sm:$0xff]  ;;  %v6526_v18 = vcombine.low %v794_v7, %v798_v8 }
  0xf4   : > { %1556 = vmatprep.subr.bf16.mxu0 %v6487_v37  ;;  %1518 = vmatpush1.bf16.msra.mxu1 %v6492_v38  ;;  %v805_v4 = vld [vmem:[%s8120_s25 + $0x1e0] sm:$0xff]  ;;  %v806_v16 = vld [vmem:[%s8120_s25 + $0x1e8] sm:$0xff] }
  0xf5   : > { %1519 = vmatprep.subr.bf16.mxu1 %v6501_v41  ;;  %v6533_v9 = vcombine.high %v801_v3, %v805_v4  ;;  %v809_v11 = vld [vmem:[%s8120_s25 + $0x200] sm:$0xff]  ;;  %v6532_v14 = vcombine.low %v801_v3, %v805_v4  ;;  %v6535_v21 = vcombine.high %v802_v15, %v806_v16  ;;  %v810_v23 = vld [vmem:[%s8120_s25 + $0x208] sm:$0xff]  ;;  %v6534_v26 = vcombine.low %v802_v15, %v806_v16 }
  0xf6   : > { %v813_v12 = vld [vmem:[%s8120_s25 + $0x220] sm:$0xff]  ;;  %v814_v24 = vld [vmem:[%s8120_s25 + $0x228] sm:$0xff] }
  0xf7   : > { %1557 = vmatpush1.bf16.msra.mxu0 %v6486_v42  ;;  %v6541_v17 = vcombine.high %v809_v11, %v813_v12  ;;  %v817_v19 = vld [vmem:[%s8120_s25 + $0x240] sm:$0xff]  ;;  %v6540_v22 = vcombine.low %v809_v11, %v813_v12  ;;  %v6543_v27 = vcombine.high %v810_v23, %v814_v24  ;;  %v818_v29 = vld [vmem:[%s8120_s25 + $0x248] sm:$0xff]  ;;  %v6542_v31 = vcombine.low %v810_v23, %v814_v24 }
  0xf8   : > { %1558 = vmatprep.subr.bf16.mxu0 %v6495_v45  ;;  %1520 = vmatpush1.bf16.msra.mxu1 %v6500_v46  ;;  %v821_v20 = vld [vmem:[%s8120_s25 + $0x260] sm:$0xff]  ;;  %v822_v30 = vld [vmem:[%s8120_s25 + $0x268] sm:$0xff] }
  0xf9   : > { %1521 = vmatprep.subr.bf16.mxu1 %v6509_v49  ;;  %v6549_v25 = vcombine.high %v817_v19, %v821_v20  ;;  %v6548_v28 = vcombine.low %v817_v19, %v821_v20  ;;  %v6551_v32 = vcombine.high %v818_v29, %v822_v30  ;;  %v6550_v33 = vcombine.low %v818_v29, %v822_v30  ;;  %v825_v34 = vld [vmem:[%s8120_s25 + $0x280] sm:$0xff]  ;;  %v826_v36 = vld [vmem:[%s8120_s25 + $0x288] sm:$0xff]  ;;  %v8224_v19 = vld [vmem:[%s8120_s25 + $0x30] sm:$0xff] }
  0xfa   : > { %v829_v35 = vld [vmem:[%s8120_s25 + $0x2a0] sm:$0xff]  ;;  %v830_v38 = vld [vmem:[%s8120_s25 + $0x2a8] sm:$0xff]  ;;  %v8227_v20 = vld [vmem:[%s8120_s25 + $0x18] sm:$0xff] }
  0xfb   : > { %1559 = vmatpush1.bf16.msra.mxu0 %v6494_v50  ;;  %v6557_v37 = vcombine.high %v825_v34, %v829_v35  ;;  %v6556_v39 = vcombine.low %v825_v34, %v829_v35  ;;  %v6558_v40 = vcombine.low %v826_v36, %v830_v38  ;;  %v6559_v41 = vcombine.high %v826_v36, %v830_v38  ;;  %v833_v42 = vld [vmem:[%s8120_s25 + $0x2c0] sm:$0xff]  ;;  %v834_v44 = vld [vmem:[%s8120_s25 + $0x2c8] sm:$0xff] }
  0xfc   : > { %1560 = vmatprep.subr.bf16.mxu0 %v6503_v53  ;;  %1522 = vmatpush1.bf16.msra.mxu1 %v6508_v54  ;;  %v837_v43 = vld [vmem:[%s8120_s25 + $0x2e0] sm:$0xff]  ;;  %v838_v46 = vld [vmem:[%s8120_s25 + $0x2e8] sm:$0xff] }
  0xfd   : > { %1523 = vmatprep.subr.bf16.mxu1 %v6517_v57  ;;  %v6565_v45 = vcombine.high %v833_v42, %v837_v43  ;;  %v6564_v47 = vcombine.low %v833_v42, %v837_v43  ;;  %v6566_v48 = vcombine.low %v834_v44, %v838_v46  ;;  %v6567_v49 = vcombine.high %v834_v44, %v838_v46  ;;  %v841_v50 = vld [vmem:[%s8120_s25 + $0x300] sm:$0xff]  ;;  %v842_v52 = vld [vmem:[%s8120_s25 + $0x308] sm:$0xff] }
  0xfe   : > { %v845_v51 = vld [vmem:[%s8120_s25 + $0x320] sm:$0xff]  ;;  %v846_v54 = vld [vmem:[%s8120_s25 + $0x328] sm:$0xff] }
  0xff   : > { %1561 = vmatpush1.bf16.msra.mxu0 %v6502_v58  ;;  %v6573_v53 = vcombine.high %v841_v50, %v845_v51  ;;  %v6572_v55 = vcombine.low %v841_v50, %v845_v51  ;;  %v6574_v56 = vcombine.low %v842_v52, %v846_v54  ;;  %v6575_v57 = vcombine.high %v842_v52, %v846_v54  ;;  %v849_v58 = vld [vmem:[%s8120_s25 + $0x340] sm:$0xff]  ;;  %v850_v60 = vld [vmem:[%s8120_s25 + $0x348] sm:$0xff] }
 0x100   : > { %1562 = vmatprep.subr.bf16.mxu0 %v6511_v61  ;;  %1524 = vmatpush1.bf16.msra.mxu1 %v6516_v62  ;;  %v853_v59 = vld [vmem:[%s8120_s25 + $0x360] sm:$0xff]  ;;  %v854_v62 = vld [vmem:[%s8120_s25 + $0x368] sm:$0xff] }
 0x101   : > { %1525 = vmatprep.subr.bf16.mxu1 %v6525_v1  ;;  %v6581_v61 = vcombine.high %v849_v58, %v853_v59  ;;  %v6580_v63 = vcombine.low %v849_v58, %v853_v59  ;;  %v6582_v0 = vcombine.low %v850_v60, %v854_v62  ;;  %v6583_v1 = vcombine.high %v850_v60, %v854_v62  ;;  %v861_v3 = vld [vmem:[%s8120_s25 + $0x3a0] sm:$0xff]  ;;  %v858_v4 = vld [vmem:[%s8120_s25 + $0x388] sm:$0xff] }
 0x102   : > { %v869_v11 = vld [vmem:[%s8120_s25 + $0x3e0] sm:$0xff]  ;;  %v866_v12 = vld [vmem:[%s8120_s25 + $0x3c8] sm:$0xff] }
 0x103   : > { %1563 = vmatpush1.bf16.msra.mxu0 %v6510_v2  ;;  %v857_v2 = vld [vmem:[%s8120_s25 + $0x380] sm:$0xff] }
 0x104   : > { %1564 = vmatprep.subr.bf16.mxu0 %v6519_v5  ;;  %1526 = vmatpush1.bf16.msra.mxu1 %v6524_v6  ;;  %v6589_v5 = vcombine.high %v857_v2, %v861_v3  ;;  %v862_v6 = vld [vmem:[%s8120_s25 + $0x3a8] sm:$0xff]  ;;  %v6588_v7 = vcombine.low %v857_v2, %v861_v3 }
 0x105   : > { %1527 = vmatprep.subr.bf16.mxu1 %v6533_v9  ;;  %v6590_v8 = vcombine.low %v858_v4, %v862_v6  ;;  %v6591_v9 = vcombine.high %v858_v4, %v862_v6 }
 0x107   : > { %1565 = vmatpush1.bf16.msra.mxu0 %v6518_v10  ;;  %v865_v10 = vld [vmem:[%s8120_s25 + $0x3c0] sm:$0xff] }
 0x108   : > { %1566 = vmatprep.subr.bf16.mxu0 %v6527_v13  ;;  %1528 = vmatpush1.bf16.msra.mxu1 %v6532_v14  ;;  %v6597_v13 = vcombine.high %v865_v10, %v869_v11  ;;  %v870_v14 = vld [vmem:[%s8120_s25 + $0x3e8] sm:$0xff]  ;;  %v6596_v15 = vcombine.low %v865_v10, %v869_v11  ;;  %v759_v10 = vld [vmem:[%s8120_s25 + $0x70] sm:$0xff]  ;;  %v756_v11 = vld [vmem:[%s8120_s25 + $0x58] sm:$0xff] }
 0x109   : > { %1529 = vmatprep.subr.bf16.mxu1 %v6541_v17  ;;  %v6598_v16 = vcombine.low %v866_v12, %v870_v14  ;;  %v6599_v17 = vcombine.high %v866_v12, %v870_v14  ;;  %v760_v12 = vld [vmem:[%s8120_s25 + $0x78] sm:$0xff] }
 0x10b   : > { %1567 = vmatpush1.bf16.msra.mxu0 %v6526_v18  ;;  %v8221_v18 = vld [vmem:[%s8120_s25 + $0x10] sm:$0xff] }
 0x10c   : > { %1568 = vmatprep.subr.bf16.mxu0 %v6535_v21  ;;  %1530 = vmatpush1.bf16.msra.mxu1 %v6540_v22  ;;  %v6481_v21 = vcombine.high %v8221_v18, %v8224_v19  ;;  %v8232_v22 = vld [vmem:[%s8120_s25 + $0x38] sm:$0xff]  ;;  %v6480_v23 = vcombine.low %v8221_v18, %v8224_v19 }
 0x10d   : > { %1531 = vmatprep.subr.bf16.mxu1 %v6549_v25  ;;  %v6482_v24 = vcombine.low %v8227_v20, %v8232_v22  ;;  %v6483_v25 = vcombine.high %v8227_v20, %v8232_v22  ;;  %v772_v18 = vld [vmem:[%s8120_s25 + $0xd8] sm:$0xff] }
 0x10e   : > { %v776_v19 = vld [vmem:[%s8120_s25 + $0xf8] sm:$0xff] }
 0x10f   : > { %1569 = vmatpush1.bf16.msra.mxu0 %v6534_v26  ;;  %v695_v26 = vlaneseq }
 0x110   : > { %1570 = vmatprep.subr.bf16.mxu0 %v6543_v27  ;;  %1532 = vmatpush1.bf16.msra.mxu1 %v6548_v28 }
 0x111   : > { %1533 = vmatprep.subr.bf16.mxu1 %v6557_v37  ;;  %v8240_v27 = vshrl.u32 %v695_v26, 7  ;;  %v768_v26 = vld [vmem:[%s8120_s25 + $0xb8] sm:$0xff] }
 0x113   : > { %1571 = vmatpush1.bf16.msra.mxu0 %v6542_v31  ;;  %v8243_v30 = vsub.s32 0, %v8240_v27  ;;  %v693_v31 = vld [vmem:[#allocation6] sm:$0x3] }
 0x114   : > { %1572 = vmatprep.subr.bf16.mxu0 %v6551_v32  ;;  %1534 = vmatpush1.bf16.msra.mxu1 %v6556_v39  ;;  %v8246_v32 = vsub.s32 1, %v8240_v27 }
 0x115   : > { %1535 = vmatprep.subr.bf16.mxu1 %v6565_v45 }
 0x116   : > { %v702_v35 = vrot.slane %v693_v31, %v8246_v32 }
 0x117   : > { %1573 = vmatpush1.bf16.msra.mxu0 %v6550_v33  ;;  %v698_v33 = vrot.slane %v693_v31, %v8243_v30 }
 0x118   : > { %1574 = vmatprep.subr.bf16.mxu0 %v6559_v41  ;;  %1536 = vmatpush1.bf16.msra.mxu1 %v6564_v47 }
 0x119   : > { %1537 = vmatprep.subr.bf16.mxu1 %v6573_v53 }
 0x11b   : > { %1575 = vmatpush1.bf16.msra.mxu0 %v6558_v40 }
 0x11c   : > { %1576 = vmatprep.subr.bf16.mxu0 %v6567_v49  ;;  %1538 = vmatpush1.bf16.msra.mxu1 %v6572_v55 }
 0x11d   : > { %1539 = vmatprep.subr.bf16.mxu1 %v6581_v61 }
 0x11f   : > { %1577 = vmatpush1.bf16.msra.mxu0 %v6566_v48 }
 0x120   : > { %1578 = vmatprep.subr.bf16.mxu0 %v6575_v57  ;;  %1540 = vmatpush1.bf16.msra.mxu1 %v6580_v63 }
 0x121   : > { %1541 = vmatprep.subr.bf16.mxu1 %v6589_v5 }
 0x123   : > { %1579 = vmatpush1.bf16.msra.mxu0 %v6574_v56 }
 0x124   : > { %1580 = vmatprep.subr.bf16.mxu0 %v6583_v1  ;;  %1542 = vmatpush1.bf16.msra.mxu1 %v6588_v7 }
 0x125   : > { %1543 = vmatprep.subr.bf16.mxu1 %v6597_v13 }
 0x127   : > { %1581 = vmatpush1.bf16.msra.mxu0 %v6582_v0 }
 0x128   : > { %1582 = vmatprep.subr.bf16.mxu0 %v6591_v9  ;;  %1544 = vmatpush1.bf16.msra.mxu1 %v6596_v15  ;;  %v763_v15 = vld [vmem:[%s8120_s25 + $0x90] sm:$0xff] }
 0x129   : > { %1595 = vmatprep.subr.bf16.mxu1 %v6481_v21  ;;  %v767_v21 = vld [vmem:[%s8120_s25 + $0xb0] sm:$0xff] }
 0x12a   : > { %v6497_v31 = vcombine.high %v763_v15, %v767_v21  ;;  %v6496_v20 = vcombine.low %v763_v15, %v767_v21  ;;  %v820_v15 = vld [vmem:[%s8120_s25 + $0x258] sm:$0xff] }
 0x12b   : > { %1583 = vmatpush1.bf16.msra.mxu0 %v6590_v8  ;;  %v755_v8 = vld [vmem:[%s8120_s25 + $0x50] sm:$0xff] }
 0x12c   : > { %1584 = vmatprep.subr.bf16.mxu0 %v6599_v17  ;;  %v6491_v17 = vcombine.high %v756_v11, %v760_v12 }
 0x12f   : > { %1585 = vmatpush1.bf16.msra.mxu0 %v6598_v16  ;;  %v6489_v16 = vcombine.high %v755_v8, %v759_v10 }
 0x130   : > { %1636 = vmatprep.subr.bf16.mxu0 %v6483_v25  ;;  %v764_v25 = vld [vmem:[%s8120_s25 + $0x98] sm:$0xff] }
 0x131   : > { %v6498_v22 = vcombine.low %v764_v25, %v768_v26 }
 0x1bd   : > { %v519_v28 = vpop.f32.mrb[0].mxu1 }
 0x1be   : > { %v521_v29 = vpop.f32.mrb[1].mxu1 }
 0x1c5   : > { %v686_v34 = vpop.f32.mrb[0].mxu0 }
 0x1c6   : > { %v7275_v36 = vadd.f32 %v686_v34, %v519_v28  ;;  %v688_v37 = vpop.f32.mrb[1].mxu0  ;;  %v6488_v28 = vcombine.low %v755_v8, %v759_v10  ;;  %v771_v34 = vld [vmem:[%s8120_s25 + $0xd0] sm:$0xff] }
 0x1c7   : > { %v7276_v38 = vadd.f32 %v688_v37, %v521_v29  ;;  %v6490_v29 = vcombine.low %v756_v11, %v760_v12  ;;  %v783_v37 = vld [vmem:[%s8120_s25 + $0x130] sm:$0xff] }
 0x1c8   : > { %v705_v39 = vadd.f32 %v7275_v36, %v698_v33  ;;  %v6499_v33 = vcombine.high %v764_v25, %v768_v26  ;;  %v779_v36 = vld [vmem:[%s8120_s25 + $0x110] sm:$0xff] }
 0x1c9   : > { %v706_v40 = vadd.f32 %v7276_v38, %v702_v35  ;;  %v775_v35 = vld [vmem:[%s8120_s25 + $0xf0] sm:$0xff]  ;;  %v780_v38 = vld [vmem:[%s8120_s25 + $0x118] sm:$0xff] }
 0x1ca   : > { %v707_v41 = vmax.f32 %v705_v39, 0.0  ;;  %v784_v39 = vld [vmem:[%s8120_s25 + $0x138] sm:$0xff]  ;;  %v819_v12 = vld [vmem:[%s8120_s25 + $0x250] sm:$0xff] }
 0x1cb   : > { %v708_v42 = vmax.f32 %v706_v40, 0.0  ;;  %v6504_v40 = vcombine.low %v771_v34, %v775_v35 }
 0x1cc   : > { %v709_v43 = vsel %vm432_vm0, %v707_v41, -inf  ;;  %v724_v44 = vsel %vm723_vm2, %v707_v41, -inf  ;;  %v6506_v41 = vcombine.low %v772_v18, %v776_v19 }
 0x1cd   : > { %v710_v45 = vrot.slane %v709_v43, 4  ;;  %v725_v46 = vrot.slane %v724_v44, 4  ;;  %v716_v47 = vsel %vm432_vm0, %v708_v42, -inf  ;;  %v731_v48 = vsel %vm723_vm2, %v708_v42, -inf }
 0x1ce   : > { %v717_v49 = vrot.slane %v716_v47, 4  ;;  %v732_v50 = vrot.slane %v731_v48, 4  ;;  %v6513_v42 = vcombine.high %v779_v36, %v783_v37 }
 0x1cf   : > { %v711_v51 = vmax.f32 %v709_v43, %v710_v45  ;;  %v726_v52 = vmax.f32 %v724_v44, %v725_v46  ;;  %v6515_v43 = vcombine.high %v780_v38, %v784_v39  ;;  %v787_v44 = vld [vmem:[%s8120_s25 + $0x150] sm:$0xff]  ;;  %v788_v46 = vld [vmem:[%s8120_s25 + $0x158] sm:$0xff] }
 0x1d0   : > { %v718_v53 = vmax.f32 %v716_v47, %v717_v49  ;;  %v733_v54 = vmax.f32 %v731_v48, %v732_v50  ;;  %v791_v45 = vld [vmem:[%s8120_s25 + $0x170] sm:$0xff]  ;;  %v792_v47 = vld [vmem:[%s8120_s25 + $0x178] sm:$0xff]  ;;  %v6512_v48 = vcombine.low %v779_v36, %v783_v37  ;;  %v6514_v49 = vcombine.low %v780_v38, %v784_v39 }
 0x1d1   : > { %v712_v55 = vrot.slane %v711_v51, 2  ;;  %v727_v56 = vrot.slane %v726_v52, 2  ;;  %v6521_v50 = vcombine.high %v787_v44, %v791_v45 }
 0x1d2   : > { %v719_v57 = vrot.slane %v718_v53, 2  ;;  %v734_v58 = vrot.slane %v733_v54, 2 }
 0x1d3   : > { %v713_v59 = vmax.f32 %v711_v51, %v712_v55  ;;  %v728_v60 = vmax.f32 %v726_v52, %v727_v56  ;;  %v6523_v51 = vcombine.high %v788_v46, %v792_v47  ;;  %v795_v52 = vld [vmem:[%s8120_s25 + $0x190] sm:$0xff]  ;;  %v800_v55 = vld [vmem:[%s8120_s25 + $0x1b8] sm:$0xff]  ;;  %v6520_v56 = vcombine.low %v787_v44, %v791_v45 }
 0x1d4   : > { %v720_v61 = vmax.f32 %v718_v53, %v719_v57  ;;  %v735_v62 = vmax.f32 %v733_v54, %v734_v58  ;;  %v799_v53 = vld [vmem:[%s8120_s25 + $0x1b0] sm:$0xff]  ;;  %v796_v54 = vld [vmem:[%s8120_s25 + $0x198] sm:$0xff]  ;;  %v6522_v57 = vcombine.low %v788_v46, %v792_v47 }
 0x1d5   : > { %v714_v63 = vrot.slane %v713_v59, 1  ;;  %v729_v0 = vrot.slane %v728_v60, 1  ;;  %v6529_v58 = vcombine.high %v795_v52, %v799_v53 }
 0x1d6   : > { %v721_v1 = vrot.slane %v720_v61, 1  ;;  %v736_v2 = vrot.slane %v735_v62, 1 }
 0x1d7   : > { %v715_v3 = vmax.f32 %v713_v59, %v714_v63  ;;  %v730_v4 = vmax.f32 %v728_v60, %v729_v0  ;;  %v6531_v59 = vcombine.high %v796_v54, %v800_v55  ;;  %v803_v60 = vld [vmem:[%s8120_s25 + $0x1d0] sm:$0xff]  ;;  %v808_v63 = vld [vmem:[%s8120_s25 + $0x1f8] sm:$0xff]  ;;  %v6528_v0 = vcombine.low %v795_v52, %v799_v53 }
 0x1d8   : > { %v722_v5 = vmax.f32 %v720_v61, %v721_v1  ;;  %v737_v6 = vmax.f32 %v735_v62, %v736_v2  ;;  %v807_v61 = vld [vmem:[%s8120_s25 + $0x1f0] sm:$0xff]  ;;  %v804_v62 = vld [vmem:[%s8120_s25 + $0x1d8] sm:$0xff]  ;;  %v6530_v1 = vcombine.low %v796_v54, %v800_v55 }
 0x1d9   : > { %v739_v7 = vsel %vm738_vm3, %v715_v3, %v730_v4  ;;  %v6537_v2 = vcombine.high %v803_v60, %v807_v61  ;;  %v6539_v3 = vcombine.high %v804_v62, %v808_v63  ;;  %v811_v4 = vld [vmem:[%s8120_s25 + $0x210] sm:$0xff]  ;;  %v6536_v8 = vcombine.low %v803_v60, %v807_v61 }
 0x1da   : > { %v740_v9 = vsel %vm738_vm3, %v722_v5, %v737_v6  ;;  %v8256_v14 = vpack.c.bf16 %v739_v7, %v739_v7  ;;  %v815_v5 = vld [vmem:[%s8120_s25 + $0x230] sm:$0xff]  ;;  %v812_v6 = vld [vmem:[%s8120_s25 + $0x218] sm:$0xff] }
 0x1db   : > { %v744_v13 = vpack.c.bf16 %v740_v9, %v740_v9  ;;  %v816_v7 = vld [vmem:[%s8120_s25 + $0x238] sm:$0xff]  ;;  %v6538_v9 = vcombine.low %v804_v62, %v808_v63  ;;  %v6545_v10 = vcombine.high %v811_v4, %v815_v5 }
 0x1dc   : > { %v6547_v11 = vcombine.high %v812_v6, %v816_v7  ;;  %v6546_v21 = vcombine.low %v812_v6, %v816_v7 }
 0x1dd   : > { %1545 = vmatprep.mubr.bf16.mxu1 %v744_v13  ;;  %1586 = vmatprep.mubr.bf16.mxu0 %v744_v13 }
 0x1de   : > { %1546 = vmatmul.mubr.bf16.vlgmr.msra.gmra.mrb[4].mxu1 %v8256_v14  ;;  %1587 = vmatmul.mubr.bf16.vlgmr.msra.gmra.mrb[4].mxu0 %v8256_v14 }
 0x1df   : > { %1596 = vmatpush1.bf16.msra.mxu1 %v6480_v23  ;;  %1637 = vmatpush1.bf16.msra.mxu0 %v6482_v24  ;;  %v6505_v23 = vcombine.high %v771_v34, %v775_v35  ;;  %v6507_v24 = vcombine.high %v772_v18, %v776_v19 }
 0x1e0   : > { %1627 = vmatprep.mubr.bf16.mxu1 %v744_v13  ;;  %1668 = vmatprep.mubr.bf16.mxu0 %v744_v13  ;;  %v823_v13 = vld [vmem:[%s8120_s25 + $0x270] sm:$0xff] }
 0x1e1   : > { %1597 = vmatprep.subr.bf16.mxu1 %v6489_v16  ;;  %1638 = vmatprep.subr.bf16.mxu0 %v6491_v17  ;;  %v824_v16 = vld [vmem:[%s8120_s25 + $0x278] sm:$0xff]  ;;  %v6544_v17 = vcombine.low %v811_v4, %v815_v5  ;;  %v6553_v25 = vcombine.high %v819_v12, %v823_v13  ;;  %v6552_v34 = vcombine.low %v819_v12, %v823_v13 }
 0x1e2   : > { %v6555_v26 = vcombine.high %v820_v15, %v824_v16  ;;  %v6554_v35 = vcombine.low %v820_v15, %v824_v16 }
 0x1e3   : > { %1598 = vmatpush1.bf16.msra.mxu1 %v6488_v28  ;;  %1639 = vmatpush1.bf16.msra.mxu0 %v6490_v29  ;;  %v827_v28 = vld [vmem:[%s8120_s25 + $0x290] sm:$0xff] }
 0x1e4   : > { %1599 = vmatprep.subr.bf16.mxu1 %v6497_v31  ;;  %1640 = vmatprep.subr.bf16.mxu0 %v6499_v33  ;;  %v831_v29 = vld [vmem:[%s8120_s25 + $0x2b0] sm:$0xff]  ;;  %v828_v31 = vld [vmem:[%s8120_s25 + $0x298] sm:$0xff] }
 0x1e5   : > { %v832_v33 = vld [vmem:[%s8120_s25 + $0x2b8] sm:$0xff]  ;;  %v6561_v18 = vcombine.high %v827_v28, %v831_v29  ;;  %v6560_v36 = vcombine.low %v827_v28, %v831_v29 }
 0x1e6   : > { %v6563_v19 = vcombine.high %v828_v31, %v832_v33  ;;  %v6562_v37 = vcombine.low %v828_v31, %v832_v33 }
 0x1e7   : > { %1600 = vmatpush1.bf16.msra.mxu1 %v6496_v20  ;;  %1641 = vmatpush1.bf16.msra.mxu0 %v6498_v22  ;;  %v835_v20 = vld [vmem:[%s8120_s25 + $0x2d0] sm:$0xff] }
 0x1e8   : > { %1601 = vmatprep.subr.bf16.mxu1 %v6505_v23  ;;  %1642 = vmatprep.subr.bf16.mxu0 %v6507_v24  ;;  %v839_v22 = vld [vmem:[%s8120_s25 + $0x2f0] sm:$0xff]  ;;  %v836_v23 = vld [vmem:[%s8120_s25 + $0x2d8] sm:$0xff] }
 0x1e9   : > { %v840_v24 = vld [vmem:[%s8120_s25 + $0x2f8] sm:$0xff]  ;;  %v6569_v38 = vcombine.high %v835_v20, %v839_v22  ;;  %v6568_v44 = vcombine.low %v835_v20, %v839_v22 }
 0x1ea   : > { %v6571_v39 = vcombine.high %v836_v23, %v840_v24  ;;  %v6570_v45 = vcombine.low %v836_v23, %v840_v24 }
 0x1eb   : > { %1602 = vmatpush1.bf16.msra.mxu1 %v6504_v40  ;;  %1643 = vmatpush1.bf16.msra.mxu0 %v6506_v41  ;;  %v843_v40 = vld [vmem:[%s8120_s25 + $0x310] sm:$0xff] }
 0x1ec   : > { %1603 = vmatprep.subr.bf16.mxu1 %v6513_v42  ;;  %1644 = vmatprep.subr.bf16.mxu0 %v6515_v43  ;;  %v847_v41 = vld [vmem:[%s8120_s25 + $0x330] sm:$0xff]  ;;  %v844_v42 = vld [vmem:[%s8120_s25 + $0x318] sm:$0xff] }
 0x1ed   : > { %v848_v43 = vld [vmem:[%s8120_s25 + $0x338] sm:$0xff]  ;;  %v6577_v46 = vcombine.high %v843_v40, %v847_v41  ;;  %v6576_v52 = vcombine.low %v843_v40, %v847_v41 }
 0x1ee   : > { %v6579_v47 = vcombine.high %v844_v42, %v848_v43  ;;  %v6578_v53 = vcombine.low %v844_v42, %v848_v43 }
 0x1ef   : > { %1604 = vmatpush1.bf16.msra.mxu1 %v6512_v48  ;;  %1645 = vmatpush1.bf16.msra.mxu0 %v6514_v49  ;;  %v851_v48 = vld [vmem:[%s8120_s25 + $0x350] sm:$0xff] }
 0x1f0   : > { %1605 = vmatprep.subr.bf16.mxu1 %v6521_v50  ;;  %1646 = vmatprep.subr.bf16.mxu0 %v6523_v51  ;;  %v855_v49 = vld [vmem:[%s8120_s25 + $0x370] sm:$0xff]  ;;  %v852_v50 = vld [vmem:[%s8120_s25 + $0x358] sm:$0xff] }
 0x1f1   : > { %v856_v51 = vld [vmem:[%s8120_s25 + $0x378] sm:$0xff]  ;;  %v6585_v54 = vcombine.high %v851_v48, %v855_v49  ;;  %v6584_v60 = vcombine.low %v851_v48, %v855_v49  ;;  %v1861_v48 = vld [vmem:[#allocation10 + $0x20] sm:$0xff] (!%p6604_p8)  ;;  %v1858_v49 = vld [vmem:[#allocation10 + $0x8] sm:$0xff] (!%p6604_p8) }
 0x1f2   : > { %v6587_v55 = vcombine.high %v852_v50, %v856_v51  ;;  %v6586_v61 = vcombine.low %v852_v50, %v856_v51  ;;  %v1862_v51 = vld [vmem:[#allocation10 + $0x28] sm:$0xff] (!%p6604_p8) }
 0x1f3   : > { %1606 = vmatpush1.bf16.msra.mxu1 %v6520_v56  ;;  %1647 = vmatpush1.bf16.msra.mxu0 %v6522_v57  ;;  %v859_v56 = vld [vmem:[%s8120_s25 + $0x390] sm:$0xff] }
 0x1f4   : > { %1607 = vmatprep.subr.bf16.mxu1 %v6529_v58  ;;  %1648 = vmatprep.subr.bf16.mxu0 %v6531_v59  ;;  %v863_v57 = vld [vmem:[%s8120_s25 + $0x3b0] sm:$0xff]  ;;  %v860_v58 = vld [vmem:[%s8120_s25 + $0x398] sm:$0xff] }
 0x1f5   : > { %v864_v59 = vld [vmem:[%s8120_s25 + $0x3b8] sm:$0xff]  ;;  %v6593_v62 = vcombine.high %v859_v56, %v863_v57  ;;  %v6592_v4 = vcombine.low %v859_v56, %v863_v57  ;;  %v6607_v56 = vcombine.low (!%p6604_p8), %v1858_v49, %v1862_v51 }
 0x1f6   : > { %v6595_v63 = vcombine.high %v860_v58, %v864_v59  ;;  %v6594_v5 = vcombine.low %v860_v58, %v864_v59  ;;  %v1866_v58 = vld [vmem:[#allocation10 + $0x48] sm:$0xff] (!%p6604_p8) }
 0x1f7   : > { %1608 = vmatpush1.bf16.msra.mxu1 %v6528_v0  ;;  %1649 = vmatpush1.bf16.msra.mxu0 %v6530_v1  ;;  %v867_v0 = vld [vmem:[%s8120_s25 + $0x3d0] sm:$0xff] }
 0x1f8   : > { %1609 = vmatprep.subr.bf16.mxu1 %v6537_v2  ;;  %1650 = vmatprep.subr.bf16.mxu0 %v6539_v3  ;;  %v871_v1 = vld [vmem:[%s8120_s25 + $0x3f0] sm:$0xff]  ;;  %v868_v2 = vld [vmem:[%s8120_s25 + $0x3d8] sm:$0xff] }
 0x1f9   : > { %v872_v3 = vld [vmem:[%s8120_s25 + $0x3f8] sm:$0xff]  ;;  %v6601_v6 = vcombine.high %v867_v0, %v871_v1  ;;  %v1870_v59 = vld [vmem:[#allocation10 + $0x68] sm:$0xff] (!%p6604_p8) }
 0x1fa   : > { %v6603_v7 = vcombine.high %v868_v2, %v872_v3 }
 0x1fb   : > { %1610 = vmatpush1.bf16.msra.mxu1 %v6536_v8  ;;  %1651 = vmatpush1.bf16.msra.mxu0 %v6538_v9  ;;  %v6600_v8 = vcombine.low %v867_v0, %v871_v1  ;;  %v6602_v9 = vcombine.low %v868_v2, %v872_v3  ;;  %v1878_v0 = vld [vmem:[#allocation10 + $0xa8] sm:$0xff] (!%p6604_p8)  ;;  %v6615_v2 = vcombine.low (!%p6604_p8), %v1866_v58, %v1870_v59 }
 0x1fc   : > { %1611 = vmatprep.subr.bf16.mxu1 %v6545_v10  ;;  %1652 = vmatprep.subr.bf16.mxu0 %v6547_v11  ;;  %v7813_v10 = vmov 1983009808  }
 0x1fd   : > { %v1688_v11 = vunpack.c.l.s4 %v7813_v10 }
 0x1ff   : > { %1612 = vmatpush1.bf16.msra.mxu1 %v6544_v17  ;;  %1653 = vmatpush1.bf16.msra.mxu0 %v6546_v21  ;;  %v1689_v12 = vunpack.c.0.s8 %v1688_v11 }
 0x200   : > { %1613 = vmatprep.subr.bf16.mxu1 %v6553_v25  ;;  %1654 = vmatprep.subr.bf16.mxu0 %v6555_v26 }
 0x201   : > { %v8325_v16 = vsub.s32 %v1689_v12, %v8240_v27 }
 0x203   : > { %1614 = vmatpush1.bf16.msra.mxu1 %v6552_v34  ;;  %1655 = vmatpush1.bf16.msra.mxu0 %v6554_v35  ;;  %v741_v35 = vld [vmem:[#allocation2] sm:$0xff] }
 0x204   : > { %1615 = vmatprep.subr.bf16.mxu1 %v6561_v18  ;;  %1656 = vmatprep.subr.bf16.mxu0 %v6563_v19 }
 0x207   : > { %1616 = vmatpush1.bf16.msra.mxu1 %v6560_v36  ;;  %1657 = vmatpush1.bf16.msra.mxu0 %v6562_v37 }
 0x208   : > { %1617 = vmatprep.subr.bf16.mxu1 %v6569_v38  ;;  %1658 = vmatprep.subr.bf16.mxu0 %v6571_v39 }
 0x20b   : > { %1618 = vmatpush1.bf16.msra.mxu1 %v6568_v44  ;;  %1659 = vmatpush1.bf16.msra.mxu0 %v6570_v45  ;;  %v742_v44 = vld [vmem:[#allocation2 + $0x8] sm:$0xff] }
 0x20c   : > { %1619 = vmatprep.subr.bf16.mxu1 %v6577_v46  ;;  %1660 = vmatprep.subr.bf16.mxu0 %v6579_v47  ;;  %v1857_v47 = vld [vmem:[#allocation10] sm:$0xff] (!%p6604_p8) }
 0x20d   : > { %v6606_v50 = vcombine.high (!%p6604_p8), %v1857_v47, %v1861_v48 }
 0x20f   : > { %1620 = vmatpush1.bf16.msra.mxu1 %v6576_v52  ;;  %1661 = vmatpush1.bf16.msra.mxu0 %v6578_v53  ;;  %v6605_v52 = vcombine.low (!%p6604_p8), %v1857_v47, %v1861_v48  ;;  %v1865_v53 = vld [vmem:[#allocation10 + $0x40] sm:$0xff] (!%p6604_p8)  ;;  %v1914_v48 = vld [vmem:[#allocation10 + $0x1c8] sm:$0xff] (!%p6604_p8) }
 0x210   : > { %1621 = vmatprep.subr.bf16.mxu1 %v6585_v54  ;;  %1662 = vmatprep.subr.bf16.mxu0 %v6587_v55  ;;  %v1869_v54 = vld [vmem:[#allocation10 + $0x60] sm:$0xff] (!%p6604_p8)  ;;  %v6608_v55 = vcombine.high (!%p6604_p8), %v1858_v49, %v1862_v51  ;;  %v1918_v49 = vld [vmem:[#allocation10 + $0x1e8] sm:$0xff] (!%p6604_p8) }
 0x211   : > { %v6614_v57 = vcombine.high (!%p6604_p8), %v1865_v53, %v1869_v54  ;;  %v6613_v1 = vcombine.low (!%p6604_p8), %v1865_v53, %v1869_v54 }
 0x213   : > { %1622 = vmatpush1.bf16.msra.mxu1 %v6584_v60  ;;  %1663 = vmatpush1.bf16.msra.mxu0 %v6586_v61  ;;  %v1873_v60 = vld [vmem:[#allocation10 + $0x80] sm:$0xff] (!%p6604_p8)  ;;  %v6616_v61 = vcombine.high (!%p6604_p8), %v1866_v58, %v1870_v59 }
 0x214   : > { %1623 = vmatprep.subr.bf16.mxu1 %v6593_v62  ;;  %1664 = vmatprep.subr.bf16.mxu0 %v6595_v63  ;;  %v1877_v62 = vld [vmem:[#allocation10 + $0xa0] sm:$0xff] (!%p6604_p8)  ;;  %v1874_v63 = vld [vmem:[#allocation10 + $0x88] sm:$0xff] (!%p6604_p8) }
 0x215   : > { %v6622_v3 = vcombine.high (!%p6604_p8), %v1873_v60, %v1877_v62  ;;  %v6623_v10 = vcombine.low (!%p6604_p8), %v1874_v63, %v1878_v0  ;;  %v1921_v58 = vld [vmem:[#allocation10 + $0x200] sm:$0xff] (!%p6604_p8) }
 0x216   : > { %v1925_v59 = vld [vmem:[#allocation10 + $0x220] sm:$0xff] (!%p6604_p8) }
 0x217   : > { %1624 = vmatpush1.bf16.msra.mxu1 %v6592_v4  ;;  %1665 = vmatpush1.bf16.msra.mxu0 %v6594_v5  ;;  %v6624_v4 = vcombine.high (!%p6604_p8), %v1874_v63, %v1878_v0  ;;  %v1881_v5 = vld [vmem:[#allocation10 + $0xc0] sm:$0xff] (!%p6604_p8) }
 0x218   : > { %1625 = vmatprep.subr.bf16.mxu1 %v6601_v6  ;;  %1666 = vmatprep.subr.bf16.mxu0 %v6603_v7  ;;  %v1885_v6 = vld [vmem:[#allocation10 + $0xe0] sm:$0xff] (!%p6604_p8)  ;;  %v1882_v7 = vld [vmem:[#allocation10 + $0xc8] sm:$0xff] (!%p6604_p8) }
 0x219   : > { %v6630_v11 = vcombine.high (!%p6604_p8), %v1881_v5, %v1885_v6 }
 0x21b   : > { %1626 = vmatpush1.bf16.msra.mxu1 %v6600_v8  ;;  %1667 = vmatpush1.bf16.msra.mxu0 %v6602_v9  ;;  %v1886_v8 = vld [vmem:[#allocation10 + $0xe8] sm:$0xff] (!%p6604_p8)  ;;  %v6621_v9 = vcombine.low (!%p6604_p8), %v1873_v60, %v1877_v62 }
 0x21c   : > { %4971 = vmatprep.subr.bf16.mxu0 (!%p6604_p8), %v6606_v50  ;;  %5135 = vmatprep.subr.bf16.mxu1 (!%p6604_p8), %v6608_v55  ;;  %v6632_v12 = vcombine.high (!%p6604_p8), %v1882_v7, %v1886_v8  ;;  %v1926_v62 = vld [vmem:[#allocation10 + $0x228] sm:$0xff] (!%p6604_p8) }
 0x21e   : > { %1628 = vmatmul.mubr.bf16.vlgmr.msra.gmra.mrb[8].mxu1 %v8256_v14  ;;  %1669 = vmatmul.mubr.bf16.vlgmr.msra.gmra.mrb[8].mxu0 %v8256_v14 }
 0x21f   : > { %4972 = vmatpush1.bf16.msra.mxu0 (!%p6604_p8), %v6605_v52  ;;  %5136 = vmatpush1.bf16.msra.mxu1 (!%p6604_p8), %v6607_v56 }
 0x220   : > { %4973 = vmatprep.subr.bf16.mxu0 (!%p6604_p8), %v6614_v57  ;;  %5137 = vmatprep.subr.bf16.mxu1 (!%p6604_p8), %v6616_v61  ;;  %v6664_v57 = vcombine.high (!%p6604_p8), %v1914_v48, %v1918_v49  ;;  %v1922_v61 = vld [vmem:[#allocation10 + $0x208] sm:$0xff] (!%p6604_p8) }
 0x223   : > { %4974 = vmatpush1.bf16.msra.mxu0 (!%p6604_p8), %v6613_v1  ;;  %5138 = vmatpush1.bf16.msra.mxu1 (!%p6604_p8), %v6615_v2  ;;  %v6663_v2 = vcombine.low (!%p6604_p8), %v1914_v48, %v1918_v49 }
 0x224   : > { %4975 = vmatprep.subr.bf16.mxu0 (!%p6604_p8), %v6622_v3  ;;  %5139 = vmatprep.subr.bf16.mxu1 (!%p6604_p8), %v6624_v4  ;;  %v6670_v3 = vcombine.high (!%p6604_p8), %v1921_v58, %v1925_v59 }
 0x227   : > { %4976 = vmatpush1.bf16.msra.mxu0 (!%p6604_p8), %v6621_v9  ;;  %5140 = vmatpush1.bf16.msra.mxu1 (!%p6604_p8), %v6623_v10  ;;  %v1934_v9 = vld [vmem:[#allocation10 + $0x268] sm:$0xff] (!%p6604_p8) }
 0x228   : > { %4977 = vmatprep.subr.bf16.mxu0 (!%p6604_p8), %v6630_v11  ;;  %5141 = vmatprep.subr.bf16.mxu1 (!%p6604_p8), %v6632_v12  ;;  %v6669_v11 = vcombine.low (!%p6604_p8), %v1921_v58, %v1925_v59  ;;  %v6671_v12 = vcombine.low (!%p6604_p8), %v1922_v61, %v1926_v62  ;;  %v1969_v58 = vld [vmem:[#allocation10 + $0x380] sm:$0xff] (!%p6604_p8) }
 0x229   : > { %v1973_v59 = vld [vmem:[#allocation10 + $0x3a0] sm:$0xff] (!%p6604_p8) }
 0x2b1   : > { %v1547_v13 = vpop.f32.mrb[4].mxu1  ;;  %v1588_v15 = vpop.f32.mrb[4].mxu0 }
 0x2b2   : > { %v1549_v17 = vpop.f32.mrb[5].mxu1  ;;  %v1590_v21 = vpop.f32.mrb[5].mxu0 }
 0x2b3   : > { %v1685_v25 = vcombine.low %v1547_v13, %v1549_v17  ;;  %v1686_v26 = vcombine.low %v1588_v15, %v1590_v21  ;;  %v1551_v28 = vpop.f32.mrb[6].mxu1  ;;  %v1592_v29 = vpop.f32.mrb[6].mxu0  ;;  %v1889_v13 = vld [vmem:[#allocation10 + $0x100] sm:$0xff] (!%p6604_p8)  ;;  %v1890_v17 = vld [vmem:[#allocation10 + $0x108] sm:$0xff] (!%p6604_p8) }
 0x2b4   : > { %v1552_v31 = vpop.f32.mrb[7].mxu1  ;;  %v1593_v33 = vpop.f32.mrb[7].mxu0  ;;  %v1893_v15 = vld [vmem:[#allocation10 + $0x120] sm:$0xff] (!%p6604_p8)  ;;  %v1894_v21 = vld [vmem:[#allocation10 + $0x128] sm:$0xff] (!%p6604_p8) }
 0x2b5   : > { %v1693_v34 = vrot.slane %v1685_v25, %v8325_v16  ;;  %v1700_v14 = vrot.slane %v1686_v26, %v8325_v16  ;;  %v6629_v25 = vcombine.low (!%p6604_p8), %v1881_v5, %v1885_v6  ;;  %v6631_v26 = vcombine.low (!%p6604_p8), %v1882_v7, %v1886_v8  ;;  %v1897_v31 = vld [vmem:[#allocation10 + $0x140] sm:$0xff] (!%p6604_p8)  ;;  %v1930_v8 = vld [vmem:[#allocation10 + $0x248] sm:$0xff] (!%p6604_p8) }
 0x2b6   : > { %v6638_v28 = vcombine.high (!%p6604_p8), %v1889_v13, %v1893_v15  ;;  %v6640_v29 = vcombine.high (!%p6604_p8), %v1890_v17, %v1894_v21  ;;  %v1901_v33 = vld [vmem:[#allocation10 + $0x160] sm:$0xff] (!%p6604_p8)  ;;  %v6672_v5 = vcombine.high (!%p6604_p8), %v1922_v61, %v1926_v62  ;;  %v1974_v61 = vld [vmem:[#allocation10 + $0x3a8] sm:$0xff] (!%p6604_p8) }
 0x2b7   : > { %v1701_v18 = vcombine.low %v1693_v34, %v1700_v14  ;;  %v1898_v34 = vld [vmem:[#allocation10 + $0x148] sm:$0xff] (!%p6604_p8)  ;;  %4978 = vmatpush1.bf16.msra.mxu0 (!%p6604_p8), %v6629_v25  ;;  %5142 = vmatpush1.bf16.msra.mxu1 (!%p6604_p8), %v6631_v26  ;;  %v1929_v6 = vld [vmem:[#allocation10 + $0x240] sm:$0xff] (!%p6604_p8) }
 0x2b8   : > { %v1902_v14 = vld [vmem:[#allocation10 + $0x168] sm:$0xff] (!%p6604_p8)  ;;  %4979 = vmatprep.subr.bf16.mxu0 (!%p6604_p8), %v6638_v28  ;;  %5143 = vmatprep.subr.bf16.mxu1 (!%p6604_p8), %v6640_v29  ;;  %v1933_v7 = vld [vmem:[#allocation10 + $0x260] sm:$0xff] (!%p6604_p8) }
 0x2b9   : > { %v1721_v19 = vadd.f32 %v1701_v18, %v741_v35  ;;  %v6637_v35 = vcombine.low (!%p6604_p8), %v1889_v13, %v1893_v15  ;;  %v6639_v18 = vcombine.low (!%p6604_p8), %v1890_v17, %v1894_v21  ;;  %v6678_v13 = vcombine.high (!%p6604_p8), %v1929_v6, %v1933_v7  ;;  %v1937_v21 = vld [vmem:[#allocation10 + $0x280] sm:$0xff] (!%p6604_p8)  ;;  %v1938_v26 = vld [vmem:[#allocation10 + $0x288] sm:$0xff] (!%p6604_p8) }
 0x2ba   : > { %v6680_v17 = vcombine.high (!%p6604_p8), %v1930_v8, %v1934_v9  ;;  %v1941_v25 = vld [vmem:[#allocation10 + $0x2a0] sm:$0xff] (!%p6604_p8)  ;;  %v1942_v28 = vld [vmem:[#allocation10 + $0x2a8] sm:$0xff] (!%p6604_p8) }
 0x2bb   : > { %1723 = vst [vmem:[#allocation2] sm:$0xff] %v1721_v19  ;;  %v6646_v19 = vcombine.high (!%p6604_p8), %v1897_v31, %v1901_v33  ;;  %4980 = vmatpush1.bf16.msra.mxu0 (!%p6604_p8), %v6637_v35  ;;  %5144 = vmatpush1.bf16.msra.mxu1 (!%p6604_p8), %v6639_v18  ;;  %v6688_v35 = vcombine.high (!%p6604_p8), %v1938_v26, %v1942_v28  ;;  %v1945_v18 = vld [vmem:[#allocation10 + $0x2c0] sm:$0xff] (!%p6604_p8) }
 0x2bd   : > { %4981 = vmatprep.subr.bf16.mxu0 (!%p6604_p8), %v6646_v19  ;;  %v1949_v19 = vld [vmem:[#allocation10 + $0x2e0] sm:$0xff] (!%p6604_p8) }
 0x2c2   : > { %v1729_v1 = vld [vmem:[#allocation2] sm:$0xff] (!%p6604_p8) }
 0x2f1   : > { %v1629_v20 = vpop.f32.mrb[8].mxu1  ;;  %v1670_v22 = vpop.f32.mrb[8].mxu0 }
 0x2f2   : > { %v1631_v23 = vpop.f32.mrb[9].mxu1  ;;  %v1672_v24 = vpop.f32.mrb[9].mxu0 }
 0x2f3   : > { %v1702_v36 = vcombine.low %v1629_v20, %v1631_v23  ;;  %v1703_v37 = vcombine.low %v1670_v22, %v1672_v24  ;;  %v1633_v38 = vpop.f32.mrb[10].mxu1  ;;  %v1674_v39 = vpop.f32.mrb[10].mxu0  ;;  %v6648_v20 = vcombine.high (!%p6604_p8), %v1898_v34, %v1902_v14  ;;  %v1905_v22 = vld [vmem:[#allocation10 + $0x180] sm:$0xff] (!%p6604_p8)  ;;  %v1906_v24 = vld [vmem:[#allocation10 + $0x188] sm:$0xff] (!%p6604_p8) }
 0x2f4   : > { %v1634_v40 = vpop.f32.mrb[11].mxu1  ;;  %v1675_v41 = vpop.f32.mrb[11].mxu0  ;;  %v1909_v23 = vld [vmem:[#allocation10 + $0x1a0] sm:$0xff] (!%p6604_p8)  ;;  %v1747_v38 = vsub.s32 (!%p6604_p8), 3, %v8240_v27  ;;  %v6645_v39 = vcombine.low (!%p6604_p8), %v1897_v31, %v1901_v33  ;;  %v6677_v31 = vcombine.low (!%p6604_p8), %v1929_v6, %v1933_v7  ;;  %v6679_v33 = vcombine.low (!%p6604_p8), %v1930_v8, %v1934_v9  ;;  %v1982_v6 = vld [vmem:[#allocation10 + $0x3e8] sm:$0xff] (!%p6604_p8) }
 0x2f5   : > { %v1710_v42 = vrot.slane %v1702_v36, %v8325_v16  ;;  %v1717_v43 = vrot.slane %v1703_v37, %v8325_v16  ;;  %1728 = sbr.rel (%p6604_p8) target bundleno = 1689 (0x699), region = 92  ;;  %v1910_v36 = vld [vmem:[#allocation10 + $0x1a8] sm:$0xff] (!%p6604_p8)  ;;  %v1743_v37 = vsub.s32 (!%p6604_p8), 2, %v8240_v27  ;;  %v6647_v40 = vcombine.low (!%p6604_p8), %v1898_v34, %v1902_v14  ;;  %5145 = vmatprep.subr.bf16.mxu1 (!%p6604_p8), %v6648_v20 }
 0x2f6   : > { %v6654_v41 = vcombine.high (!%p6604_p8), %v1905_v22, %v1909_v23  ;;  %4982 = vmatpush1.bf16.msra.mxu0 (!%p6604_p8), %v6645_v39  ;;  %v6653_v52 = vcombine.low (!%p6604_p8), %v1905_v22, %v1909_v23  ;;  %v6655_v54 = vcombine.low (!%p6604_p8), %v1906_v24, %v1910_v36  ;;  %v6686_v34 = vcombine.high (!%p6604_p8), %v1937_v21, %v1941_v25  ;;  %v1946_v20 = vld [vmem:[#allocation10 + $0x2c8] sm:$0xff] (!%p6604_p8) }
 0x2f7   : > { %v1718_v45 = vcombine.low %v1710_v42, %v1717_v43  ;;  %v8334_v42 = vld [vmem:[#allocation9] sm:$0xff] (!%p6604_p8)  ;;  %v6656_v43 = vcombine.high (!%p6604_p8), %v1906_v24, %v1910_v36  ;;  %5146 = vmatpush1.bf16.msra.mxu1 (!%p6604_p8), %v6647_v40  ;;  %v1950_v22 = vld [vmem:[#allocation10 + $0x2e8] sm:$0xff] (!%p6604_p8)  ;;  %v6685_v24 = vcombine.low (!%p6604_p8), %v1937_v21, %v1941_v25  ;;  %v6687_v36 = vcombine.low (!%p6604_p8), %v1938_v26, %v1942_v28 }
 0x2f8   : > { %v1740_v47 = vrot.slane (!%p6604_p8), %v8334_v42, %v8246_v32  ;;  %v1744_v50 = vrot.slane (!%p6604_p8), %v8334_v42, %v1743_v37  ;;  %v1748_v51 = vrot.slane (!%p6604_p8), %v8334_v42, %v1747_v38  ;;  %4983 = vmatprep.subr.bf16.mxu0 (!%p6604_p8), %v6654_v41  ;;  %v6694_v39 = vcombine.high (!%p6604_p8), %v1945_v18, %v1949_v19  ;;  %v1953_v41 = vld [vmem:[#allocation10 + $0x300] sm:$0xff] (!%p6604_p8)  ;;  %v1990_v21 = vld [vmem:[#allocation10 + $0x428] sm:$0xff] (!%p6604_p8) }
 0x2f9   : > { %v1722_v46 = vadd.f32 %v1718_v45, %v742_v44  ;;  %v1913_v44 = vld [vmem:[#allocation10 + $0x1c0] sm:$0xff] (!%p6604_p8)  ;;  %5147 = vmatprep.subr.bf16.mxu1 (!%p6604_p8), %v6656_v43  ;;  %v6696_v40 = vcombine.high (!%p6604_p8), %v1946_v20, %v1950_v22  ;;  %v6717_v7 = vcombine.low (!%p6604_p8), %v1969_v58, %v1973_v59 }
 0x2fa   : > { %v1917_v45 = vld [vmem:[#allocation10 + $0x1e0] sm:$0xff] (!%p6604_p8)  ;;  %v1766_v56 = vcombine.low (!%p6604_p8), %v1744_v50, %v1748_v51  ;;  %4984 = vmatpush1.bf16.msra.mxu0 (!%p6604_p8), %v6653_v52  ;;  %v1962_v52 = vld [vmem:[#allocation10 + $0x348] sm:$0xff] (!%p6604_p8) }
 0x2fb   : > { %1724 = vst [vmem:[#allocation2 + $0x8] sm:$0xff] %v1722_v46  ;;  %v1736_v46 = vrot.slane (!%p6604_p8), %v8334_v42, %v8243_v30  ;;  %v6662_v55 = vcombine.high (!%p6604_p8), %v1913_v44, %v1917_v45  ;;  %v6661_v0 = vcombine.low (!%p6604_p8), %v1913_v44, %v1917_v45  ;;  %5148 = vmatpush1.bf16.msra.mxu1 (!%p6604_p8), %v6655_v54  ;;  %v1957_v43 = vld [vmem:[#allocation10 + $0x320] sm:$0xff] (!%p6604_p8)  ;;  %v1954_v44 = vld [vmem:[#allocation10 + $0x308] sm:$0xff] (!%p6604_p8) }
 0x2fc   : > { %v1780_v63 = vrot.slane %v1766_v56, %v8325_v16  ;;  %5149 = vmatprep.subr.bf16.mxu1 %v6664_v57  ;;  %v1958_v45 = vld [vmem:[#allocation10 + $0x328] sm:$0xff]  ;;  %v6702_v48 = vcombine.high %v1953_v41, %v1957_v43  ;;  %v1961_v50 = vld [vmem:[#allocation10 + $0x340] sm:$0xff]  ;;  %v6701_v54 = vcombine.low %v1953_v41, %v1957_v43 }
 0x2fd   : > { %v1765_v53 = vcombine.low %v1736_v46, %v1740_v47  ;;  %4985 = vmatprep.subr.bf16.mxu0 %v6662_v55  ;;  %v6693_v46 = vcombine.low %v1945_v18, %v1949_v19  ;;  %v6695_v47 = vcombine.low %v1946_v20, %v1950_v22  ;;  %v6704_v49 = vcombine.high %v1954_v44, %v1958_v45  ;;  %v1965_v51 = vld [vmem:[#allocation10 + $0x360] sm:$0xff]  ;;  %v1998_v18 = vld [vmem:[#allocation10 + $0x468] sm:$0xff] }
 0x2fe   : > { %4986 = vmatpush1.bf16.msra.mxu0 %v6661_v0  ;;  %v6703_v55 = vcombine.low %v1954_v44, %v1958_v45  ;;  %v6710_v56 = vcombine.high %v1961_v50, %v1965_v51  ;;  %v6709_v62 = vcombine.low %v1961_v50, %v1965_v51  ;;  %v6718_v0 = vcombine.high %v1969_v58, %v1973_v59  ;;  %v2006_v43 = vld [vmem:[#allocation10 + $0x4a8] sm:$0xff] }
 0x2ff   : > { %v1773_v60 = vrot.slane %v1765_v53, %v8325_v16  ;;  %5150 = vmatpush1.bf16.msra.mxu1 %v6663_v2  ;;  %4987 = vmatprep.subr.bf16.mxu0 %v6670_v3  ;;  %v1966_v53 = vld [vmem:[#allocation10 + $0x368] sm:$0xff]  ;;  %v1977_v2 = vld [vmem:[#allocation10 + $0x3c0] sm:$0xff] }
 0x300   : > { %5151 = vmatprep.subr.bf16.mxu1 %v6672_v5  ;;  %v6712_v57 = vcombine.high %v1962_v52, %v1966_v53  ;;  %v1981_v3 = vld [vmem:[#allocation10 + $0x3e0] sm:$0xff]  ;;  %v1978_v5 = vld [vmem:[#allocation10 + $0x3c8] sm:$0xff] }
 0x301   : > { %v1781_v4 = vcombine.low %v1773_v60, %v1780_v63  ;;  %v1970_v60 = vld [vmem:[#allocation10 + $0x388] sm:$0xff]  ;;  %v6711_v63 = vcombine.low %v1962_v52, %v1966_v53  ;;  %v6726_v9 = vcombine.high %v1977_v2, %v1981_v3  ;;  %v6725_v25 = vcombine.low %v1977_v2, %v1981_v3 }
 0x302   : > { %4988 = vmatpush1.bf16.msra.mxu0 %v6669_v11  ;;  %v6719_v8 = vcombine.low %v1970_v60, %v1974_v61  ;;  %v1985_v11 = vld [vmem:[#allocation10 + $0x400] sm:$0xff]  ;;  %v2014_v50 = vld [vmem:[#allocation10 + $0x4e8] sm:$0xff] }
 0x303   : > { %v1801_v10 = vadd.f32 %v1781_v4, %v1729_v1  ;;  %5152 = vmatpush1.bf16.msra.mxu1 %v6671_v12  ;;  %4989 = vmatprep.subr.bf16.mxu0 %v6678_v13  ;;  %v6720_v1 = vcombine.high %v1970_v60, %v1974_v61  ;;  %v1989_v12 = vld [vmem:[#allocation10 + $0x420] sm:$0xff]  ;;  %v2022_v58 = vld [vmem:[#allocation10 + $0x528] sm:$0xff] }
 0x304   : > { %5153 = vmatprep.subr.bf16.mxu1 %v6680_v17  ;;  %v1986_v17 = vld [vmem:[#allocation10 + $0x408] sm:$0xff]  ;;  %v6734_v26 = vcombine.high %v1985_v11, %v1989_v12  ;;  %v6733_v19 = vcombine.low %v1985_v11, %v1989_v12 }
 0x305   : > { %v8348_v15 = vmax.f32 %v1801_v10, 0.0  ;;  %v6728_v10 = vcombine.high %v1978_v5, %v1982_v6  ;;  %v6736_v28 = vcombine.high %v1986_v17, %v1990_v21  ;;  %v6735_v20 = vcombine.low %v1986_v17, %v1990_v21  ;;  %v2030_v2 = vld [vmem:[#allocation10 + $0x568] sm:$0xff]  ;;  %v2041_v21 = vld [vmem:[#allocation10 + $0x5c0] sm:$0xff] }
 0x306   : > { %4990 = vmatpush1.bf16.msra.mxu0 %v6677_v31  ;;  %v1993_v31 = vld [vmem:[#allocation10 + $0x440] sm:$0xff] }
 0x307   : > { %v8352_v29 = vrot.slane %v8348_v15, %v8325_v16  ;;  %5154 = vmatpush1.bf16.msra.mxu1 %v6679_v33  ;;  %4991 = vmatprep.subr.bf16.mxu0 %v6686_v34  ;;  %v1807_v4 = vcombine.high %v8348_v15, %v8348_v15  ;;  %v6727_v15 = vcombine.low %v1978_v5, %v1982_v6  ;;  %v1997_v33 = vld [vmem:[#allocation10 + $0x460] sm:$0xff] }
 0x308   : > { %5155 = vmatprep.subr.bf16.mxu1 %v6688_v35  ;;  %v1994_v35 = vld [vmem:[#allocation10 + $0x448] sm:$0xff]  ;;  %v6742_v22 = vcombine.high %v1993_v31, %v1997_v33  ;;  %v2033_v6 = vld [vmem:[#allocation10 + $0x580] sm:$0xff] }
 0x309   : > { %v1822_v14 = vcombine.high %v8352_v29, %v8352_v29  ;;  %v8363_v13 = vrot.slane %v1807_v4, %v8325_v16  ;;  %v6743_v44 = vcombine.low %v1994_v35, %v1998_v18 }
 0x30a   : > { %4992 = vmatpush1.bf16.msra.mxu0 %v6685_v24  ;;  %v2001_v24 = vld [vmem:[#allocation10 + $0x480] sm:$0xff] }
 0x30b   : > { %v8356_v23 = vpack.c.bf16 %v1822_v14, %v1822_v14  ;;  %5156 = vmatpush1.bf16.msra.mxu1 %v6687_v36  ;;  %4993 = vmatprep.subr.bf16.mxu0 %v6694_v39  ;;  %v1823_v34 = vcombine.high %v8363_v13, %v8363_v13  ;;  %v8369_v14 = vpack.c.bf16 %v8352_v29, %v8352_v29  ;;  %v2005_v36 = vld [vmem:[#allocation10 + $0x4a0] sm:$0xff] }
 0x30c   : > { %5157 = vmatprep.subr.bf16.mxu1 %v6696_v40  ;;  %v6744_v39 = vcombine.high %v1994_v35, %v1998_v18  ;;  %v2002_v40 = vld [vmem:[#allocation10 + $0x488] sm:$0xff]  ;;  %v6741_v29 = vcombine.low %v1993_v31, %v1997_v33  ;;  %v6750_v45 = vcombine.high %v2001_v24, %v2005_v36  ;;  %v6749_v51 = vcombine.low %v2001_v24, %v2005_v36  ;;  %v2049_v35 = vld [vmem:[#allocation10 + $0x600] sm:$0xff] }
 0x30d   : > { %5003 = vmatprep.mubr.bf16.mxu0 %v8356_v23  ;;  %5167 = vmatprep.mubr.bf16.mxu1 %v8356_v23  ;;  %v8371_v41 = vpack.c.bf16 %v1823_v34, %v1823_v34  ;;  %v6751_v52 = vcombine.low %v2002_v40, %v2006_v43  ;;  %v2053_v18 = vld [vmem:[#allocation10 + $0x620] sm:$0xff] }
 0x30e   : > { %4994 = vmatpush1.bf16.msra.mxu0 %v6693_v46  ;;  %v2009_v46 = vld [vmem:[#allocation10 + $0x4c0] sm:$0xff] }
 0x30f   : > { %5158 = vmatpush1.bf16.msra.mxu1 %v6695_v47  ;;  %4995 = vmatprep.subr.bf16.mxu0 %v6702_v48  ;;  %v2013_v47 = vld [vmem:[#allocation10 + $0x4e0] sm:$0xff]  ;;  %v2010_v48 = vld [vmem:[#allocation10 + $0x4c8] sm:$0xff] }
 0x310   : > { %5159 = vmatprep.subr.bf16.mxu1 %v6704_v49  ;;  %v6752_v49 = vcombine.high %v2002_v40, %v2006_v43  ;;  %v6758_v53 = vcombine.high %v2009_v46, %v2013_v47  ;;  %v6757_v59 = vcombine.low %v2009_v46, %v2013_v47  ;;  %v6759_v60 = vcombine.low %v2010_v48, %v2014_v50  ;;  %v2057_v36 = vld [vmem:[#allocation10 + $0x640] sm:$0xff] }
 0x311   : > { %v6798_v40 = vcombine.high %v2049_v35, %v2053_v18  ;;  %v2061_v43 = vld [vmem:[#allocation10 + $0x660] sm:$0xff]  ;;  %v1755_v46 = vsub.s32 5, %v8240_v27 }
 0x312   : > { %4996 = vmatpush1.bf16.msra.mxu0 %v6701_v54  ;;  %v2017_v54 = vld [vmem:[#allocation10 + $0x500] sm:$0xff] }
 0x313   : > { %5160 = vmatpush1.bf16.msra.mxu1 %v6703_v55  ;;  %4997 = vmatprep.subr.bf16.mxu0 %v6710_v56  ;;  %v2021_v55 = vld [vmem:[#allocation10 + $0x520] sm:$0xff]  ;;  %v2018_v56 = vld [vmem:[#allocation10 + $0x508] sm:$0xff] }
 0x314   : > { %5161 = vmatprep.subr.bf16.mxu1 %v6712_v57  ;;  %v6760_v57 = vcombine.high %v2010_v48, %v2014_v50  ;;  %v6766_v61 = vcombine.high %v2017_v54, %v2021_v55  ;;  %v6765_v3 = vcombine.low %v2017_v54, %v2021_v55  ;;  %v6767_v4 = vcombine.low %v2018_v56, %v2022_v58  ;;  %v2065_v54 = vld [vmem:[#allocation10 + $0x680] sm:$0xff] }
 0x315   : > { %v1759_v48 = vsub.s32 6, %v8240_v27  ;;  %v6797_v50 = vcombine.low %v2049_v35, %v2053_v18  ;;  %v2069_v55 = vld [vmem:[#allocation10 + $0x6a0] sm:$0xff]  ;;  %v2090_v35 = vld [vmem:[#allocation10 + $0x748] sm:$0xff] }
 0x316   : > { %4998 = vmatpush1.bf16.msra.mxu0 %v6709_v62  ;;  %v2025_v62 = vld [vmem:[#allocation10 + $0x540] sm:$0xff]  ;;  %v2094_v18 = vld [vmem:[#allocation10 + $0x768] sm:$0xff] }
 0x317   : > { %5162 = vmatpush1.bf16.msra.mxu1 %v6711_v63  ;;  %4999 = vmatprep.subr.bf16.mxu0 %v6718_v0  ;;  %v2029_v63 = vld [vmem:[#allocation10 + $0x560] sm:$0xff]  ;;  %v2026_v0 = vld [vmem:[#allocation10 + $0x548] sm:$0xff] }
 0x318   : > { %5163 = vmatprep.subr.bf16.mxu1 %v6720_v1  ;;  %v6768_v1 = vcombine.high %v2018_v56, %v2022_v58  ;;  %v6774_v5 = vcombine.high %v2025_v62, %v2029_v63  ;;  %v6773_v11 = vcombine.low %v2025_v62, %v2029_v63  ;;  %v6775_v12 = vcombine.low %v2026_v0, %v2030_v2  ;;  %v2066_v56 = vld [vmem:[#allocation10 + $0x688] sm:$0xff] }
 0x319   : > { %v6805_v62 = vcombine.low %v2057_v36, %v2061_v43 }
 0x31a   : > { %5000 = vmatpush1.bf16.msra.mxu0 %v6717_v7  ;;  %v2037_v7 = vld [vmem:[#allocation10 + $0x5a0] sm:$0xff] }
 0x31b   : > { %5164 = vmatpush1.bf16.msra.mxu1 %v6719_v8  ;;  %5001 = vmatprep.subr.bf16.mxu0 %v6726_v9  ;;  %v2034_v8 = vld [vmem:[#allocation10 + $0x588] sm:$0xff]  ;;  %v6776_v9 = vcombine.high %v2026_v0, %v2030_v2  ;;  %v6782_v17 = vcombine.high %v2033_v6, %v2037_v7  ;;  %v6781_v31 = vcombine.low %v2033_v6, %v2037_v7  ;;  %v2077_v2 = vld [vmem:[#allocation10 + $0x6e0] sm:$0xff] }
 0x31c   : > { %5165 = vmatprep.subr.bf16.mxu1 %v6728_v10  ;;  %v2038_v10 = vld [vmem:[#allocation10 + $0x5a8] sm:$0xff]  ;;  %v6814_v0 = vcombine.high %v2065_v54, %v2069_v55 }
 0x31d   : > { %v6783_v33 = vcombine.low %v2034_v8, %v2038_v10 }
 0x31e   : > { %5002 = vmatpush1.bf16.msra.mxu0 %v6725_v25  ;;  %v2045_v25 = vld [vmem:[#allocation10 + $0x5e0] sm:$0xff] }
 0x31f   : > { %5166 = vmatpush1.bf16.msra.mxu1 %v6727_v15  ;;  %5012 = vmatprep.subr.bf16.mxu0 %v6734_v26  ;;  %v2042_v15 = vld [vmem:[#allocation10 + $0x5c8] sm:$0xff]  ;;  %v6784_v26 = vcombine.high %v2034_v8, %v2038_v10  ;;  %v6790_v34 = vcombine.high %v2041_v21, %v2045_v25  ;;  %v6789_v24 = vcombine.low %v2041_v21, %v2045_v25  ;;  %v2081_v10 = vld [vmem:[#allocation10 + $0x700] sm:$0xff] }
 0x320   : > { %5176 = vmatprep.subr.bf16.mxu1 %v6736_v28  ;;  %v2046_v28 = vld [vmem:[#allocation10 + $0x5e8] sm:$0xff]  ;;  %v6813_v8 = vcombine.low %v2065_v54, %v2069_v55  ;;  %v2105_v54 = vld [vmem:[#allocation10 + $0x7c0] sm:$0xff] }
 0x321   : > { %5004 = vmatmul.mubr.bf16.vlgmr.msra.gmra.mrb[0].mxu0 %v8369_v14  ;;  %v2086_v21 = vld [vmem:[#allocation10 + $0x728] sm:$0xff]  ;;  %v2109_v55 = vld [vmem:[#allocation10 + $0x7e0] sm:$0xff] }
 0x322   : > { %5013 = vmatpush1.bf16.msra.mxu0 %v6733_v19  ;;  %5168 = vmatmul.mubr.bf16.vlgmr.msra.gmra.mrb[0].mxu1 %v8369_v14  ;;  %v2050_v19 = vld [vmem:[#allocation10 + $0x608] sm:$0xff] }
 0x323   : > { %5177 = vmatpush1.bf16.msra.mxu1 %v6735_v20  ;;  %5014 = vmatprep.subr.bf16.mxu0 %v6742_v22  ;;  %v6792_v20 = vcombine.high %v2042_v15, %v2046_v28  ;;  %v2054_v22 = vld [vmem:[#allocation10 + $0x628] sm:$0xff] }
 0x324   : > { %5178 = vmatprep.subr.bf16.mxu1 %v6744_v39  ;;  %5044 = vmatprep.mubr.bf16.mxu0 %v8371_v41  ;;  %v6791_v39 = vcombine.low %v2042_v15, %v2046_v28  ;;  %v6800_v47 = vcombine.high %v2050_v19, %v2054_v22  ;;  %v2089_v28 = vld [vmem:[#allocation10 + $0x740] sm:$0xff] }
 0x325   : > { %5208 = vmatprep.mubr.bf16.mxu1 %v8371_v41 }
 0x326   : > { %5015 = vmatpush1.bf16.msra.mxu0 %v6741_v29  ;;  %v2058_v29 = vld [vmem:[#allocation10 + $0x648] sm:$0xff] }
 0x327   : > { %5179 = vmatpush1.bf16.msra.mxu1 %v6743_v44  ;;  %5016 = vmatprep.subr.bf16.mxu0 %v6750_v45  ;;  %v2062_v44 = vld [vmem:[#allocation10 + $0x668] sm:$0xff]  ;;  %v1751_v45 = vsub.s32 4, %v8240_v27 }
 0x328   : > { %5180 = vmatprep.subr.bf16.mxu1 %v6752_v49  ;;  %v1763_v49 = vsub.s32 7, %v8240_v27  ;;  %v6807_v63 = vcombine.low %v2058_v29, %v2062_v44 }
 0x329   : > { %v1752_v58 = vrot.slane %v8334_v42, %v1751_v45 }
 0x32a   : > { %5017 = vmatpush1.bf16.msra.mxu0 %v6749_v51  ;;  %v6799_v51 = vcombine.low %v2050_v19, %v2054_v22 }
 0x32b   : > { %5181 = vmatpush1.bf16.msra.mxu1 %v6751_v52  ;;  %5018 = vmatprep.subr.bf16.mxu0 %v6758_v53  ;;  %v6806_v52 = vcombine.high %v2057_v36, %v2061_v43  ;;  %v6808_v53 = vcombine.high %v2058_v29, %v2062_v44  ;;  %v2101_v43 = vld [vmem:[#allocation10 + $0x7a0] sm:$0xff]  ;;  %v2098_v29 = vld [vmem:[#allocation10 + $0x788] sm:$0xff]  ;;  %v6840_v44 = vcombine.high %v2090_v35, %v2094_v18 }
 0x32c   : > { %5182 = vmatprep.subr.bf16.mxu1 %v6760_v57  ;;  %v2070_v57 = vld [vmem:[#allocation10 + $0x6a8] sm:$0xff] }
 0x32e   : > { %5019 = vmatpush1.bf16.msra.mxu0 %v6757_v59  ;;  %v1756_v59 = vrot.slane %v8334_v42, %v1755_v46 }
 0x32f   : > { %5183 = vmatpush1.bf16.msra.mxu1 %v6759_v60  ;;  %5020 = vmatprep.subr.bf16.mxu0 %v6766_v61  ;;  %v1760_v60 = vrot.slane %v8334_v42, %v1759_v48  ;;  %v1764_v61 = vrot.slane %v8334_v42, %v1763_v49 }
 0x330   : > { %5184 = vmatprep.subr.bf16.mxu1 %v6768_v1  ;;  %v2073_v1 = vld [vmem:[#allocation10 + $0x6c0] sm:$0xff]  ;;  %v1782_v6 = vcombine.low %v1752_v58, %v1756_v59  ;;  %v2110_v58 = vld [vmem:[#allocation10 + $0x7e8] sm:$0xff] }
 0x331   : > { %v1783_v7 = vcombine.low %v1760_v60, %v1764_v61  ;;  %v6822_v42 = vcombine.high %v2073_v1, %v2077_v2 }
 0x332   : > { %5021 = vmatpush1.bf16.msra.mxu0 %v6765_v3  ;;  %v2074_v3 = vld [vmem:[#allocation10 + $0x6c8] sm:$0xff]  ;;  %v1790_v25 = vrot.slane %v1782_v6, %v8325_v16 }
 0x333   : > { %5185 = vmatpush1.bf16.msra.mxu1 %v6767_v4  ;;  %5022 = vmatprep.subr.bf16.mxu0 %v6774_v5  ;;  %v6816_v4 = vcombine.high %v2066_v56, %v2070_v57  ;;  %v2078_v5 = vld [vmem:[#allocation10 + $0x6e8] sm:$0xff]  ;;  %v1797_v15 = vrot.slane %v1783_v7, %v8325_v16 }
 0x334   : > { %5186 = vmatprep.subr.bf16.mxu1 %v6776_v9  ;;  %v6815_v9 = vcombine.low %v2066_v56, %v2070_v57  ;;  %v2106_v56 = vld [vmem:[#allocation10 + $0x7c8] sm:$0xff] }
 0x335   : > { %v1798_v22 = vcombine.low %v1790_v25, %v1797_v15  ;;  %v6855_v6 = vcombine.low %v2106_v56, %v2110_v58 }
 0x336   : > { %5023 = vmatpush1.bf16.msra.mxu0 %v6773_v11  ;;  %v2085_v11 = vld [vmem:[#allocation10 + $0x720] sm:$0xff] }
 0x337   : > { %5187 = vmatpush1.bf16.msra.mxu1 %v6775_v12  ;;  %5024 = vmatprep.subr.bf16.mxu0 %v6782_v17  ;;  %v2082_v12 = vld [vmem:[#allocation10 + $0x708] sm:$0xff]  ;;  %v6824_v17 = vcombine.high %v2074_v3, %v2078_v5 }
 0x338   : > { %5188 = vmatprep.subr.bf16.mxu1 %v6784_v26  ;;  %v6821_v26 = vcombine.low %v2073_v1, %v2077_v2  ;;  %v6832_v19 = vcombine.high %v2082_v12, %v2086_v21  ;;  %v6831_v36 = vcombine.low %v2082_v12, %v2086_v21  ;;  %v2114_v1 = vld [vmem:[#allocation10 + $0x808] sm:$0xff]  ;;  %v6856_v2 = vcombine.high %v2106_v56, %v2110_v58  ;;  %v2157_v58 = vld [vmem:[#allocation10 + $0x960] sm:$0xff] }
 0x33a   : > { %5025 = vmatpush1.bf16.msra.mxu0 %v6781_v31  ;;  %v6823_v31 = vcombine.low %v2074_v3, %v2078_v5  ;;  %v2118_v3 = vld [vmem:[#allocation10 + $0x828] sm:$0xff]  ;;  %v6853_v5 = vcombine.low %v2105_v54, %v2109_v55 }
 0x33b   : > { %5189 = vmatpush1.bf16.msra.mxu1 %v6783_v33  ;;  %5026 = vmatprep.subr.bf16.mxu0 %v6790_v34  ;;  %v6830_v33 = vcombine.high %v2081_v10, %v2085_v11  ;;  %v2093_v34 = vld [vmem:[#allocation10 + $0x760] sm:$0xff]  ;;  %v6863_v25 = vcombine.low %v2114_v1, %v2118_v3 }
 0x33c   : > { %5190 = vmatprep.subr.bf16.mxu1 %v6792_v20  ;;  %v1730_v20 = vld [vmem:[#allocation2 + $0x8] sm:$0xff] }
 0x33e   : > { %5027 = vmatpush1.bf16.msra.mxu0 %v6789_v24  ;;  %v6829_v24 = vcombine.low %v2081_v10, %v2085_v11  ;;  %v6864_v10 = vcombine.high %v2114_v1, %v2118_v3  ;;  %v2126_v11 = vld [vmem:[#allocation10 + $0x868] sm:$0xff]  ;;  %v2165_v3 = vld [vmem:[#allocation10 + $0x9a0] sm:$0xff] }
 0x33f   : > { %5191 = vmatpush1.bf16.msra.mxu1 %v6791_v39  ;;  %5028 = vmatprep.subr.bf16.mxu0 %v6798_v40  ;;  %v6838_v39 = vcombine.high %v2089_v28, %v2093_v34  ;;  %v2097_v40 = vld [vmem:[#allocation10 + $0x780] sm:$0xff] }
 0x340   : > { %5192 = vmatprep.subr.bf16.mxu1 %v6800_v47  ;;  %v2102_v47 = vld [vmem:[#allocation10 + $0x7a8] sm:$0xff]  ;;  %v6845_v60 = vcombine.low %v2097_v40, %v2101_v43 }
 0x341   : > { %v6848_v57 = vcombine.high %v2098_v29, %v2102_v47  ;;  %v6847_v61 = vcombine.low %v2098_v29, %v2102_v47  ;;  %v2145_v47 = vld [vmem:[#allocation10 + $0x900] sm:$0xff] }
 0x342   : > { %5029 = vmatpush1.bf16.msra.mxu0 %v6797_v50  ;;  %v1802_v50 = vadd.f32 %v1798_v22, %v1730_v20  ;;  %v2137_v22 = vld [vmem:[#allocation10 + $0x8c0] sm:$0xff] }
 0x343   : > { %5193 = vmatpush1.bf16.msra.mxu1 %v6799_v51  ;;  %5030 = vmatprep.subr.bf16.mxu0 %v6806_v52  ;;  %v6837_v51 = vcombine.low %v2089_v28, %v2093_v34  ;;  %v6839_v52 = vcombine.low %v2090_v35, %v2094_v18  ;;  %v2129_v28 = vld [vmem:[#allocation10 + $0x880] sm:$0xff]  ;;  %v2130_v34 = vld [vmem:[#allocation10 + $0x888] sm:$0xff] }
 0x344   : > { %5194 = vmatprep.subr.bf16.mxu1 %v6808_v53  ;;  %v6846_v53 = vcombine.high %v2097_v40, %v2101_v43  ;;  %v8395_v59 = vmax.f32 %v1802_v50, 0.0  ;;  %v2134_v35 = vld [vmem:[#allocation10 + $0x8a8] sm:$0xff]  ;;  %v2149_v50 = vld [vmem:[#allocation10 + $0x920] sm:$0xff] }
 0x345   : > { %v6880_v20 = vcombine.high %v2130_v34, %v2134_v35  ;;  %v6879_v43 = vcombine.low %v2130_v34, %v2134_v35  ;;  %v2181_v34 = vld [vmem:[#allocation10 + $0xa20] sm:$0xff]  ;;  %v2178_v35 = vld [vmem:[#allocation10 + $0xa08] sm:$0xff] }
 0x346   : > { %5031 = vmatpush1.bf16.msra.mxu0 %v6805_v62  ;;  %v6854_v62 = vcombine.high %v2105_v54, %v2109_v55  ;;  %v6894_v55 = vcombine.high %v2145_v47, %v2149_v50 }
 0x347   : > { %5195 = vmatpush1.bf16.msra.mxu1 %v6807_v63  ;;  %5032 = vmatprep.subr.bf16.mxu0 %v6814_v0  ;;  %v2113_v63 = vld [vmem:[#allocation10 + $0x800] sm:$0xff] }
 0x348   : > { %5196 = vmatprep.subr.bf16.mxu1 %v6816_v4  ;;  %v2117_v0 = vld [vmem:[#allocation10 + $0x820] sm:$0xff]  ;;  %v8399_v4 = vrot.slane %v8395_v59, %v8325_v16 }
 0x349   : > { %v6862_v7 = vcombine.high %v2113_v63, %v2117_v0  ;;  %v6861_v21 = vcombine.low %v2113_v63, %v2117_v0 }
 0x34a   : > { %5033 = vmatpush1.bf16.msra.mxu0 %v6813_v8  ;;  %v2121_v8 = vld [vmem:[#allocation10 + $0x840] sm:$0xff]  ;;  %v1839_v12 = vcombine.high %v8399_v4, %v8399_v4 }
 0x34b   : > { %5197 = vmatpush1.bf16.msra.mxu1 %v6815_v9  ;;  %5034 = vmatprep.subr.bf16.mxu0 %v6822_v42  ;;  %v2125_v9 = vld [vmem:[#allocation10 + $0x860] sm:$0xff]  ;;  %v2122_v42 = vld [vmem:[#allocation10 + $0x848] sm:$0xff] }
 0x34c   : > { %5198 = vmatprep.subr.bf16.mxu1 %v6824_v17  ;;  %v8405_v17 = vpack.c.bf16 %v8363_v13, %v8363_v13  ;;  %v6870_v15 = vcombine.high %v2121_v8, %v2125_v9  ;;  %v6869_v13 = vcombine.low %v2121_v8, %v2125_v9  ;;  %v6871_v18 = vcombine.low %v2122_v42, %v2126_v11 }
 0x34e   : > { %5035 = vmatpush1.bf16.msra.mxu0 %v6821_v26  ;;  %v6872_v26 = vcombine.high %v2122_v42, %v2126_v11  ;;  %v2173_v11 = vld [vmem:[#allocation10 + $0x9e0] sm:$0xff] }
 0x34f   : > { %5199 = vmatpush1.bf16.msra.mxu1 %v6823_v31  ;;  %5036 = vmatprep.subr.bf16.mxu0 %v6830_v33  ;;  %v2133_v31 = vld [vmem:[#allocation10 + $0x8a0] sm:$0xff]  ;;  %v8407_v33 = vpack.c.bf16 %v1839_v12, %v1839_v12  ;;  %v2170_v12 = vld [vmem:[#allocation10 + $0x9c8] sm:$0xff] }
 0x350   : > { %5200 = vmatprep.subr.bf16.mxu1 %v6832_v19  ;;  %v6878_v19 = vcombine.high %v2129_v28, %v2133_v31  ;;  %v6877_v40 = vcombine.low %v2129_v28, %v2133_v31  ;;  %v2177_v31 = vld [vmem:[#allocation10 + $0xa00] sm:$0xff] }
 0x352   : > { %5037 = vmatpush1.bf16.msra.mxu0 %v6829_v24  ;;  %v2141_v24 = vld [vmem:[#allocation10 + $0x8e0] sm:$0xff] }
 0x353   : > { %5201 = vmatpush1.bf16.msra.mxu1 %v6831_v36  ;;  %5038 = vmatprep.subr.bf16.mxu0 %v6838_v39  ;;  %v2138_v36 = vld [vmem:[#allocation10 + $0x8c8] sm:$0xff]  ;;  %v6886_v29 = vcombine.high %v2137_v22, %v2141_v24 }
 0x354   : > { %5202 = vmatprep.subr.bf16.mxu1 %v6840_v44  ;;  %v2142_v39 = vld [vmem:[#allocation10 + $0x8e8] sm:$0xff] }
 0x355   : > { %v6888_v44 = vcombine.high %v2138_v36, %v2142_v39  ;;  %v6887_v54 = vcombine.low %v2138_v36, %v2142_v39  ;;  %v2189_v36 = vld [vmem:[#allocation10 + $0xa60] sm:$0xff]  ;;  %v2186_v39 = vld [vmem:[#allocation10 + $0xa48] sm:$0xff] }
 0x356   : > { %5039 = vmatpush1.bf16.msra.mxu0 %v6837_v51  ;;  %v2146_v51 = vld [vmem:[#allocation10 + $0x908] sm:$0xff] }
 0x357   : > { %5203 = vmatpush1.bf16.msra.mxu1 %v6839_v52  ;;  %5040 = vmatprep.subr.bf16.mxu0 %v6846_v53  ;;  %v2150_v52 = vld [vmem:[#allocation10 + $0x928] sm:$0xff]  ;;  %v6885_v53 = vcombine.low %v2137_v22, %v2141_v24  ;;  %v2185_v24 = vld [vmem:[#allocation10 + $0xa40] sm:$0xff] }
 0x358   : > { %5204 = vmatprep.subr.bf16.mxu1 %v6848_v57  ;;  %v6896_v56 = vcombine.high %v2146_v51, %v2150_v52  ;;  %v2153_v57 = vld [vmem:[#allocation10 + $0x940] sm:$0xff]  ;;  %v6895_v63 = vcombine.low %v2146_v51, %v2150_v52  ;;  %v2194_v52 = vld [vmem:[#allocation10 + $0xa88] sm:$0xff] }
 0x359   : > { %v6902_v0 = vcombine.high %v2153_v57, %v2157_v58  ;;  %v2197_v51 = vld [vmem:[#allocation10 + $0xaa0] sm:$0xff] }
 0x35a   : > { %5041 = vmatpush1.bf16.msra.mxu0 %v6845_v60  ;;  %v2154_v60 = vld [vmem:[#allocation10 + $0x948] sm:$0xff] }
 0x35b   : > { %5205 = vmatpush1.bf16.msra.mxu1 %v6847_v61  ;;  %5042 = vmatprep.subr.bf16.mxu0 %v6854_v62  ;;  %v2158_v61 = vld [vmem:[#allocation10 + $0x968] sm:$0xff]  ;;  %v6893_v62 = vcombine.low %v2145_v47, %v2149_v50  ;;  %v2193_v50 = vld [vmem:[#allocation10 + $0xa80] sm:$0xff] }
 0x35c   : > { %5206 = vmatprep.subr.bf16.mxu1 %v6856_v2  ;;  %v6904_v1 = vcombine.high %v2154_v60, %v2158_v61  ;;  %v2161_v2 = vld [vmem:[#allocation10 + $0x980] sm:$0xff]  ;;  %v6903_v8 = vcombine.low %v2154_v60, %v2158_v61  ;;  %v2202_v61 = vld [vmem:[#allocation10 + $0xac8] sm:$0xff] }
 0x35d   : > { %v6910_v9 = vcombine.high %v2161_v2, %v2165_v3  ;;  %v2205_v60 = vld [vmem:[#allocation10 + $0xae0] sm:$0xff] }
 0x35e   : > { %5043 = vmatpush1.bf16.msra.mxu0 %v6853_v5  ;;  %v2162_v5 = vld [vmem:[#allocation10 + $0x988] sm:$0xff] }
 0x35f   : > { %5207 = vmatpush1.bf16.msra.mxu1 %v6855_v6  ;;  %5053 = vmatprep.subr.bf16.mxu0 %v6862_v7  ;;  %v2166_v6 = vld [vmem:[#allocation10 + $0x9a8] sm:$0xff]  ;;  %v6901_v7 = vcombine.low %v2153_v57, %v2157_v58  ;;  %v2201_v58 = vld [vmem:[#allocation10 + $0xac0] sm:$0xff] }
 0x360   : > { %5217 = vmatprep.subr.bf16.mxu1 %v6864_v10  ;;  %v6912_v42 = vcombine.high %v2162_v5, %v2166_v6  ;;  %v2169_v10 = vld [vmem:[#allocation10 + $0x9c0] sm:$0xff] }
 0x361   : > { %5045 = vmatmul.mubr.bf16.vlgmr.msra.gmra.mrb[0].mxu0 %v8405_v17 }
 0x362   : > { %5054 = vmatpush1.bf16.msra.mxu0 %v6861_v21  ;;  %5209 = vmatmul.mubr.bf16.vlgmr.msra.gmra.mrb[0].mxu1 %v8405_v17  ;;  %v2174_v21 = vld [vmem:[#allocation10 + $0x9e8] sm:$0xff] }
 0x363   : > { %5218 = vmatpush1.bf16.msra.mxu1 %v6863_v25  ;;  %5055 = vmatprep.subr.bf16.mxu0 %v6870_v15  ;;  %v6909_v25 = vcombine.low %v2161_v2, %v2165_v3  ;;  %v6911_v15 = vcombine.low %v2162_v5, %v2166_v6  ;;  %v6920_v28 = vcombine.high %v2170_v12, %v2174_v21  ;;  %v2209_v3 = vld [vmem:[#allocation10 + $0xb00] sm:$0xff]  ;;  %v2210_v6 = vld [vmem:[#allocation10 + $0xb08] sm:$0xff] }
 0x364   : > { %5219 = vmatprep.subr.bf16.mxu1 %v6872_v26  ;;  %5085 = vmatprep.mubr.bf16.mxu0 %v8407_v33  ;;  %v6918_v26 = vcombine.high %v2169_v10, %v2173_v11  ;;  %v2213_v5 = vld [vmem:[#allocation10 + $0xb20] sm:$0xff] }
 0x365   : > { %5249 = vmatprep.mubr.bf16.mxu1 %v8407_v33 }
 0x366   : > { %5056 = vmatpush1.bf16.msra.mxu0 %v6869_v13  ;;  %v2182_v13 = vld [vmem:[#allocation10 + $0xa28] sm:$0xff] }
 0x367   : > { %5220 = vmatpush1.bf16.msra.mxu1 %v6871_v18  ;;  %5057 = vmatprep.subr.bf16.mxu0 %v6878_v19  ;;  %v6917_v18 = vcombine.low %v2169_v10, %v2173_v11  ;;  %v6919_v19 = vcombine.low %v2170_v12, %v2174_v21  ;;  %v6928_v22 = vcombine.high %v2178_v35, %v2182_v13  ;;  %v2217_v11 = vld [vmem:[#allocation10 + $0xb40] sm:$0xff]  ;;  %v2218_v21 = vld [vmem:[#allocation10 + $0xb48] sm:$0xff] }
 0x368   : > { %5221 = vmatprep.subr.bf16.mxu1 %v6880_v20  ;;  %v6926_v20 = vcombine.high %v2177_v31, %v2181_v34  ;;  %v2221_v12 = vld [vmem:[#allocation10 + $0xb60] sm:$0xff] }
 0x36a   : > { %5058 = vmatpush1.bf16.msra.mxu0 %v6877_v40  ;;  %v2190_v40 = vld [vmem:[#allocation10 + $0xa68] sm:$0xff] }
 0x36b   : > { %5222 = vmatpush1.bf16.msra.mxu1 %v6879_v43  ;;  %5059 = vmatprep.subr.bf16.mxu0 %v6886_v29  ;;  %v6925_v43 = vcombine.low %v2177_v31, %v2181_v34  ;;  %v6927_v29 = vcombine.low %v2178_v35, %v2182_v13  ;;  %v6936_v47 = vcombine.high %v2186_v39, %v2190_v40  ;;  %v2225_v34 = vld [vmem:[#allocation10 + $0xb80] sm:$0xff]  ;;  %v2226_v13 = vld [vmem:[#allocation10 + $0xb88] sm:$0xff] }
 0x36c   : > { %5223 = vmatprep.subr.bf16.mxu1 %v6888_v44  ;;  %v6934_v44 = vcombine.high %v2185_v24, %v2189_v36  ;;  %v2229_v35 = vld [vmem:[#allocation10 + $0xba0] sm:$0xff] }
 0x36e   : > { %5060 = vmatpush1.bf16.msra.mxu0 %v6885_v53  ;;  %v2198_v53 = vld [vmem:[#allocation10 + $0xaa8] sm:$0xff] }
 0x36f   : > { %5224 = vmatpush1.bf16.msra.mxu1 %v6887_v54  ;;  %5061 = vmatprep.subr.bf16.mxu0 %v6894_v55  ;;  %v6933_v54 = vcombine.low %v2185_v24, %v2189_v36  ;;  %v6935_v55 = vcombine.low %v2186_v39, %v2190_v40  ;;  %v6944_v57 = vcombine.high %v2194_v52, %v2198_v53  ;;  %v2233_v36 = vld [vmem:[#allocation10 + $0xbc0] sm:$0xff] }
 0x370   : > { %5225 = vmatprep.subr.bf16.mxu1 %v6896_v56  ;;  %v6942_v56 = vcombine.high %v2193_v50, %v2197_v51  ;;  %v2237_v39 = vld [vmem:[#allocation10 + $0xbe0] sm:$0xff]  ;;  %v1824_v40 = vcombine.high %v8395_v59, %v8395_v59 }
 0x372   : > { %5062 = vmatpush1.bf16.msra.mxu0 %v6893_v62  ;;  %v2206_v62 = vld [vmem:[#allocation10 + $0xae8] sm:$0xff] }
 0x373   : > { %5226 = vmatpush1.bf16.msra.mxu1 %v6895_v63  ;;  %5063 = vmatprep.subr.bf16.mxu0 %v6902_v0  ;;  %v6941_v63 = vcombine.low %v2193_v50, %v2197_v51  ;;  %v6943_v0 = vcombine.low %v2194_v52, %v2198_v53  ;;  %v6952_v2 = vcombine.high %v2202_v61, %v2206_v62  ;;  %v2241_v52 = vld [vmem:[#allocation10 + $0xc00] sm:$0xff] }
 0x374   : > { %5227 = vmatprep.subr.bf16.mxu1 %v6904_v1  ;;  %v6950_v1 = vcombine.high %v2201_v58, %v2205_v60  ;;  %v6982_v50 = vcombine.high %v2233_v36, %v2237_v39  ;;  %v2245_v53 = vld [vmem:[#allocation10 + $0xc20] sm:$0xff] }
 0x376   : > { %5064 = vmatpush1.bf16.msra.mxu0 %v6901_v7  ;;  %v2214_v7 = vld [vmem:[#allocation10 + $0xb28] sm:$0xff] }
 0x377   : > { %5228 = vmatpush1.bf16.msra.mxu1 %v6903_v8  ;;  %5065 = vmatprep.subr.bf16.mxu0 %v6910_v9  ;;  %v6949_v8 = vcombine.low %v2201_v58, %v2205_v60  ;;  %v6951_v9 = vcombine.low %v2202_v61, %v2206_v62  ;;  %v6960_v10 = vcombine.high %v2210_v6, %v2214_v7  ;;  %v2249_v61 = vld [vmem:[#allocation10 + $0xc40] sm:$0xff] }
 0x378   : > { %5229 = vmatprep.subr.bf16.mxu1 %v6912_v42  ;;  %v6958_v42 = vcombine.high %v2209_v3, %v2213_v5  ;;  %v6990_v58 = vcombine.high %v2241_v52, %v2245_v53  ;;  %v2253_v62 = vld [vmem:[#allocation10 + $0xc60] sm:$0xff] }
 0x37a   : > { %5066 = vmatpush1.bf16.msra.mxu0 %v6909_v25  ;;  %v2222_v25 = vld [vmem:[#allocation10 + $0xb68] sm:$0xff] }
 0x37b   : > { %5230 = vmatpush1.bf16.msra.mxu1 %v6911_v15  ;;  %5067 = vmatprep.subr.bf16.mxu0 %v6918_v26  ;;  %v6957_v15 = vcombine.low %v2209_v3, %v2213_v5  ;;  %v6959_v26 = vcombine.low %v2210_v6, %v2214_v7  ;;  %v6968_v31 = vcombine.high %v2218_v21, %v2222_v25  ;;  %v2257_v7 = vld [vmem:[#allocation10 + $0xc80] sm:$0xff] }
 0x37c   : > { %5231 = vmatprep.subr.bf16.mxu1 %v6920_v28  ;;  %v6966_v28 = vcombine.high %v2217_v11, %v2221_v12  ;;  %v6998_v5 = vcombine.high %v2249_v61, %v2253_v62 }
 0x37e   : > { %5068 = vmatpush1.bf16.msra.mxu0 %v6917_v18  ;;  %v2230_v18 = vld [vmem:[#allocation10 + $0xba8] sm:$0xff] }
 0x37f   : > { %5232 = vmatpush1.bf16.msra.mxu1 %v6919_v19  ;;  %5069 = vmatprep.subr.bf16.mxu0 %v6926_v20  ;;  %v6965_v19 = vcombine.low %v2217_v11, %v2221_v12  ;;  %v6967_v20 = vcombine.low %v2218_v21, %v2222_v25  ;;  %v6976_v24 = vcombine.high %v2226_v13, %v2230_v18  ;;  %v2265_v25 = vld [vmem:[#allocation10 + $0xcc0] sm:$0xff] }
 0x380   : > { %5233 = vmatprep.subr.bf16.mxu1 %v6928_v22  ;;  %v6974_v22 = vcombine.high %v2225_v34, %v2229_v35 }
 0x382   : > { %5070 = vmatpush1.bf16.msra.mxu0 %v6925_v43  ;;  %v2234_v43 = vld [vmem:[#allocation10 + $0xbc8] sm:$0xff] }
 0x383   : > { %5234 = vmatpush1.bf16.msra.mxu1 %v6927_v29  ;;  %5071 = vmatprep.subr.bf16.mxu0 %v6934_v44  ;;  %v2238_v29 = vld [vmem:[#allocation10 + $0xbe8] sm:$0xff]  ;;  %v6973_v44 = vcombine.low %v2225_v34, %v2229_v35 }
 0x384   : > { %5235 = vmatprep.subr.bf16.mxu1 %v6936_v47  ;;  %v6975_v47 = vcombine.low %v2226_v13, %v2230_v18  ;;  %v6984_v51 = vcombine.high %v2234_v43, %v2238_v29  ;;  %v6983_v59 = vcombine.low %v2234_v43, %v2238_v29  ;;  %v2273_v18 = vld [vmem:[#allocation10 + $0xd00] sm:$0xff] }
 0x385   : > { %v2281_v43 = vld [vmem:[#allocation10 + $0xd40] sm:$0xff] }
 0x386   : > { %5072 = vmatpush1.bf16.msra.mxu0 %v6933_v54  ;;  %v8416_v54 = vrot.slane %v1824_v40, %v8325_v16  ;;  %v2250_v16 = vld [vmem:[#allocation10 + $0xc48] sm:$0xff]  ;;  %v2285_v29 = vld [vmem:[#allocation10 + $0xd60] sm:$0xff] }
 0x387   : > { %5236 = vmatpush1.bf16.msra.mxu1 %v6935_v55  ;;  %5073 = vmatprep.subr.bf16.mxu0 %v6942_v56  ;;  %v2242_v55 = vld [vmem:[#allocation10 + $0xc08] sm:$0xff] }
 0x388   : > { %5237 = vmatprep.subr.bf16.mxu1 %v6944_v57  ;;  %v2246_v56 = vld [vmem:[#allocation10 + $0xc28] sm:$0xff]  ;;  %v6981_v57 = vcombine.low %v2233_v36, %v2237_v39 }
 0x389   : > { %v6992_v60 = vcombine.high %v2242_v55, %v2246_v56  ;;  %v6991_v3 = vcombine.low %v2242_v55, %v2246_v56  ;;  %v2289_v55 = vld [vmem:[#allocation10 + $0xd80] sm:$0xff] }
 0x38a   : > { %5074 = vmatpush1.bf16.msra.mxu0 %v6941_v63  ;;  %v1840_v63 = vcombine.high %v8416_v54, %v8416_v54  ;;  %v2293_v56 = vld [vmem:[#allocation10 + $0xda0] sm:$0xff] }
 0x38b   : > { %5238 = vmatpush1.bf16.msra.mxu1 %v6943_v0  ;;  %5075 = vmatprep.subr.bf16.mxu0 %v6950_v1  ;;  %v8422_v0 = vpack.c.bf16 %v8399_v4, %v8399_v4  ;;  %v2254_v1 = vld [vmem:[#allocation10 + $0xc68] sm:$0xff]  ;;  %v6997_v4 = vcombine.low %v2249_v61, %v2253_v62  ;;  %v7038_v61 = vcombine.high %v2289_v55, %v2293_v56 }
 0x38c   : > { %5239 = vmatprep.subr.bf16.mxu1 %v6952_v2  ;;  %v6989_v2 = vcombine.low %v2241_v52, %v2245_v53  ;;  %v7000_v6 = vcombine.high %v2250_v16, %v2254_v1  ;;  %v6999_v11 = vcombine.low %v2250_v16, %v2254_v1  ;;  %v7030_v52 = vcombine.high %v2281_v43, %v2285_v29  ;;  %v2301_v16 = vld [vmem:[#allocation10 + $0xde0] sm:$0xff]  ;;  %v2298_v1 = vld [vmem:[#allocation10 + $0xdc8] sm:$0xff] }
 0x38e   : > { %5076 = vmatpush1.bf16.msra.mxu0 %v6949_v8  ;;  %v2261_v8 = vld [vmem:[#allocation10 + $0xca0] sm:$0xff] }
 0x38f   : > { %5240 = vmatpush1.bf16.msra.mxu1 %v6951_v9  ;;  %5077 = vmatprep.subr.bf16.mxu0 %v6958_v42  ;;  %v8424_v9 = vpack.c.bf16 %v1840_v63, %v1840_v63  ;;  %v2258_v42 = vld [vmem:[#allocation10 + $0xc88] sm:$0xff]  ;;  %v7006_v12 = vcombine.high %v2257_v7, %v2261_v8  ;;  %v2297_v63 = vld [vmem:[#allocation10 + $0xdc0] sm:$0xff] }
 0x390   : > { %5241 = vmatprep.subr.bf16.mxu1 %v6960_v10  ;;  %v2262_v10 = vld [vmem:[#allocation10 + $0xca8] sm:$0xff] }
 0x391   : > { %v7008_v21 = vcombine.high %v2258_v42, %v2262_v10  ;;  %v7007_v34 = vcombine.low %v2258_v42, %v2262_v10  ;;  %v2309_v42 = vld [vmem:[#allocation10 + $0xe20] sm:$0xff]  ;;  %v2306_v10 = vld [vmem:[#allocation10 + $0xe08] sm:$0xff] }
 0x392   : > { %5078 = vmatpush1.bf16.msra.mxu0 %v6957_v15  ;;  %v2269_v15 = vld [vmem:[#allocation10 + $0xce0] sm:$0xff] }
 0x393   : > { %5242 = vmatpush1.bf16.msra.mxu1 %v6959_v26  ;;  %5079 = vmatprep.subr.bf16.mxu0 %v6966_v28  ;;  %v2266_v26 = vld [vmem:[#allocation10 + $0xcc8] sm:$0xff]  ;;  %v7014_v35 = vcombine.high %v2265_v25, %v2269_v15 }
 0x394   : > { %5243 = vmatprep.subr.bf16.mxu1 %v6968_v31  ;;  %v2270_v28 = vld [vmem:[#allocation10 + $0xce8] sm:$0xff]  ;;  %v7005_v31 = vcombine.low %v2257_v7, %v2261_v8  ;;  %v2305_v8 = vld [vmem:[#allocation10 + $0xe00] sm:$0xff] }
 0x395   : > { %v7016_v13 = vcombine.high %v2266_v26, %v2270_v28  ;;  %v7015_v36 = vcombine.low %v2266_v26, %v2270_v28  ;;  %v2317_v26 = vld [vmem:[#allocation10 + $0xe60] sm:$0xff]  ;;  %v2314_v28 = vld [vmem:[#allocation10 + $0xe48] sm:$0xff] }
 0x396   : > { %5080 = vmatpush1.bf16.msra.mxu0 %v6965_v19  ;;  %v2277_v19 = vld [vmem:[#allocation10 + $0xd20] sm:$0xff] }
 0x397   : > { %5244 = vmatpush1.bf16.msra.mxu1 %v6967_v20  ;;  %5081 = vmatprep.subr.bf16.mxu0 %v6974_v22  ;;  %v2274_v20 = vld [vmem:[#allocation10 + $0xd08] sm:$0xff]  ;;  %v7022_v39 = vcombine.high %v2273_v18, %v2277_v19 }
 0x398   : > { %5245 = vmatprep.subr.bf16.mxu1 %v6976_v24  ;;  %v2278_v22 = vld [vmem:[#allocation10 + $0xd28] sm:$0xff]  ;;  %v7013_v24 = vcombine.low %v2265_v25, %v2269_v15  ;;  %v2313_v15 = vld [vmem:[#allocation10 + $0xe40] sm:$0xff] }
 0x399   : > { %v7024_v40 = vcombine.high %v2274_v20, %v2278_v22 }
 0x39a   : > { %5082 = vmatpush1.bf16.msra.mxu0 %v6973_v44  ;;  %v2282_v44 = vld [vmem:[#allocation10 + $0xd48] sm:$0xff] }
 0x39b   : > { %5246 = vmatpush1.bf16.msra.mxu1 %v6975_v47  ;;  %5083 = vmatprep.subr.bf16.mxu0 %v6982_v50  ;;  %v2286_v47 = vld [vmem:[#allocation10 + $0xd68] sm:$0xff]  ;;  %v7021_v50 = vcombine.low %v2273_v18, %v2277_v19  ;;  %v2321_v19 = vld [vmem:[#allocation10 + $0xe80] sm:$0xff] }
 0x39c   : > { %5247 = vmatprep.subr.bf16.mxu1 %v6984_v51  ;;  %v7023_v51 = vcombine.low %v2274_v20, %v2278_v22  ;;  %v7032_v53 = vcombine.high %v2282_v44, %v2286_v47  ;;  %v2325_v20 = vld [vmem:[#allocation10 + $0xea0] sm:$0xff]  ;;  %v2322_v22 = vld [vmem:[#allocation10 + $0xe88] sm:$0xff] }
 0x39e   : > { %5084 = vmatpush1.bf16.msra.mxu0 %v6981_v57  ;;  %v2290_v57 = vld [vmem:[#allocation10 + $0xd88] sm:$0xff] }
 0x39f   : > { %5248 = vmatpush1.bf16.msra.mxu1 %v6983_v59  ;;  %5094 = vmatprep.subr.bf16.mxu0 %v6990_v58  ;;  %v2294_v59 = vld [vmem:[#allocation10 + $0xda8] sm:$0xff]  ;;  %v7029_v58 = vcombine.low %v2281_v43, %v2285_v29  ;;  %v2329_v29 = vld [vmem:[#allocation10 + $0xec0] sm:$0xff] }
 0x3a0   : > { %5258 = vmatprep.subr.bf16.mxu1 %v6992_v60  ;;  %v7031_v60 = vcombine.low %v2282_v44, %v2286_v47  ;;  %v7040_v62 = vcombine.high %v2290_v57, %v2294_v59  ;;  %v2333_v44 = vld [vmem:[#allocation10 + $0xee0] sm:$0xff]  ;;  %v2330_v47 = vld [vmem:[#allocation10 + $0xec8] sm:$0xff] }
 0x3a1   : > { %5086 = vmatmul.mubr.bf16.vlgmr.msra.gmra.mrb[0].mxu0 %v8422_v0 }
 0x3a2   : > { %5095 = vmatpush1.bf16.msra.mxu0 %v6989_v2  ;;  %5250 = vmatmul.mubr.bf16.vlgmr.msra.gmra.mrb[0].mxu1 %v8422_v0  ;;  %v2302_v2 = vld [vmem:[#allocation10 + $0xde8] sm:$0xff] }
 0x3a3   : > { %5259 = vmatpush1.bf16.msra.mxu1 %v6991_v3  ;;  %5096 = vmatprep.subr.bf16.mxu0 %v6998_v5  ;;  %v7037_v3 = vcombine.low %v2289_v55, %v2293_v56  ;;  %v7039_v5 = vcombine.low %v2290_v57, %v2294_v59  ;;  %v7048_v7 = vcombine.high %v2298_v1, %v2302_v2  ;;  %v2337_v56 = vld [vmem:[#allocation10 + $0xf00] sm:$0xff]  ;;  %v2338_v59 = vld [vmem:[#allocation10 + $0xf08] sm:$0xff] }
 0x3a4   : > { %5260 = vmatprep.subr.bf16.mxu1 %v7000_v6  ;;  %5126 = vmatprep.mubr.bf16.mxu0 %v8424_v9  ;;  %v7046_v6 = vcombine.high %v2297_v63, %v2301_v16  ;;  %v2341_v57 = vld [vmem:[#allocation10 + $0xf20] sm:$0xff] }
 0x3a5   : > { %5290 = vmatprep.mubr.bf16.mxu1 %v8424_v9 }
 0x3a6   : > { %5097 = vmatpush1.bf16.msra.mxu0 %v6997_v4  ;;  %v2310_v4 = vld [vmem:[#allocation10 + $0xe28] sm:$0xff] }
 0x3a7   : > { %5261 = vmatpush1.bf16.msra.mxu1 %v6999_v11  ;;  %5098 = vmatprep.subr.bf16.mxu0 %v7006_v12  ;;  %v7045_v11 = vcombine.low %v2297_v63, %v2301_v16  ;;  %v7047_v12 = vcombine.low %v2298_v1, %v2302_v2  ;;  %v7056_v25 = vcombine.high %v2306_v10, %v2310_v4  ;;  %v2345_v16 = vld [vmem:[#allocation10 + $0xf40] sm:$0xff]  ;;  %v2346_v2 = vld [vmem:[#allocation10 + $0xf48] sm:$0xff] }
 0x3a8   : > { %5262 = vmatprep.subr.bf16.mxu1 %v7008_v21  ;;  %v7054_v21 = vcombine.high %v2305_v8, %v2309_v42  ;;  %v2349_v1 = vld [vmem:[#allocation10 + $0xf60] sm:$0xff] }
 0x3aa   : > { %5099 = vmatpush1.bf16.msra.mxu0 %v7005_v31  ;;  %v2318_v31 = vld [vmem:[#allocation10 + $0xe68] sm:$0xff] }
 0x3ab   : > { %5263 = vmatpush1.bf16.msra.mxu1 %v7007_v34  ;;  %5100 = vmatprep.subr.bf16.mxu0 %v7014_v35  ;;  %v7053_v34 = vcombine.low %v2305_v8, %v2309_v42  ;;  %v7055_v35 = vcombine.low %v2306_v10, %v2310_v4  ;;  %v7064_v18 = vcombine.high %v2314_v28, %v2318_v31  ;;  %v2353_v42 = vld [vmem:[#allocation10 + $0xf80] sm:$0xff]  ;;  %v2354_v4 = vld [vmem:[#allocation10 + $0xf88] sm:$0xff] }
 0x3ac   : > { %5264 = vmatprep.subr.bf16.mxu1 %v7016_v13  ;;  %v7062_v13 = vcombine.high %v2313_v15, %v2317_v26  ;;  %v2357_v10 = vld [vmem:[#allocation10 + $0xfa0] sm:$0xff] }
 0x3ae   : > { %5101 = vmatpush1.bf16.msra.mxu0 %v7013_v24  ;;  %v2326_v24 = vld [vmem:[#allocation10 + $0xea8] sm:$0xff] }
 0x3af   : > { %5265 = vmatpush1.bf16.msra.mxu1 %v7015_v36  ;;  %5102 = vmatprep.subr.bf16.mxu0 %v7022_v39  ;;  %v7061_v36 = vcombine.low %v2313_v15, %v2317_v26  ;;  %v7063_v39 = vcombine.low %v2314_v28, %v2318_v31  ;;  %v7072_v43 = vcombine.high %v2322_v22, %v2326_v24  ;;  %v2361_v26 = vld [vmem:[#allocation10 + $0xfc0] sm:$0xff]  ;;  %v2362_v31 = vld [vmem:[#allocation10 + $0xfc8] sm:$0xff] }
 0x3b0   : > { %5266 = vmatprep.subr.bf16.mxu1 %v7024_v40  ;;  %v7070_v40 = vcombine.high %v2321_v19, %v2325_v20  ;;  %v2365_v28 = vld [vmem:[#allocation10 + $0xfe0] sm:$0xff] }
 0x3b2   : > { %5103 = vmatpush1.bf16.msra.mxu0 %v7021_v50  ;;  %v2334_v50 = vld [vmem:[#allocation10 + $0xee8] sm:$0xff] }
 0x3b3   : > { %5267 = vmatpush1.bf16.msra.mxu1 %v7023_v51  ;;  %5104 = vmatprep.subr.bf16.mxu0 %v7030_v52  ;;  %v7069_v51 = vcombine.low %v2321_v19, %v2325_v20  ;;  %v7071_v52 = vcombine.low %v2322_v22, %v2326_v24  ;;  %v7080_v55 = vcombine.high %v2330_v47, %v2334_v50  ;;  %v1859_v20 = vld [vmem:[#allocation10 + $0x10] sm:$0xff]  ;;  %v1860_v24 = vld [vmem:[#allocation10 + $0x18] sm:$0xff] }
 0x3b4   : > { %5268 = vmatprep.subr.bf16.mxu1 %v7032_v53  ;;  %v7078_v53 = vcombine.high %v2329_v29, %v2333_v44  ;;  %v1863_v22 = vld [vmem:[#allocation10 + $0x30] sm:$0xff] }
 0x3b6   : > { %5105 = vmatpush1.bf16.msra.mxu0 %v7029_v58  ;;  %v2342_v58 = vld [vmem:[#allocation10 + $0xf28] sm:$0xff] }
 0x3b7   : > { %5269 = vmatpush1.bf16.msra.mxu1 %v7031_v60  ;;  %5106 = vmatprep.subr.bf16.mxu0 %v7038_v61  ;;  %v7077_v60 = vcombine.low %v2329_v29, %v2333_v44  ;;  %v7079_v61 = vcombine.low %v2330_v47, %v2334_v50  ;;  %v7088_v63 = vcombine.high %v2338_v59, %v2342_v58  ;;  %v1867_v44 = vld [vmem:[#allocation10 + $0x50] sm:$0xff] }
 0x3b8   : > { %5270 = vmatprep.subr.bf16.mxu1 %v7040_v62  ;;  %v7086_v62 = vcombine.high %v2337_v56, %v2341_v57  ;;  %v1871_v47 = vld [vmem:[#allocation10 + $0x70] sm:$0xff]  ;;  %v8432_v50 = vpack.c.bf16 %v8416_v54, %v8416_v54 }
 0x3b9   : > { %v6617_v54 = vcombine.low %v1867_v44, %v1871_v47 }
 0x3ba   : > { %5107 = vmatpush1.bf16.msra.mxu0 %v7037_v3  ;;  %v2350_v3 = vld [vmem:[#allocation10 + $0xf68] sm:$0xff] }
 0x3bb   : > { %5271 = vmatpush1.bf16.msra.mxu1 %v7039_v5  ;;  %5108 = vmatprep.subr.bf16.mxu0 %v7046_v6  ;;  %v7085_v5 = vcombine.low %v2337_v56, %v2341_v57  ;;  %v7087_v6 = vcombine.low %v2338_v59, %v2342_v58  ;;  %v7096_v8 = vcombine.high %v2346_v2, %v2350_v3  ;;  %v1875_v59 = vld [vmem:[#allocation10 + $0x90] sm:$0xff] }
 0x3bc   : > { %5272 = vmatprep.subr.bf16.mxu1 %v7048_v7  ;;  %v7094_v7 = vcombine.high %v2345_v16, %v2349_v1  ;;  %v6618_v56 = vcombine.high %v1867_v44, %v1871_v47  ;;  %v1879_v58 = vld [vmem:[#allocation10 + $0xb0] sm:$0xff] }
 0x3bd   : > { %v1915_v44 = vld [vmem:[#allocation10 + $0x1d0] sm:$0xff] }
 0x3be   : > { %5109 = vmatpush1.bf16.msra.mxu0 %v7045_v11  ;;  %v2358_v11 = vld [vmem:[#allocation10 + $0xfa8] sm:$0xff]  ;;  %v1919_v47 = vld [vmem:[#allocation10 + $0x1f0] sm:$0xff] }
 0x3bf   : > { %5273 = vmatpush1.bf16.msra.mxu1 %v7047_v12  ;;  %5110 = vmatprep.subr.bf16.mxu0 %v7054_v21  ;;  %v7093_v12 = vcombine.low %v2345_v16, %v2349_v1  ;;  %v7095_v21 = vcombine.low %v2346_v2, %v2350_v3  ;;  %v7104_v15 = vcombine.high %v2354_v4, %v2358_v11  ;;  %v1883_v1 = vld [vmem:[#allocation10 + $0xd0] sm:$0xff]  ;;  %v1884_v3 = vld [vmem:[#allocation10 + $0xd8] sm:$0xff] }
 0x3c0   : > { %5274 = vmatprep.subr.bf16.mxu1 %v7056_v25  ;;  %v7102_v25 = vcombine.high %v2353_v42, %v2357_v10  ;;  %v1887_v2 = vld [vmem:[#allocation10 + $0xf0] sm:$0xff] }
 0x3c2   : > { %5111 = vmatpush1.bf16.msra.mxu0 %v7053_v34  ;;  %v2366_v34 = vld [vmem:[#allocation10 + $0xfe8] sm:$0xff] }
 0x3c3   : > { %5275 = vmatpush1.bf16.msra.mxu1 %v7055_v35  ;;  %5112 = vmatprep.subr.bf16.mxu0 %v7062_v13  ;;  %v7101_v35 = vcombine.low %v2353_v42, %v2357_v10  ;;  %v7103_v13 = vcombine.low %v2354_v4, %v2358_v11  ;;  %v7112_v19 = vcombine.high %v2362_v31, %v2366_v34  ;;  %v1891_v10 = vld [vmem:[#allocation10 + $0x110] sm:$0xff]  ;;  %v1892_v11 = vld [vmem:[#allocation10 + $0x118] sm:$0xff] }
 0x3c4   : > { %5276 = vmatprep.subr.bf16.mxu1 %v7064_v18  ;;  %v7110_v18 = vcombine.high %v2361_v26, %v2365_v28  ;;  %v1895_v4 = vld [vmem:[#allocation10 + $0x130] sm:$0xff] }
 0x3c6   : > { %5113 = vmatpush1.bf16.msra.mxu0 %v7061_v36  ;;  %v1864_v36 = vld [vmem:[#allocation10 + $0x38] sm:$0xff] }
 0x3c7   : > { %5277 = vmatpush1.bf16.msra.mxu1 %v7063_v39  ;;  %5114 = vmatprep.subr.bf16.mxu0 %v7070_v40  ;;  %v7109_v39 = vcombine.low %v2361_v26, %v2365_v28  ;;  %v7111_v40 = vcombine.low %v2362_v31, %v2366_v34  ;;  %v6612_v29 = vcombine.high %v1860_v24, %v1864_v36  ;;  %v1899_v26 = vld [vmem:[#allocation10 + $0x150] sm:$0xff]  ;;  %v1900_v31 = vld [vmem:[#allocation10 + $0x158] sm:$0xff] }
 0x3c8   : > { %5278 = vmatprep.subr.bf16.mxu1 %v7072_v43  ;;  %v6610_v43 = vcombine.high %v1859_v20, %v1863_v22  ;;  %v1903_v28 = vld [vmem:[#allocation10 + $0x170] sm:$0xff]  ;;  %v1904_v34 = vld [vmem:[#allocation10 + $0x178] sm:$0xff] }
 0x3ca   : > { %5115 = vmatpush1.bf16.msra.mxu0 %v7069_v51  ;;  %v1868_v51 = vld [vmem:[#allocation10 + $0x58] sm:$0xff] }
 0x3cb   : > { %5279 = vmatpush1.bf16.msra.mxu1 %v7071_v52  ;;  %5116 = vmatprep.subr.bf16.mxu0 %v7078_v53  ;;  %v1872_v52 = vld [vmem:[#allocation10 + $0x78] sm:$0xff]  ;;  %v6609_v53 = vcombine.low %v1859_v20, %v1863_v22  ;;  %v1907_v20 = vld [vmem:[#allocation10 + $0x190] sm:$0xff] }
 0x3cc   : > { %5280 = vmatprep.subr.bf16.mxu1 %v7080_v55  ;;  %v6611_v55 = vcombine.low %v1860_v24, %v1864_v36  ;;  %v6620_v57 = vcombine.high %v1868_v51, %v1872_v52  ;;  %v1911_v22 = vld [vmem:[#allocation10 + $0x1b0] sm:$0xff]  ;;  %v1908_v24 = vld [vmem:[#allocation10 + $0x198] sm:$0xff] }
 0x3cd   : > { %v1912_v36 = vld [vmem:[#allocation10 + $0x1b8] sm:$0xff] }
 0x3ce   : > { %5117 = vmatpush1.bf16.msra.mxu0 %v7077_v60  ;;  %v1876_v60 = vld [vmem:[#allocation10 + $0x98] sm:$0xff] }
 0x3cf   : > { %5281 = vmatpush1.bf16.msra.mxu1 %v7079_v61  ;;  %5118 = vmatprep.subr.bf16.mxu0 %v7086_v62  ;;  %v1880_v61 = vld [vmem:[#allocation10 + $0xb8] sm:$0xff]  ;;  %v6619_v62 = vcombine.low %v1868_v51, %v1872_v52 }
 0x3d0   : > { %5282 = vmatprep.subr.bf16.mxu1 %v7088_v63  ;;  %v6626_v63 = vcombine.high %v1875_v59, %v1879_v58  ;;  %v6628_v16 = vcombine.high %v1876_v60, %v1880_v61  ;;  %v1916_v51 = vld [vmem:[#allocation10 + $0x1d8] sm:$0xff] }
 0x3d1   : > { %v1920_v52 = vld [vmem:[#allocation10 + $0x1f8] sm:$0xff] }
 0x3d2   : > { %5119 = vmatpush1.bf16.msra.mxu0 %v7085_v5  ;;  %v1888_v5 = vld [vmem:[#allocation10 + $0xf8] sm:$0xff] }
 0x3d3   : > { %5283 = vmatpush1.bf16.msra.mxu1 %v7087_v6  ;;  %5120 = vmatprep.subr.bf16.mxu0 %v7094_v7  ;;  %v6625_v6 = vcombine.low %v1875_v59, %v1879_v58  ;;  %v6627_v7 = vcombine.low %v1876_v60, %v1880_v61  ;;  %v6636_v42 = vcombine.high %v1884_v3, %v1888_v5  ;;  %v1923_v59 = vld [vmem:[#allocation10 + $0x210] sm:$0xff]  ;;  %v1924_v60 = vld [vmem:[#allocation10 + $0x218] sm:$0xff] }
 0x3d4   : > { %5284 = vmatprep.subr.bf16.mxu1 %v7096_v8  ;;  %v6634_v8 = vcombine.high %v1883_v1, %v1887_v2  ;;  %v1927_v58 = vld [vmem:[#allocation10 + $0x230] sm:$0xff]  ;;  %v1928_v61 = vld [vmem:[#allocation10 + $0x238] sm:$0xff] }
 0x3d6   : > { %5121 = vmatpush1.bf16.msra.mxu0 %v7093_v12  ;;  %v1896_v12 = vld [vmem:[#allocation10 + $0x138] sm:$0xff] }
 0x3d7   : > { %5285 = vmatpush1.bf16.msra.mxu1 %v7095_v21  ;;  %5122 = vmatprep.subr.bf16.mxu0 %v7102_v25  ;;  %v6633_v21 = vcombine.low %v1883_v1, %v1887_v2  ;;  %v6635_v25 = vcombine.low %v1884_v3, %v1888_v5  ;;  %v1931_v1 = vld [vmem:[#allocation10 + $0x250] sm:$0xff]  ;;  %v1932_v3 = vld [vmem:[#allocation10 + $0x258] sm:$0xff] }
 0x3d8   : > { %5286 = vmatprep.subr.bf16.mxu1 %v7104_v15  ;;  %v6642_v15 = vcombine.high %v1891_v10, %v1895_v4  ;;  %v1935_v2 = vld [vmem:[#allocation10 + $0x270] sm:$0xff]  ;;  %v1936_v5 = vld [vmem:[#allocation10 + $0x278] sm:$0xff] }
 0x3da   : > { %5123 = vmatpush1.bf16.msra.mxu0 %v7101_v35  ;;  %v6641_v35 = vcombine.low %v1891_v10, %v1895_v4  ;;  %v1939_v10 = vld [vmem:[#allocation10 + $0x290] sm:$0xff] }
 0x3db   : > { %5287 = vmatpush1.bf16.msra.mxu1 %v7103_v13  ;;  %5124 = vmatprep.subr.bf16.mxu0 %v7110_v18  ;;  %v6643_v13 = vcombine.low %v1892_v11, %v1896_v12  ;;  %v6650_v18 = vcombine.high %v1899_v26, %v1903_v28  ;;  %v1943_v4 = vld [vmem:[#allocation10 + $0x2b0] sm:$0xff] }
 0x3dc   : > { %5288 = vmatprep.subr.bf16.mxu1 %v7112_v19  ;;  %v6652_v19 = vcombine.high %v1900_v31, %v1904_v34 }
 0x3de   : > { %5125 = vmatpush1.bf16.msra.mxu0 %v7109_v39  ;;  %v6649_v39 = vcombine.low %v1899_v26, %v1903_v28  ;;  %v1947_v26 = vld [vmem:[#allocation10 + $0x2d0] sm:$0xff] }
 0x3df   : > { %5289 = vmatpush1.bf16.msra.mxu1 %v7111_v40  ;;  %5299 = vmatprep.subr.bf16.mxu0 %v6610_v43  ;;  %v6651_v40 = vcombine.low %v1900_v31, %v1904_v34  ;;  %v6658_v43 = vcombine.high %v1907_v20, %v1911_v22  ;;  %v1951_v28 = vld [vmem:[#allocation10 + $0x2f0] sm:$0xff]  ;;  %v1948_v31 = vld [vmem:[#allocation10 + $0x2d8] sm:$0xff] }
 0x3e0   : > { %5463 = vmatprep.subr.bf16.mxu1 %v6612_v29  ;;  %v6660_v29 = vcombine.high %v1908_v24, %v1912_v36  ;;  %v1952_v34 = vld [vmem:[#allocation10 + $0x2f8] sm:$0xff] }
 0x3e1   : > { %5127 = vmatmul.mubr.bf16.vlgmr.msra.gmra.mrb[0].mxu0 %v8432_v50 }
 0x3e2   : > { %5291 = vmatmul.mubr.bf16.vlgmr.msra.gmra.mrb[0].mxu1 %v8432_v50  ;;  %5300 = vmatpush1.bf16.msra.mxu0 %v6609_v53  ;;  %v6657_v53 = vcombine.low %v1907_v20, %v1911_v22  ;;  %v1955_v20 = vld [vmem:[#allocation10 + $0x310] sm:$0xff] }
 0x3e3   : > { %5464 = vmatpush1.bf16.msra.mxu1 %v6611_v55  ;;  %5301 = vmatprep.subr.bf16.mxu0 %v6618_v56  ;;  %v6659_v55 = vcombine.low %v1908_v24, %v1912_v36  ;;  %v6666_v56 = vcombine.high %v1915_v44, %v1919_v47  ;;  %v1959_v22 = vld [vmem:[#allocation10 + $0x330] sm:$0xff]  ;;  %v1956_v24 = vld [vmem:[#allocation10 + $0x318] sm:$0xff] }
 0x3e4   : > { %5465 = vmatprep.subr.bf16.mxu1 %v6620_v57  ;;  %5331 = vmatprep.mubr.bf16.mxu0 %v8356_v23  ;;  %v6668_v57 = vcombine.high %v1916_v51, %v1920_v52  ;;  %v1960_v36 = vld [vmem:[#allocation10 + $0x338] sm:$0xff] }
 0x3e5   : > { %5495 = vmatprep.mubr.bf16.mxu1 %v8356_v23  ;;  %v6644_v23 = vcombine.high %v1892_v11, %v1896_v12  ;;  %v1940_v11 = vld [vmem:[#allocation10 + $0x298] sm:$0xff] }
 0x3e6   : > { %5302 = vmatpush1.bf16.msra.mxu0 %v6617_v54  ;;  %v6665_v54 = vcombine.low %v1915_v44, %v1919_v47  ;;  %v1944_v12 = vld [vmem:[#allocation10 + $0x2b8] sm:$0xff]  ;;  %v1963_v44 = vld [vmem:[#allocation10 + $0x350] sm:$0xff] }
 0x3e7   : > { %5466 = vmatpush1.bf16.msra.mxu1 %v6619_v62  ;;  %5303 = vmatprep.subr.bf16.mxu0 %v6626_v63  ;;  %v6667_v62 = vcombine.low %v1916_v51, %v1920_v52  ;;  %v6674_v63 = vcombine.high %v1923_v59, %v1927_v58  ;;  %v1967_v47 = vld [vmem:[#allocation10 + $0x370] sm:$0xff]  ;;  %v1964_v51 = vld [vmem:[#allocation10 + $0x358] sm:$0xff] }
 0x3e8   : > { %5467 = vmatprep.subr.bf16.mxu1 %v6628_v16  ;;  %v6676_v16 = vcombine.high %v1924_v60, %v1928_v61  ;;  %v1968_v52 = vld [vmem:[#allocation10 + $0x378] sm:$0xff] }
 0x3ea   : > { %5304 = vmatpush1.bf16.msra.mxu0 %v6625_v6  ;;  %v6673_v6 = vcombine.low %v1923_v59, %v1927_v58  ;;  %v1971_v59 = vld [vmem:[#allocation10 + $0x390] sm:$0xff] }
 0x3eb   : > { %5468 = vmatpush1.bf16.msra.mxu1 %v6627_v7  ;;  %5305 = vmatprep.subr.bf16.mxu0 %v6634_v8  ;;  %v6675_v7 = vcombine.low %v1924_v60, %v1928_v61  ;;  %v6682_v8 = vcombine.high %v1931_v1, %v1935_v2  ;;  %v1975_v58 = vld [vmem:[#allocation10 + $0x3b0] sm:$0xff]  ;;  %v1972_v60 = vld [vmem:[#allocation10 + $0x398] sm:$0xff] }
 0x3ec   : > { %5469 = vmatprep.subr.bf16.mxu1 %v6636_v42  ;;  %v6684_v42 = vcombine.high %v1932_v3, %v1936_v5  ;;  %v1976_v61 = vld [vmem:[#allocation10 + $0x3b8] sm:$0xff] }
 0x3ee   : > { %5306 = vmatpush1.bf16.msra.mxu0 %v6633_v21  ;;  %v6681_v21 = vcombine.low %v1931_v1, %v1935_v2  ;;  %v1979_v1 = vld [vmem:[#allocation10 + $0x3d0] sm:$0xff] }
 0x3ef   : > { %5470 = vmatpush1.bf16.msra.mxu1 %v6635_v25  ;;  %5307 = vmatprep.subr.bf16.mxu0 %v6642_v15  ;;  %v6683_v25 = vcombine.low %v1932_v3, %v1936_v5  ;;  %v6690_v15 = vcombine.high %v1939_v10, %v1943_v4  ;;  %v1983_v2 = vld [vmem:[#allocation10 + $0x3f0] sm:$0xff]  ;;  %v1980_v3 = vld [vmem:[#allocation10 + $0x3d8] sm:$0xff] }
 0x3f0   : > { %5471 = vmatprep.subr.bf16.mxu1 %v6644_v23  ;;  %v6692_v23 = vcombine.high %v1940_v11, %v1944_v12  ;;  %v1984_v5 = vld [vmem:[#allocation10 + $0x3f8] sm:$0xff] }
 0x3f2   : > { %5308 = vmatpush1.bf16.msra.mxu0 %v6641_v35  ;;  %v6689_v35 = vcombine.low %v1939_v10, %v1943_v4  ;;  %v1987_v10 = vld [vmem:[#allocation10 + $0x410] sm:$0xff] }
 0x3f3   : > { %5472 = vmatpush1.bf16.msra.mxu1 %v6643_v13  ;;  %5309 = vmatprep.subr.bf16.mxu0 %v6650_v18  ;;  %v6691_v13 = vcombine.low %v1940_v11, %v1944_v12  ;;  %v6698_v18 = vcombine.high %v1947_v26, %v1951_v28  ;;  %v1991_v4 = vld [vmem:[#allocation10 + $0x430] sm:$0xff]  ;;  %v1988_v11 = vld [vmem:[#allocation10 + $0x418] sm:$0xff] }
 0x3f4   : > { %5473 = vmatprep.subr.bf16.mxu1 %v6652_v19  ;;  %v6700_v19 = vcombine.high %v1948_v31, %v1952_v34  ;;  %v1992_v12 = vld [vmem:[#allocation10 + $0x438] sm:$0xff] }
 0x3f6   : > { %5310 = vmatpush1.bf16.msra.mxu0 %v6649_v39  ;;  %v6697_v39 = vcombine.low %v1947_v26, %v1951_v28  ;;  %v1995_v26 = vld [vmem:[#allocation10 + $0x450] sm:$0xff] }
 0x3f7   : > { %5474 = vmatpush1.bf16.msra.mxu1 %v6651_v40  ;;  %5311 = vmatprep.subr.bf16.mxu0 %v6658_v43  ;;  %v6699_v40 = vcombine.low %v1948_v31, %v1952_v34  ;;  %v6706_v43 = vcombine.high %v1955_v20, %v1959_v22  ;;  %v1999_v28 = vld [vmem:[#allocation10 + $0x470] sm:$0xff]  ;;  %v1996_v31 = vld [vmem:[#allocation10 + $0x458] sm:$0xff] }
 0x3f8   : > { %5475 = vmatprep.subr.bf16.mxu1 %v6660_v29  ;;  %v6708_v29 = vcombine.high %v1956_v24, %v1960_v36  ;;  %v2000_v34 = vld [vmem:[#allocation10 + $0x478] sm:$0xff] }
 0x3fa   : > { %5312 = vmatpush1.bf16.msra.mxu0 %v6657_v53  ;;  %v6705_v53 = vcombine.low %v1955_v20, %v1959_v22  ;;  %v2003_v20 = vld [vmem:[#allocation10 + $0x490] sm:$0xff] }
 0x3fb   : > { %5476 = vmatpush1.bf16.msra.mxu1 %v6659_v55  ;;  %5313 = vmatprep.subr.bf16.mxu0 %v6666_v56  ;;  %v6707_v55 = vcombine.low %v1956_v24, %v1960_v36  ;;  %v6714_v56 = vcombine.high %v1963_v44, %v1967_v47  ;;  %v2007_v22 = vld [vmem:[#allocation10 + $0x4b0] sm:$0xff]  ;;  %v2004_v24 = vld [vmem:[#allocation10 + $0x498] sm:$0xff] }
 0x3fc   : > { %5477 = vmatprep.subr.bf16.mxu1 %v6668_v57  ;;  %v6716_v57 = vcombine.high %v1964_v51, %v1968_v52  ;;  %v2008_v36 = vld [vmem:[#allocation10 + $0x4b8] sm:$0xff] }
 0x3fe   : > { %5314 = vmatpush1.bf16.msra.mxu0 %v6665_v54  ;;  %v6713_v54 = vcombine.low %v1963_v44, %v1967_v47  ;;  %v2011_v44 = vld [vmem:[#allocation10 + $0x4d0] sm:$0xff] }
 0x3ff   : > { %5478 = vmatpush1.bf16.msra.mxu1 %v6667_v62  ;;  %5315 = vmatprep.subr.bf16.mxu0 %v6674_v63  ;;  %v6715_v62 = vcombine.low %v1964_v51, %v1968_v52  ;;  %v6722_v63 = vcombine.high %v1971_v59, %v1975_v58  ;;  %v2015_v47 = vld [vmem:[#allocation10 + $0x4f0] sm:$0xff]  ;;  %v2012_v51 = vld [vmem:[#allocation10 + $0x4d8] sm:$0xff] }
 0x400   : > { %5479 = vmatprep.subr.bf16.mxu1 %v6676_v16  ;;  %v6724_v16 = vcombine.high %v1972_v60, %v1976_v61  ;;  %v2016_v52 = vld [vmem:[#allocation10 + $0x4f8] sm:$0xff] }
 0x402   : > { %5316 = vmatpush1.bf16.msra.mxu0 %v6673_v6  ;;  %v6721_v6 = vcombine.low %v1971_v59, %v1975_v58  ;;  %v2023_v59 = vld [vmem:[#allocation10 + $0x530] sm:$0xff]  ;;  %v2020_v58 = vld [vmem:[#allocation10 + $0x518] sm:$0xff] }
 0x403   : > { %5480 = vmatpush1.bf16.msra.mxu1 %v6675_v7  ;;  %5317 = vmatprep.subr.bf16.mxu0 %v6682_v8  ;;  %v6723_v7 = vcombine.low %v1972_v60, %v1976_v61  ;;  %v6730_v8 = vcombine.high %v1979_v1, %v1983_v2  ;;  %v2024_v60 = vld [vmem:[#allocation10 + $0x538] sm:$0xff]  ;;  %v6761_v61 = vcombine.low %v2011_v44, %v2015_v47 }
 0x404   : > { %5481 = vmatprep.subr.bf16.mxu1 %v6684_v42  ;;  %v6732_v42 = vcombine.high %v1980_v3, %v1984_v5 }
 0x406   : > { %5318 = vmatpush1.bf16.msra.mxu0 %v6681_v21  ;;  %v6729_v21 = vcombine.low %v1979_v1, %v1983_v2  ;;  %v2028_v1 = vld [vmem:[#allocation10 + $0x558] sm:$0xff] }
 0x407   : > { %5482 = vmatpush1.bf16.msra.mxu1 %v6683_v25  ;;  %5319 = vmatprep.subr.bf16.mxu0 %v6690_v15  ;;  %v6731_v25 = vcombine.low %v1980_v3, %v1984_v5  ;;  %v6738_v15 = vcombine.high %v1987_v10, %v1991_v4  ;;  %v2032_v2 = vld [vmem:[#allocation10 + $0x578] sm:$0xff]  ;;  %v6771_v5 = vcombine.low %v2020_v58, %v2024_v60 }
 0x408   : > { %5483 = vmatprep.subr.bf16.mxu1 %v6692_v23  ;;  %v6740_v23 = vcombine.high %v1988_v11, %v1992_v12 }
 0x40a   : > { %5320 = vmatpush1.bf16.msra.mxu0 %v6689_v35  ;;  %v6737_v35 = vcombine.low %v1987_v10, %v1991_v4  ;;  %v2036_v10 = vld [vmem:[#allocation10 + $0x598] sm:$0xff] }
 0x40b   : > { %5484 = vmatpush1.bf16.msra.mxu1 %v6691_v13  ;;  %5321 = vmatprep.subr.bf16.mxu0 %v6698_v18  ;;  %v6739_v13 = vcombine.low %v1988_v11, %v1992_v12  ;;  %v6746_v18 = vcombine.high %v1995_v26, %v1999_v28  ;;  %v2040_v4 = vld [vmem:[#allocation10 + $0x5b8] sm:$0xff]  ;;  %v6779_v12 = vcombine.low %v2028_v1, %v2032_v2 }
 0x40c   : > { %5485 = vmatprep.subr.bf16.mxu1 %v6700_v19  ;;  %v6748_v19 = vcombine.high %v1996_v31, %v2000_v34 }
 0x40e   : > { %5322 = vmatpush1.bf16.msra.mxu0 %v6697_v39  ;;  %v6745_v39 = vcombine.low %v1995_v26, %v1999_v28  ;;  %v2044_v26 = vld [vmem:[#allocation10 + $0x5d8] sm:$0xff] }
 0x40f   : > { %5486 = vmatpush1.bf16.msra.mxu1 %v6699_v40  ;;  %5323 = vmatprep.subr.bf16.mxu0 %v6706_v43  ;;  %v6747_v40 = vcombine.low %v1996_v31, %v2000_v34  ;;  %v6754_v43 = vcombine.high %v2003_v20, %v2007_v22  ;;  %v2048_v28 = vld [vmem:[#allocation10 + $0x5f8] sm:$0xff]  ;;  %v6787_v34 = vcombine.low %v2036_v10, %v2040_v4 }
 0x410   : > { %5487 = vmatprep.subr.bf16.mxu1 %v6708_v29  ;;  %v6756_v29 = vcombine.high %v2004_v24, %v2008_v36 }
 0x412   : > { %5324 = vmatpush1.bf16.msra.mxu0 %v6705_v53  ;;  %v6753_v53 = vcombine.low %v2003_v20, %v2007_v22  ;;  %v2052_v20 = vld [vmem:[#allocation10 + $0x618] sm:$0xff] }
 0x413   : > { %5488 = vmatpush1.bf16.msra.mxu1 %v6707_v55  ;;  %5325 = vmatprep.subr.bf16.mxu0 %v6714_v56  ;;  %v6762_v55 = vcombine.high %v2011_v44, %v2015_v47  ;;  %v6764_v56 = vcombine.high %v2012_v51, %v2016_v52  ;;  %v2056_v22 = vld [vmem:[#allocation10 + $0x638] sm:$0xff] }
 0x414   : > { %5489 = vmatprep.subr.bf16.mxu1 %v6716_v57  ;;  %v2019_v57 = vld [vmem:[#allocation10 + $0x510] sm:$0xff]  ;;  %v2060_v44 = vld [vmem:[#allocation10 + $0x658] sm:$0xff] }
 0x415   : > { %v6769_v3 = vcombine.low %v2019_v57, %v2023_v59  ;;  %v2064_v47 = vld [vmem:[#allocation10 + $0x678] sm:$0xff] }
 0x416   : > { %5326 = vmatpush1.bf16.msra.mxu0 %v6713_v54  ;;  %v6763_v54 = vcombine.low %v2012_v51, %v2016_v52  ;;  %v6803_v52 = vcombine.low %v2052_v20, %v2056_v22 }
 0x417   : > { %5490 = vmatpush1.bf16.msra.mxu1 %v6715_v62  ;;  %5327 = vmatprep.subr.bf16.mxu0 %v6722_v63  ;;  %v6770_v62 = vcombine.high %v2019_v57, %v2023_v59  ;;  %v2027_v63 = vld [vmem:[#allocation10 + $0x550] sm:$0xff]  ;;  %v2068_v57 = vld [vmem:[#allocation10 + $0x698] sm:$0xff] }
 0x418   : > { %5491 = vmatprep.subr.bf16.mxu1 %v6724_v16  ;;  %v2031_v16 = vld [vmem:[#allocation10 + $0x570] sm:$0xff]  ;;  %v2072_v59 = vld [vmem:[#allocation10 + $0x6b8] sm:$0xff] }
 0x419   : > { %v6777_v11 = vcombine.low %v2027_v63, %v2031_v16 }
 0x41a   : > { %5328 = vmatpush1.bf16.msra.mxu0 %v6721_v6  ;;  %v6778_v6 = vcombine.high %v2027_v63, %v2031_v16  ;;  %v2076_v63 = vld [vmem:[#allocation10 + $0x6d8] sm:$0xff] }
 0x41b   : > { %5492 = vmatpush1.bf16.msra.mxu1 %v6723_v7  ;;  %5329 = vmatprep.subr.bf16.mxu0 %v6730_v8  ;;  %v6780_v7 = vcombine.high %v2028_v1, %v2032_v2  ;;  %v2035_v8 = vld [vmem:[#allocation10 + $0x590] sm:$0xff]  ;;  %v2080_v16 = vld [vmem:[#allocation10 + $0x6f8] sm:$0xff]  ;;  %v6819_v2 = vcombine.low %v2068_v57, %v2072_v59 }
 0x41c   : > { %5493 = vmatprep.subr.bf16.mxu1 %v6732_v42  ;;  %v2039_v42 = vld [vmem:[#allocation10 + $0x5b0] sm:$0xff] }
 0x41d   : > { %v6785_v31 = vcombine.low %v2035_v8, %v2039_v42 }
 0x41e   : > { %5330 = vmatpush1.bf16.msra.mxu0 %v6729_v21  ;;  %v6786_v21 = vcombine.high %v2035_v8, %v2039_v42  ;;  %v2084_v8 = vld [vmem:[#allocation10 + $0x718] sm:$0xff] }
 0x41f   : > { %5494 = vmatpush1.bf16.msra.mxu1 %v6731_v25  ;;  %5340 = vmatprep.subr.bf16.mxu0 %v6738_v15  ;;  %v6788_v25 = vcombine.high %v2036_v10, %v2040_v4  ;;  %v2043_v15 = vld [vmem:[#allocation10 + $0x5d0] sm:$0xff]  ;;  %v2088_v42 = vld [vmem:[#allocation10 + $0x738] sm:$0xff]  ;;  %v6827_v4 = vcombine.low %v2076_v63, %v2080_v16 }
 0x420   : > { %5504 = vmatprep.subr.bf16.mxu1 %v6740_v23  ;;  %v2047_v23 = vld [vmem:[#allocation10 + $0x5f0] sm:$0xff] }
 0x421   : > { %5332 = vmatmul.mubr.bf16.vlgmr.msra.gmra.mrb[4].mxu0 %v8369_v14 }
 0x422   : > { %5341 = vmatpush1.bf16.msra.mxu0 %v6737_v35  ;;  %5496 = vmatmul.mubr.bf16.vlgmr.msra.gmra.mrb[4].mxu1 %v8369_v14  ;;  %v6755_v14 = vcombine.low %v2004_v24, %v2008_v36  ;;  %v6794_v35 = vcombine.high %v2043_v15, %v2047_v23  ;;  %v6793_v24 = vcombine.low %v2043_v15, %v2047_v23  ;;  %v2092_v15 = vld [vmem:[#allocation10 + $0x758] sm:$0xff] }
 0x423   : > { %5505 = vmatpush1.bf16.msra.mxu1 %v6739_v13  ;;  %5342 = vmatprep.subr.bf16.mxu0 %v6746_v18  ;;  %v6796_v13 = vcombine.high %v2044_v26, %v2048_v28  ;;  %v2051_v18 = vld [vmem:[#allocation10 + $0x610] sm:$0xff]  ;;  %v6795_v36 = vcombine.low %v2044_v26, %v2048_v28  ;;  %v2096_v23 = vld [vmem:[#allocation10 + $0x778] sm:$0xff]  ;;  %v6835_v28 = vcombine.low %v2084_v8, %v2088_v42 }
 0x424   : > { %5506 = vmatprep.subr.bf16.mxu1 %v6748_v19  ;;  %5372 = vmatprep.mubr.bf16.mxu0 %v8371_v41  ;;  %v2055_v19 = vld [vmem:[#allocation10 + $0x630] sm:$0xff] }
 0x425   : > { %5536 = vmatprep.mubr.bf16.mxu1 %v8371_v41  ;;  %v6772_v41 = vcombine.high %v2020_v58, %v2024_v60  ;;  %v6801_v51 = vcombine.low %v2051_v18, %v2055_v19  ;;  %v6811_v60 = vcombine.low %v2060_v44, %v2064_v47 }
 0x426   : > { %5343 = vmatpush1.bf16.msra.mxu0 %v6745_v39  ;;  %v6802_v39 = vcombine.high %v2051_v18, %v2055_v19  ;;  %v2100_v18 = vld [vmem:[#allocation10 + $0x798] sm:$0xff] }
 0x427   : > { %5507 = vmatpush1.bf16.msra.mxu1 %v6747_v40  ;;  %5344 = vmatprep.subr.bf16.mxu0 %v6754_v43  ;;  %v6804_v40 = vcombine.high %v2052_v20, %v2056_v22  ;;  %v2059_v43 = vld [vmem:[#allocation10 + $0x650] sm:$0xff]  ;;  %v2104_v19 = vld [vmem:[#allocation10 + $0x7b8] sm:$0xff]  ;;  %v6843_v22 = vcombine.low %v2092_v15, %v2096_v23 }
 0x428   : > { %5508 = vmatprep.subr.bf16.mxu1 %v6756_v29  ;;  %v2063_v29 = vld [vmem:[#allocation10 + $0x670] sm:$0xff] }
 0x429   : > { %v6809_v58 = vcombine.low %v2059_v43, %v2063_v29 }
 0x42a   : > { %5345 = vmatpush1.bf16.msra.mxu0 %v6753_v53  ;;  %v6810_v53 = vcombine.high %v2059_v43, %v2063_v29  ;;  %v2108_v43 = vld [vmem:[#allocation10 + $0x7d8] sm:$0xff] }
 0x42b   : > { %5509 = vmatpush1.bf16.msra.mxu1 %v6755_v14  ;;  %5346 = vmatprep.subr.bf16.mxu0 %v6762_v55  ;;  %v6812_v14 = vcombine.high %v2060_v44, %v2064_v47  ;;  %v2067_v55 = vld [vmem:[#allocation10 + $0x690] sm:$0xff]  ;;  %v2112_v29 = vld [vmem:[#allocation10 + $0x7f8] sm:$0xff]  ;;  %v6851_v47 = vcombine.low %v2100_v18, %v2104_v19 }
 0x42c   : > { %5510 = vmatprep.subr.bf16.mxu1 %v6764_v56  ;;  %v2071_v56 = vld [vmem:[#allocation10 + $0x6b0] sm:$0xff] }
 0x42d   : > { %v6817_v1 = vcombine.low %v2067_v55, %v2071_v56 }
 0x42e   : > { %5347 = vmatpush1.bf16.msra.mxu0 %v6761_v61  ;;  %v6818_v61 = vcombine.high %v2067_v55, %v2071_v56  ;;  %v2116_v55 = vld [vmem:[#allocation10 + $0x818] sm:$0xff] }
 0x42f   : > { %5511 = vmatpush1.bf16.msra.mxu1 %v6763_v54  ;;  %5348 = vmatprep.subr.bf16.mxu0 %v6770_v62  ;;  %v6820_v54 = vcombine.high %v2068_v57, %v2072_v59  ;;  %v2075_v62 = vld [vmem:[#allocation10 + $0x6d0] sm:$0xff]  ;;  %v2120_v56 = vld [vmem:[#allocation10 + $0x838] sm:$0xff]  ;;  %v6859_v59 = vcombine.low %v2108_v43, %v2112_v29 }
 0x430   : > { %5512 = vmatprep.subr.bf16.mxu1 %v6772_v41  ;;  %v2079_v41 = vld [vmem:[#allocation10 + $0x6f0] sm:$0xff] }
 0x431   : > { %v6825_v10 = vcombine.low %v2075_v62, %v2079_v41 }
 0x432   : > { %5349 = vmatpush1.bf16.msra.mxu0 %v6769_v3  ;;  %v6826_v3 = vcombine.high %v2075_v62, %v2079_v41  ;;  %v2124_v62 = vld [vmem:[#allocation10 + $0x858] sm:$0xff] }
 0x433   : > { %5513 = vmatpush1.bf16.msra.mxu1 %v6771_v5  ;;  %5350 = vmatprep.subr.bf16.mxu0 %v6778_v6  ;;  %v6828_v5 = vcombine.high %v2076_v63, %v2080_v16  ;;  %v2083_v6 = vld [vmem:[#allocation10 + $0x710] sm:$0xff]  ;;  %v2128_v41 = vld [vmem:[#allocation10 + $0x878] sm:$0xff]  ;;  %v6867_v16 = vcombine.low %v2116_v55, %v2120_v56 }
 0x434   : > { %5514 = vmatprep.subr.bf16.mxu1 %v6780_v7  ;;  %v2087_v7 = vld [vmem:[#allocation10 + $0x730] sm:$0xff] }
 0x435   : > { %v6833_v26 = vcombine.low %v2083_v6, %v2087_v7 }
 0x436   : > { %5351 = vmatpush1.bf16.msra.mxu0 %v6777_v11  ;;  %v6834_v11 = vcombine.high %v2083_v6, %v2087_v7  ;;  %v2132_v6 = vld [vmem:[#allocation10 + $0x898] sm:$0xff] }
 0x437   : > { %5515 = vmatpush1.bf16.msra.mxu1 %v6779_v12  ;;  %5352 = vmatprep.subr.bf16.mxu0 %v6786_v21  ;;  %v6836_v12 = vcombine.high %v2084_v8, %v2088_v42  ;;  %v2091_v21 = vld [vmem:[#allocation10 + $0x750] sm:$0xff]  ;;  %v2136_v7 = vld [vmem:[#allocation10 + $0x8b8] sm:$0xff]  ;;  %v6875_v42 = vcombine.low %v2124_v62, %v2128_v41 }
 0x438   : > { %5516 = vmatprep.subr.bf16.mxu1 %v6788_v25  ;;  %v2095_v25 = vld [vmem:[#allocation10 + $0x770] sm:$0xff] }
 0x439   : > { %v6841_v20 = vcombine.low %v2091_v21, %v2095_v25 }
 0x43a   : > { %5353 = vmatpush1.bf16.msra.mxu0 %v6785_v31  ;;  %v6842_v31 = vcombine.high %v2091_v21, %v2095_v25  ;;  %v2140_v21 = vld [vmem:[#allocation10 + $0x8d8] sm:$0xff] }
 0x43b   : > { %5517 = vmatpush1.bf16.msra.mxu1 %v6787_v34  ;;  %5354 = vmatprep.subr.bf16.mxu0 %v6794_v35  ;;  %v6844_v34 = vcombine.high %v2092_v15, %v2096_v23  ;;  %v2099_v35 = vld [vmem:[#allocation10 + $0x790] sm:$0xff]  ;;  %v2144_v25 = vld [vmem:[#allocation10 + $0x8f8] sm:$0xff] }
 0x43c   : > { %5518 = vmatprep.subr.bf16.mxu1 %v6796_v13  ;;  %v2103_v13 = vld [vmem:[#allocation10 + $0x7b0] sm:$0xff] }
 0x43d   : > { %v6849_v44 = vcombine.low %v2099_v35, %v2103_v13 }
 0x43e   : > { %5355 = vmatpush1.bf16.msra.mxu0 %v6793_v24  ;;  %v6850_v24 = vcombine.high %v2099_v35, %v2103_v13  ;;  %v2152_v35 = vld [vmem:[#allocation10 + $0x938] sm:$0xff] }
 0x43f   : > { %5519 = vmatpush1.bf16.msra.mxu1 %v6795_v36  ;;  %5356 = vmatprep.subr.bf16.mxu0 %v6802_v39  ;;  %v6852_v36 = vcombine.high %v2100_v18, %v2104_v19  ;;  %v2107_v39 = vld [vmem:[#allocation10 + $0x7d0] sm:$0xff]  ;;  %v6891_v18 = vcombine.low %v2140_v21, %v2144_v25 }
 0x440   : > { %5520 = vmatprep.subr.bf16.mxu1 %v6804_v40  ;;  %v2111_v40 = vld [vmem:[#allocation10 + $0x7f0] sm:$0xff] }
 0x441   : > { %v6857_v57 = vcombine.low %v2107_v39, %v2111_v40 }
 0x442   : > { %5357 = vmatpush1.bf16.msra.mxu0 %v6801_v51  ;;  %v6858_v51 = vcombine.high %v2107_v39, %v2111_v40 }
 0x443   : > { %5521 = vmatpush1.bf16.msra.mxu1 %v6803_v52  ;;  %5358 = vmatprep.subr.bf16.mxu0 %v6810_v53  ;;  %v6860_v52 = vcombine.high %v2108_v43, %v2112_v29  ;;  %v2115_v53 = vld [vmem:[#allocation10 + $0x810] sm:$0xff] }
 0x444   : > { %5522 = vmatprep.subr.bf16.mxu1 %v6812_v14  ;;  %v2119_v14 = vld [vmem:[#allocation10 + $0x830] sm:$0xff] }
 0x445   : > { %v6865_v63 = vcombine.low %v2115_v53, %v2119_v14 }
 0x446   : > { %5359 = vmatpush1.bf16.msra.mxu0 %v6809_v58  ;;  %v6866_v58 = vcombine.high %v2115_v53, %v2119_v14 }
 0x447   : > { %5523 = vmatpush1.bf16.msra.mxu1 %v6811_v60  ;;  %5360 = vmatprep.subr.bf16.mxu0 %v6818_v61  ;;  %v6868_v60 = vcombine.high %v2116_v55, %v2120_v56  ;;  %v2123_v61 = vld [vmem:[#allocation10 + $0x850] sm:$0xff] }
 0x448   : > { %5524 = vmatprep.subr.bf16.mxu1 %v6820_v54  ;;  %v2127_v54 = vld [vmem:[#allocation10 + $0x870] sm:$0xff] }
 0x449   : > { %v6873_v8 = vcombine.low %v2123_v61, %v2127_v54 }
 0x44a   : > { %5361 = vmatpush1.bf16.msra.mxu0 %v6817_v1  ;;  %v6874_v1 = vcombine.high %v2123_v61, %v2127_v54 }
 0x44b   : > { %5525 = vmatpush1.bf16.msra.mxu1 %v6819_v2  ;;  %5362 = vmatprep.subr.bf16.mxu0 %v6826_v3  ;;  %v6876_v2 = vcombine.high %v2124_v62, %v2128_v41  ;;  %v2131_v3 = vld [vmem:[#allocation10 + $0x890] sm:$0xff] }
 0x44c   : > { %5526 = vmatprep.subr.bf16.mxu1 %v6828_v5  ;;  %v2135_v5 = vld [vmem:[#allocation10 + $0x8b0] sm:$0xff] }
 0x44d   : > { %v6881_v15 = vcombine.low %v2131_v3, %v2135_v5 }
 0x44e   : > { %5363 = vmatpush1.bf16.msra.mxu0 %v6825_v10  ;;  %v6882_v10 = vcombine.high %v2131_v3, %v2135_v5 }
 0x44f   : > { %5527 = vmatpush1.bf16.msra.mxu1 %v6827_v4  ;;  %5364 = vmatprep.subr.bf16.mxu0 %v6834_v11  ;;  %v6884_v4 = vcombine.high %v2132_v6, %v2136_v7  ;;  %v2139_v11 = vld [vmem:[#allocation10 + $0x8d0] sm:$0xff] }
 0x450   : > { %5528 = vmatprep.subr.bf16.mxu1 %v6836_v12  ;;  %v2143_v12 = vld [vmem:[#allocation10 + $0x8f0] sm:$0xff] }
 0x451   : > { %v6890_v23 = vcombine.high %v2139_v11, %v2143_v12  ;;  %v6889_v13 = vcombine.low %v2139_v11, %v2143_v12 }
 0x452   : > { %5365 = vmatpush1.bf16.msra.mxu0 %v6833_v26  ;;  %v6892_v26 = vcombine.high %v2140_v21, %v2144_v25 }
 0x453   : > { %5529 = vmatpush1.bf16.msra.mxu1 %v6835_v28  ;;  %5366 = vmatprep.subr.bf16.mxu0 %v6842_v31  ;;  %v2147_v28 = vld [vmem:[#allocation10 + $0x910] sm:$0xff] }
 0x454   : > { %5530 = vmatprep.subr.bf16.mxu1 %v6844_v34  ;;  %v2151_v31 = vld [vmem:[#allocation10 + $0x930] sm:$0xff]  ;;  %v2148_v34 = vld [vmem:[#allocation10 + $0x918] sm:$0xff] }
 0x455   : > { %v6898_v19 = vcombine.high %v2147_v28, %v2151_v31  ;;  %v6897_v39 = vcombine.low %v2147_v28, %v2151_v31  ;;  %v6899_v40 = vcombine.low %v2148_v34, %v2152_v35 }
 0x456   : > { %5367 = vmatpush1.bf16.msra.mxu0 %v6841_v20  ;;  %v2155_v20 = vld [vmem:[#allocation10 + $0x950] sm:$0xff] }
 0x457   : > { %5531 = vmatpush1.bf16.msra.mxu1 %v6843_v22  ;;  %5368 = vmatprep.subr.bf16.mxu0 %v6850_v24  ;;  %v2159_v22 = vld [vmem:[#allocation10 + $0x970] sm:$0xff]  ;;  %v2156_v24 = vld [vmem:[#allocation10 + $0x958] sm:$0xff] }
 0x458   : > { %5532 = vmatprep.subr.bf16.mxu1 %v6852_v36  ;;  %v2160_v36 = vld [vmem:[#allocation10 + $0x978] sm:$0xff]  ;;  %v6906_v43 = vcombine.high %v2155_v20, %v2159_v22  ;;  %v6905_v53 = vcombine.low %v2155_v20, %v2159_v22 }
 0x459   : > { %v6908_v29 = vcombine.high %v2156_v24, %v2160_v36  ;;  %v6907_v14 = vcombine.low %v2156_v24, %v2160_v36 }
 0x45a   : > { %5369 = vmatpush1.bf16.msra.mxu0 %v6849_v44  ;;  %v2163_v44 = vld [vmem:[#allocation10 + $0x990] sm:$0xff] }
 0x45b   : > { %5533 = vmatpush1.bf16.msra.mxu1 %v6851_v47  ;;  %5370 = vmatprep.subr.bf16.mxu0 %v6858_v51  ;;  %v2167_v47 = vld [vmem:[#allocation10 + $0x9b0] sm:$0xff]  ;;  %v2164_v51 = vld [vmem:[#allocation10 + $0x998] sm:$0xff] }
 0x45c   : > { %5534 = vmatprep.subr.bf16.mxu1 %v6860_v52  ;;  %v2168_v52 = vld [vmem:[#allocation10 + $0x9b8] sm:$0xff]  ;;  %v6914_v55 = vcombine.high %v2163_v44, %v2167_v47  ;;  %v6913_v61 = vcombine.low %v2163_v44, %v2167_v47 }
 0x45d   : > { %v6916_v56 = vcombine.high %v2164_v51, %v2168_v52  ;;  %v6915_v54 = vcombine.low %v2164_v51, %v2168_v52 }
 0x45e   : > { %5371 = vmatpush1.bf16.msra.mxu0 %v6857_v57  ;;  %v2171_v57 = vld [vmem:[#allocation10 + $0x9d0] sm:$0xff] }
 0x45f   : > { %5535 = vmatpush1.bf16.msra.mxu1 %v6859_v59  ;;  %5381 = vmatprep.subr.bf16.mxu0 %v6866_v58  ;;  %v2175_v59 = vld [vmem:[#allocation10 + $0x9f0] sm:$0xff]  ;;  %v2172_v58 = vld [vmem:[#allocation10 + $0x9d8] sm:$0xff] }
 0x460   : > { %5545 = vmatprep.subr.bf16.mxu1 %v6868_v60  ;;  %v2176_v60 = vld [vmem:[#allocation10 + $0x9f8] sm:$0xff]  ;;  %v6922_v62 = vcombine.high %v2171_v57, %v2175_v59  ;;  %v6921_v3 = vcombine.low %v2171_v57, %v2175_v59 }
 0x461   : > { %5373 = vmatmul.mubr.bf16.vlgmr.msra.gmra.mrb[4].mxu0 %v8405_v17  ;;  %v6924_v41 = vcombine.high %v2172_v58, %v2176_v60  ;;  %v6923_v5 = vcombine.low %v2172_v58, %v2176_v60 }
 0x462   : > { %5382 = vmatpush1.bf16.msra.mxu0 %v6865_v63  ;;  %5537 = vmatmul.mubr.bf16.vlgmr.msra.gmra.mrb[4].mxu1 %v8405_v17  ;;  %v6883_v17 = vcombine.low %v2132_v6, %v2136_v7  ;;  %v2179_v63 = vld [vmem:[#allocation10 + $0xa10] sm:$0xff] }
 0x463   : > { %5546 = vmatpush1.bf16.msra.mxu1 %v6867_v16  ;;  %5383 = vmatprep.subr.bf16.mxu0 %v6874_v1  ;;  %v2183_v16 = vld [vmem:[#allocation10 + $0xa30] sm:$0xff]  ;;  %v2180_v1 = vld [vmem:[#allocation10 + $0xa18] sm:$0xff] }
 0x464   : > { %5547 = vmatprep.subr.bf16.mxu1 %v6876_v2  ;;  %5413 = vmatprep.mubr.bf16.mxu0 %v8407_v33  ;;  %v2184_v2 = vld [vmem:[#allocation10 + $0xa38] sm:$0xff]  ;;  %v6930_v6 = vcombine.high %v2179_v63, %v2183_v16  ;;  %v6929_v11 = vcombine.low %v2179_v63, %v2183_v16 }
 0x465   : > { %5577 = vmatprep.mubr.bf16.mxu1 %v8407_v33  ;;  %v6900_v33 = vcombine.high %v2148_v34, %v2152_v35  ;;  %v6932_v7 = vcombine.high %v2180_v1, %v2184_v2  ;;  %v6931_v12 = vcombine.low %v2180_v1, %v2184_v2 }
 0x466   : > { %5384 = vmatpush1.bf16.msra.mxu0 %v6873_v8  ;;  %v2187_v8 = vld [vmem:[#allocation10 + $0xa50] sm:$0xff] }
 0x467   : > { %5548 = vmatpush1.bf16.msra.mxu1 %v6875_v42  ;;  %5385 = vmatprep.subr.bf16.mxu0 %v6882_v10  ;;  %v2191_v42 = vld [vmem:[#allocation10 + $0xa70] sm:$0xff]  ;;  %v2188_v10 = vld [vmem:[#allocation10 + $0xa58] sm:$0xff] }
 0x468   : > { %5549 = vmatprep.subr.bf16.mxu1 %v6884_v4  ;;  %v2192_v4 = vld [vmem:[#allocation10 + $0xa78] sm:$0xff]  ;;  %v6938_v21 = vcombine.high %v2187_v8, %v2191_v42  ;;  %v6937_v28 = vcombine.low %v2187_v8, %v2191_v42 }
 0x469   : > { %v6940_v25 = vcombine.high %v2188_v10, %v2192_v4  ;;  %v6939_v31 = vcombine.low %v2188_v10, %v2192_v4 }
 0x46a   : > { %5386 = vmatpush1.bf16.msra.mxu0 %v6881_v15  ;;  %v2195_v15 = vld [vmem:[#allocation10 + $0xa90] sm:$0xff] }
 0x46b   : > { %5550 = vmatpush1.bf16.msra.mxu1 %v6883_v17  ;;  %5387 = vmatprep.subr.bf16.mxu0 %v6890_v23  ;;  %v2199_v17 = vld [vmem:[#allocation10 + $0xab0] sm:$0xff]  ;;  %v2196_v23 = vld [vmem:[#allocation10 + $0xa98] sm:$0xff] }
 0x46c   : > { %5551 = vmatprep.subr.bf16.mxu1 %v6892_v26  ;;  %v2200_v26 = vld [vmem:[#allocation10 + $0xab8] sm:$0xff]  ;;  %v6946_v34 = vcombine.high %v2195_v15, %v2199_v17  ;;  %v6945_v20 = vcombine.low %v2195_v15, %v2199_v17 }
 0x46d   : > { %v6948_v35 = vcombine.high %v2196_v23, %v2200_v26  ;;  %v6947_v22 = vcombine.low %v2196_v23, %v2200_v26 }
 0x46e   : > { %5388 = vmatpush1.bf16.msra.mxu0 %v6889_v13  ;;  %v2203_v13 = vld [vmem:[#allocation10 + $0xad0] sm:$0xff] }
 0x46f   : > { %5552 = vmatpush1.bf16.msra.mxu1 %v6891_v18  ;;  %5389 = vmatprep.subr.bf16.mxu0 %v6898_v19  ;;  %v2207_v18 = vld [vmem:[#allocation10 + $0xaf0] sm:$0xff]  ;;  %v2204_v19 = vld [vmem:[#allocation10 + $0xad8] sm:$0xff] }
 0x470   : > { %5553 = vmatprep.subr.bf16.mxu1 %v6900_v33  ;;  %v2208_v33 = vld [vmem:[#allocation10 + $0xaf8] sm:$0xff]  ;;  %v6954_v24 = vcombine.high %v2203_v13, %v2207_v18  ;;  %v6953_v44 = vcombine.low %v2203_v13, %v2207_v18 }
 0x471   : > { %v6956_v36 = vcombine.high %v2204_v19, %v2208_v33  ;;  %v6955_v47 = vcombine.low %v2204_v19, %v2208_v33 }
 0x472   : > { %5390 = vmatpush1.bf16.msra.mxu0 %v6897_v39  ;;  %v2211_v39 = vld [vmem:[#allocation10 + $0xb10] sm:$0xff] }
 0x473   : > { %5554 = vmatpush1.bf16.msra.mxu1 %v6899_v40  ;;  %5391 = vmatprep.subr.bf16.mxu0 %v6906_v43  ;;  %v2215_v40 = vld [vmem:[#allocation10 + $0xb30] sm:$0xff]  ;;  %v2212_v43 = vld [vmem:[#allocation10 + $0xb18] sm:$0xff] }
 0x474   : > { %5555 = vmatprep.subr.bf16.mxu1 %v6908_v29  ;;  %v2216_v29 = vld [vmem:[#allocation10 + $0xb38] sm:$0xff]  ;;  %v6962_v51 = vcombine.high %v2211_v39, %v2215_v40  ;;  %v6961_v57 = vcombine.low %v2211_v39, %v2215_v40 }
 0x475   : > { %v6964_v52 = vcombine.high %v2212_v43, %v2216_v29  ;;  %v6963_v59 = vcombine.low %v2212_v43, %v2216_v29 }
 0x476   : > { %5392 = vmatpush1.bf16.msra.mxu0 %v6905_v53  ;;  %v2219_v53 = vld [vmem:[#allocation10 + $0xb50] sm:$0xff] }
 0x477   : > { %5556 = vmatpush1.bf16.msra.mxu1 %v6907_v14  ;;  %5393 = vmatprep.subr.bf16.mxu0 %v6914_v55  ;;  %v2223_v14 = vld [vmem:[#allocation10 + $0xb70] sm:$0xff]  ;;  %v2220_v55 = vld [vmem:[#allocation10 + $0xb58] sm:$0xff] }
 0x478   : > { %5557 = vmatprep.subr.bf16.mxu1 %v6916_v56  ;;  %v2224_v56 = vld [vmem:[#allocation10 + $0xb78] sm:$0xff]  ;;  %v6970_v58 = vcombine.high %v2219_v53, %v2223_v14  ;;  %v6969_v63 = vcombine.low %v2219_v53, %v2223_v14 }
 0x479   : > { %v6972_v60 = vcombine.high %v2220_v55, %v2224_v56  ;;  %v6971_v16 = vcombine.low %v2220_v55, %v2224_v56  ;;  %v2275_v56 = vld [vmem:[#allocation10 + $0xd10] sm:$0xff] }
 0x47a   : > { %5394 = vmatpush1.bf16.msra.mxu0 %v6913_v61  ;;  %v2227_v61 = vld [vmem:[#allocation10 + $0xb90] sm:$0xff] }
 0x47b   : > { %5558 = vmatpush1.bf16.msra.mxu1 %v6915_v54  ;;  %5395 = vmatprep.subr.bf16.mxu0 %v6922_v62  ;;  %v2231_v54 = vld [vmem:[#allocation10 + $0xbb0] sm:$0xff]  ;;  %v2228_v62 = vld [vmem:[#allocation10 + $0xb98] sm:$0xff] }
 0x47c   : > { %5559 = vmatprep.subr.bf16.mxu1 %v6924_v41  ;;  %v2232_v41 = vld [vmem:[#allocation10 + $0xbb8] sm:$0xff]  ;;  %v6978_v1 = vcombine.high %v2227_v61, %v2231_v54  ;;  %v6977_v8 = vcombine.low %v2227_v61, %v2231_v54 }
 0x47d   : > { %v6980_v2 = vcombine.high %v2228_v62, %v2232_v41  ;;  %v6979_v42 = vcombine.low %v2228_v62, %v2232_v41  ;;  %v2283_v62 = vld [vmem:[#allocation10 + $0xd50] sm:$0xff] }
 0x47e   : > { %5396 = vmatpush1.bf16.msra.mxu0 %v6921_v3  ;;  %v2235_v3 = vld [vmem:[#allocation10 + $0xbd0] sm:$0xff] }
 0x47f   : > { %5560 = vmatpush1.bf16.msra.mxu1 %v6923_v5  ;;  %5397 = vmatprep.subr.bf16.mxu0 %v6930_v6  ;;  %v2239_v5 = vld [vmem:[#allocation10 + $0xbf0] sm:$0xff]  ;;  %v2236_v6 = vld [vmem:[#allocation10 + $0xbd8] sm:$0xff] }
 0x480   : > { %5561 = vmatprep.subr.bf16.mxu1 %v6932_v7  ;;  %v2240_v7 = vld [vmem:[#allocation10 + $0xbf8] sm:$0xff]  ;;  %v6986_v10 = vcombine.high %v2235_v3, %v2239_v5  ;;  %v6985_v15 = vcombine.low %v2235_v3, %v2239_v5  ;;  %v2287_v41 = vld [vmem:[#allocation10 + $0xd70] sm:$0xff] }
 0x481   : > { %v6988_v4 = vcombine.high %v2236_v6, %v2240_v7  ;;  %v6987_v17 = vcombine.low %v2236_v6, %v2240_v7  ;;  %v7034_v3 = vcombine.high %v2283_v62, %v2287_v41  ;;  %v2291_v6 = vld [vmem:[#allocation10 + $0xd90] sm:$0xff] }
 0x482   : > { %5398 = vmatpush1.bf16.msra.mxu0 %v6929_v11  ;;  %v2243_v11 = vld [vmem:[#allocation10 + $0xc10] sm:$0xff] }
 0x483   : > { %5562 = vmatpush1.bf16.msra.mxu1 %v6931_v12  ;;  %5399 = vmatprep.subr.bf16.mxu0 %v6938_v21  ;;  %v2247_v12 = vld [vmem:[#allocation10 + $0xc30] sm:$0xff]  ;;  %v2244_v21 = vld [vmem:[#allocation10 + $0xc18] sm:$0xff] }
 0x484   : > { %5563 = vmatprep.subr.bf16.mxu1 %v6940_v25  ;;  %v2248_v25 = vld [vmem:[#allocation10 + $0xc38] sm:$0xff]  ;;  %v6994_v23 = vcombine.high %v2243_v11, %v2247_v12  ;;  %v6993_v13 = vcombine.low %v2243_v11, %v2247_v12  ;;  %v2295_v7 = vld [vmem:[#allocation10 + $0xdb0] sm:$0xff] }
 0x485   : > { %v6996_v26 = vcombine.high %v2244_v21, %v2248_v25  ;;  %v6995_v18 = vcombine.low %v2244_v21, %v2248_v25  ;;  %v7042_v11 = vcombine.high %v2291_v6, %v2295_v7  ;;  %v2299_v25 = vld [vmem:[#allocation10 + $0xdd0] sm:$0xff] }
 0x486   : > { %5400 = vmatpush1.bf16.msra.mxu0 %v6937_v28  ;;  %v2251_v28 = vld [vmem:[#allocation10 + $0xc50] sm:$0xff] }
 0x487   : > { %5564 = vmatpush1.bf16.msra.mxu1 %v6939_v31  ;;  %5401 = vmatprep.subr.bf16.mxu0 %v6946_v34  ;;  %v2255_v31 = vld [vmem:[#allocation10 + $0xc70] sm:$0xff]  ;;  %v2252_v34 = vld [vmem:[#allocation10 + $0xc58] sm:$0xff] }
 0x488   : > { %5565 = vmatprep.subr.bf16.mxu1 %v6948_v35  ;;  %v2256_v35 = vld [vmem:[#allocation10 + $0xc78] sm:$0xff]  ;;  %v7002_v19 = vcombine.high %v2251_v28, %v2255_v31  ;;  %v7001_v39 = vcombine.low %v2251_v28, %v2255_v31 }
 0x489   : > { %v7004_v33 = vcombine.high %v2252_v34, %v2256_v35  ;;  %v7003_v40 = vcombine.low %v2252_v34, %v2256_v35  ;;  %v2304_v28 = vld [vmem:[#allocation10 + $0xdf8] sm:$0xff]  ;;  %v7041_v35 = vcombine.low %v2291_v6, %v2295_v7 }
 0x48a   : > { %5402 = vmatpush1.bf16.msra.mxu0 %v6945_v20  ;;  %v2259_v20 = vld [vmem:[#allocation10 + $0xc90] sm:$0xff] }
 0x48b   : > { %5566 = vmatpush1.bf16.msra.mxu1 %v6947_v22  ;;  %5403 = vmatprep.subr.bf16.mxu0 %v6954_v24  ;;  %v2263_v22 = vld [vmem:[#allocation10 + $0xcb0] sm:$0xff]  ;;  %v2260_v24 = vld [vmem:[#allocation10 + $0xc98] sm:$0xff] }
 0x48c   : > { %5567 = vmatprep.subr.bf16.mxu1 %v6956_v36  ;;  %v2264_v36 = vld [vmem:[#allocation10 + $0xcb8] sm:$0xff]  ;;  %v7010_v43 = vcombine.high %v2259_v20, %v2263_v22  ;;  %v7009_v53 = vcombine.low %v2259_v20, %v2263_v22 }
 0x48d   : > { %v7012_v29 = vcombine.high %v2260_v24, %v2264_v36 }
 0x48e   : > { %5404 = vmatpush1.bf16.msra.mxu0 %v6953_v44  ;;  %v2267_v44 = vld [vmem:[#allocation10 + $0xcd0] sm:$0xff] }
 0x48f   : > { %5568 = vmatpush1.bf16.msra.mxu1 %v6955_v47  ;;  %5405 = vmatprep.subr.bf16.mxu0 %v6962_v51  ;;  %v2271_v47 = vld [vmem:[#allocation10 + $0xcf0] sm:$0xff]  ;;  %v2268_v51 = vld [vmem:[#allocation10 + $0xcd8] sm:$0xff] }
 0x490   : > { %5569 = vmatprep.subr.bf16.mxu1 %v6964_v52  ;;  %v2272_v52 = vld [vmem:[#allocation10 + $0xcf8] sm:$0xff]  ;;  %v7018_v14 = vcombine.high %v2267_v44, %v2271_v47 }
 0x491   : > { %v7020_v55 = vcombine.high %v2268_v51, %v2272_v52  ;;  %v7019_v61 = vcombine.low %v2268_v51, %v2272_v52  ;;  %v2315_v51 = vld [vmem:[#allocation10 + $0xe50] sm:$0xff] }
 0x492   : > { %5406 = vmatpush1.bf16.msra.mxu0 %v6961_v57  ;;  %v2279_v57 = vld [vmem:[#allocation10 + $0xd30] sm:$0xff] }
 0x493   : > { %5570 = vmatpush1.bf16.msra.mxu1 %v6963_v59  ;;  %5407 = vmatprep.subr.bf16.mxu0 %v6970_v58  ;;  %v2276_v59 = vld [vmem:[#allocation10 + $0xd18] sm:$0xff]  ;;  %v7026_v54 = vcombine.high %v2275_v56, %v2279_v57  ;;  %v2319_v52 = vld [vmem:[#allocation10 + $0xe70] sm:$0xff] }
 0x494   : > { %5571 = vmatprep.subr.bf16.mxu1 %v6972_v60  ;;  %v2280_v58 = vld [vmem:[#allocation10 + $0xd38] sm:$0xff]  ;;  %v7017_v60 = vcombine.low %v2267_v44, %v2271_v47 }
 0x496   : > { %5408 = vmatpush1.bf16.msra.mxu0 %v6969_v63  ;;  %v2284_v63 = vld [vmem:[#allocation10 + $0xd58] sm:$0xff] }
 0x497   : > { %5572 = vmatpush1.bf16.msra.mxu1 %v6971_v16  ;;  %5409 = vmatprep.subr.bf16.mxu0 %v6978_v1  ;;  %v2288_v16 = vld [vmem:[#allocation10 + $0xd78] sm:$0xff]  ;;  %v7025_v1 = vcombine.low %v2275_v56, %v2279_v57  ;;  %v7066_v56 = vcombine.high %v2315_v51, %v2319_v52 }
 0x498   : > { %5573 = vmatprep.subr.bf16.mxu1 %v6980_v2  ;;  %v7027_v2 = vcombine.low %v2276_v59, %v2280_v58  ;;  %v7036_v5 = vcombine.high %v2284_v63, %v2288_v16 }
 0x49a   : > { %5410 = vmatpush1.bf16.msra.mxu0 %v6977_v8  ;;  %v2292_v8 = vld [vmem:[#allocation10 + $0xd98] sm:$0xff] }
 0x49b   : > { %5574 = vmatpush1.bf16.msra.mxu1 %v6979_v42  ;;  %5411 = vmatprep.subr.bf16.mxu0 %v6986_v10  ;;  %v2296_v42 = vld [vmem:[#allocation10 + $0xdb8] sm:$0xff]  ;;  %v7033_v10 = vcombine.low %v2283_v62, %v2287_v41 }
 0x49c   : > { %5575 = vmatprep.subr.bf16.mxu1 %v6988_v4  ;;  %v7035_v4 = vcombine.low %v2284_v63, %v2288_v16  ;;  %v7044_v21 = vcombine.high %v2292_v8, %v2296_v42  ;;  %v2331_v63 = vld [vmem:[#allocation10 + $0xed0] sm:$0xff] }
 0x49d   : > { %v2335_v16 = vld [vmem:[#allocation10 + $0xef0] sm:$0xff] }
 0x49e   : > { %5412 = vmatpush1.bf16.msra.mxu0 %v6985_v15  ;;  %v2303_v15 = vld [vmem:[#allocation10 + $0xdf0] sm:$0xff]  ;;  %v7082_v6 = vcombine.high %v2331_v63, %v2335_v16 }
 0x49f   : > { %5576 = vmatpush1.bf16.msra.mxu1 %v6987_v17  ;;  %5422 = vmatprep.subr.bf16.mxu0 %v6994_v23 }
 0x4a0   : > { %5586 = vmatprep.subr.bf16.mxu1 %v6996_v26  ;;  %v2300_v26 = vld [vmem:[#allocation10 + $0xdd8] sm:$0xff] }
 0x4a1   : > { %5414 = vmatmul.mubr.bf16.vlgmr.msra.gmra.mrb[4].mxu0 %v8422_v0  ;;  %v7052_v22 = vcombine.high %v2300_v26, %v2304_v28 }
 0x4a2   : > { %5423 = vmatpush1.bf16.msra.mxu0 %v6993_v13  ;;  %5578 = vmatmul.mubr.bf16.vlgmr.msra.gmra.mrb[4].mxu1 %v8422_v0  ;;  %v7011_v0 = vcombine.low %v2260_v24, %v2264_v36  ;;  %v2307_v24 = vld [vmem:[#allocation10 + $0xe10] sm:$0xff] }
 0x4a3   : > { %5587 = vmatpush1.bf16.msra.mxu1 %v6995_v18  ;;  %5424 = vmatprep.subr.bf16.mxu0 %v7002_v19  ;;  %v7043_v19 = vcombine.low %v2292_v8, %v2296_v42  ;;  %v2311_v36 = vld [vmem:[#allocation10 + $0xe30] sm:$0xff] }
 0x4a4   : > { %5588 = vmatprep.subr.bf16.mxu1 %v7004_v33  ;;  %5454 = vmatprep.mubr.bf16.mxu0 %v8424_v9  ;;  %v7050_v33 = vcombine.high %v2299_v25, %v2303_v15  ;;  %v7058_v44 = vcombine.high %v2307_v24, %v2311_v36  ;;  %v2339_v8 = vld [vmem:[#allocation10 + $0xf10] sm:$0xff] }
 0x4a5   : > { %5618 = vmatprep.mubr.bf16.mxu1 %v8424_v9  ;;  %v7028_v9 = vcombine.high %v2276_v59, %v2280_v58  ;;  %v2323_v59 = vld [vmem:[#allocation10 + $0xe90] sm:$0xff] }
 0x4a6   : > { %5425 = vmatpush1.bf16.msra.mxu0 %v7001_v39  ;;  %v2308_v39 = vld [vmem:[#allocation10 + $0xe18] sm:$0xff]  ;;  %v2327_v58 = vld [vmem:[#allocation10 + $0xeb0] sm:$0xff] }
 0x4a7   : > { %5589 = vmatpush1.bf16.msra.mxu1 %v7003_v40  ;;  %5426 = vmatprep.subr.bf16.mxu0 %v7010_v43  ;;  %v2312_v40 = vld [vmem:[#allocation10 + $0xe38] sm:$0xff]  ;;  %v7049_v43 = vcombine.low %v2299_v25, %v2303_v15  ;;  %v7074_v62 = vcombine.high %v2323_v59, %v2327_v58  ;;  %v2343_v42 = vld [vmem:[#allocation10 + $0xf30] sm:$0xff] }
 0x4a8   : > { %5590 = vmatprep.subr.bf16.mxu1 %v7012_v29  ;;  %v7051_v29 = vcombine.low %v2300_v26, %v2304_v28  ;;  %v7060_v47 = vcombine.high %v2308_v39, %v2312_v40  ;;  %v7090_v25 = vcombine.high %v2339_v8, %v2343_v42  ;;  %v2347_v26 = vld [vmem:[#allocation10 + $0xf50] sm:$0xff] }
 0x4a9   : > { %v2351_v28 = vld [vmem:[#allocation10 + $0xf70] sm:$0xff] }
 0x4aa   : > { %5427 = vmatpush1.bf16.msra.mxu0 %v7009_v53  ;;  %v2316_v53 = vld [vmem:[#allocation10 + $0xe58] sm:$0xff] }
 0x4ab   : > { %5591 = vmatpush1.bf16.msra.mxu1 %v7011_v0  ;;  %5428 = vmatprep.subr.bf16.mxu0 %v7018_v14  ;;  %v2320_v0 = vld [vmem:[#allocation10 + $0xe78] sm:$0xff]  ;;  %v7057_v14 = vcombine.low %v2307_v24, %v2311_v36 }
 0x4ac   : > { %5592 = vmatprep.subr.bf16.mxu1 %v7020_v55  ;;  %v7059_v55 = vcombine.low %v2308_v39, %v2312_v40  ;;  %v7068_v57 = vcombine.high %v2316_v53, %v2320_v0  ;;  %v2356_v24 = vld [vmem:[#allocation10 + $0xf98] sm:$0xff]  ;;  %v8458_v39 = vld [vmem:[#allocation12] sm:$0xff]  ;;  %v7097_v40 = vcombine.low %v2347_v26, %v2351_v28 }
 0x4ad   : > { %v2360_v36 = vld [vmem:[#allocation10 + $0xfb8] sm:$0xff] }
 0x4ae   : > { %5429 = vmatpush1.bf16.msra.mxu0 %v7017_v60  ;;  %v2324_v60 = vld [vmem:[#allocation10 + $0xe98] sm:$0xff] }
 0x4af   : > { %5593 = vmatpush1.bf16.msra.mxu1 %v7019_v61  ;;  %5430 = vmatprep.subr.bf16.mxu0 %v7026_v54  ;;  %v2328_v61 = vld [vmem:[#allocation10 + $0xeb8] sm:$0xff]  ;;  %v7065_v54 = vcombine.low %v2315_v51, %v2319_v52  ;;  %v2367_v51 = vld [vmem:[#allocation10 + $0xff0] sm:$0xff]  ;;  %v2378_v52 = vrot.slane %v8458_v39, %v8246_v32 }
 0x4b0   : > { %5594 = vmatprep.subr.bf16.mxu1 %v7028_v9  ;;  %v7067_v9 = vcombine.low %v2316_v53, %v2320_v0  ;;  %v7076_v41 = vcombine.high %v2324_v60, %v2328_v61  ;;  %v2364_v53 = vld [vmem:[#allocation10 + $0xfd8] sm:$0xff] }
 0x4b1   : > { %v2368_v0 = vld [vmem:[#allocation10 + $0xff8] sm:$0xff] }
 0x4b2   : > { %5431 = vmatpush1.bf16.msra.mxu0 %v7025_v1  ;;  %v2332_v1 = vld [vmem:[#allocation10 + $0xed8] sm:$0xff] }
 0x4b3   : > { %5595 = vmatpush1.bf16.msra.mxu1 %v7027_v2  ;;  %5432 = vmatprep.subr.bf16.mxu0 %v7034_v3  ;;  %v2336_v2 = vld [vmem:[#allocation10 + $0xef8] sm:$0xff]  ;;  %v7073_v3 = vcombine.low %v2323_v59, %v2327_v58  ;;  %v7116_v59 = vcombine.high %v2364_v53, %v2368_v0 }
 0x4b4   : > { %v8450_v12 = vpop.f32.mrb[0].mxu0  ;;  %5596 = vmatprep.subr.bf16.mxu1 %v7036_v5  ;;  %v7075_v5 = vcombine.low %v2324_v60, %v2328_v61  ;;  %v7084_v7 = vcombine.high %v2332_v1, %v2336_v2  ;;  %v7115_v61 = vcombine.low %v2364_v53, %v2368_v0  ;;  %v7488_v53 = vld [vmem:[%s8723_s7 + $0x148] sm:$0xff]  }
 0x4b5   : > { %v8452_v17 = vpop.f32.mrb[0].mxu1  ;;  %v8454_v23 = vpop.f32.mrb[1].mxu0 }
 0x4b6   : > { %v8456_v31 = vpop.f32.mrb[1].mxu1  ;;  %v5132_v34 = vpop.f32.mrb[2].mxu0  ;;  %5433 = vmatpush1.bf16.msra.mxu0 %v7033_v10  ;;  %v2340_v10 = vld [vmem:[#allocation10 + $0xf18] sm:$0xff]  ;;  %v7280_v58 = vadd.f32 %v8454_v23, %v2378_v52 }
 0x4b7   : > { %v5296_v13 = vpop.f32.mrb[2].mxu1  ;;  %5597 = vmatpush1.bf16.msra.mxu1 %v7035_v4  ;;  %v5133_v18 = vpop.f32.mrb[3].mxu0  ;;  %5434 = vmatprep.subr.bf16.mxu0 %v7042_v11  ;;  %v2344_v4 = vld [vmem:[#allocation10 + $0xf38] sm:$0xff]  ;;  %v7081_v11 = vcombine.low %v2331_v63, %v2335_v16  ;;  %v7457_v16 = vld [vmem:[%s8723_s7 + $0xc8] sm:$0xff]  }
 0x4b8   : > { %v5297_v20 = vpop.f32.mrb[3].mxu1  ;;  %5598 = vmatprep.subr.bf16.mxu1 %v7044_v21  ;;  %v7083_v21 = vcombine.low %v2332_v1, %v2336_v2  ;;  %v7092_v15 = vcombine.high %v2340_v10, %v2344_v4  ;;  %v2348_v34 = vld [vmem:[#allocation10 + $0xf58] sm:$0xff]  ;;  %v7089_v13 = vcombine.low %v2339_v8, %v2343_v42  ;;  %v7091_v18 = vcombine.low %v2340_v10, %v2344_v4  ;;  %v7458_v2 = vld [vmem:[%s8723_s7 + $0x8] sm:$0xff]  }
 0x4b9   : > { %v2355_v20 = vld [vmem:[#allocation10 + $0xf90] sm:$0xff]  ;;  %v7454_v23 = vld [vmem:[%s8723_s7] sm:$0xff]  }
 0x4ba   : > { %5435 = vmatpush1.bf16.msra.mxu0 %v7041_v35  ;;  %v2352_v35 = vld [vmem:[#allocation10 + $0xf78] sm:$0xff] }
 0x4bb   : > { %5599 = vmatpush1.bf16.msra.mxu1 %v7043_v19  ;;  %5436 = vmatprep.subr.bf16.mxu0 %v7050_v33  ;;  %v7098_v19 = vcombine.high %v2347_v26, %v2351_v28  ;;  %v7100_v33 = vcombine.high %v2348_v34, %v2352_v35  ;;  %v7464_v8 = vld [vmem:[%s8723_s7 + $0x58] sm:$0xff]   ;;  %v7472_v26 = vld [vmem:[%s8723_s7 + $0x68] sm:$0xff]   ;;  %v7487_v52 = vld [vmem:[%s8723_s7 + $0x180] sm:$0xff]  }
 0x4bc   : > { %5600 = vmatprep.subr.bf16.mxu1 %v7052_v22  ;;  %v2359_v22 = vld [vmem:[#allocation10 + $0xfb0] sm:$0xff]  ;;  %v7473_v28 = vld [vmem:[%s8723_s7 + $0xe8] sm:$0xff]  }
 0x4bd   : > { %v7465_v42 = vld [vmem:[%s8723_s7 + $0xd8] sm:$0xff]  }
 0x4be   : > { %5437 = vmatpush1.bf16.msra.mxu0 %v7049_v43  ;;  %v7099_v43 = vcombine.low %v2348_v34, %v2352_v35  ;;  %v7466_v10 = vld [vmem:[%s8723_s7 + $0x18] sm:$0xff]   ;;  %v7474_v34 = vld [vmem:[%s8723_s7 + $0x28] sm:$0xff]   ;;  %v2374_v35 = vrot.slane %v8458_v39, %v8243_v30  ;;  %v7478_v30 = vld [vmem:[%s8723_s7 + $0x30] sm:$0xff]  }
 0x4bf   : > { %5601 = vmatpush1.bf16.msra.mxu1 %v7051_v29  ;;  %5438 = vmatprep.subr.bf16.mxu0 %v7058_v44  ;;  %v7106_v29 = vcombine.high %v2355_v20, %v2359_v22  ;;  %v7108_v44 = vcombine.high %v2356_v24, %v2360_v36  ;;  %v7467_v4 = vld [vmem:[%s8723_s7 + $0x98] sm:$0xff]  }
 0x4c0   : > { %5602 = vmatprep.subr.bf16.mxu1 %v7060_v47  ;;  %v2363_v47 = vld [vmem:[#allocation10 + $0xfd0] sm:$0xff] }
 0x4c1   : > { %v7113_v32 = vcombine.low %v2363_v47, %v2367_v51 }
 0x4c2   : > { %5439 = vmatpush1.bf16.msra.mxu0 %v7057_v14  ;;  %v2386_v14 = vrot.slane %v8458_v39, %v1747_v38  ;;  %v7452_v38 = vld [vmem:[%s8723_s7 + $0x40] sm:$0xff]  }
 0x4c3   : > { %5603 = vmatpush1.bf16.msra.mxu1 %v7059_v55  ;;  %5440 = vmatprep.subr.bf16.mxu0 %v7066_v56  ;;  %v7105_v55 = vcombine.low %v2355_v20, %v2359_v22  ;;  %v7107_v56 = vcombine.low %v2356_v24, %v2360_v36  ;;  %v7279_v20 = vadd.f32 %v8450_v12, %v2374_v35  ;;  %v7479_v22 = vld [vmem:[%s8723_s7 + $0xb0] sm:$0xff]   ;;  %v7481_v36 = vld [vmem:[%s8723_s7 + $0xf8] sm:$0xff]  }
 0x4c4   : > { %5604 = vmatprep.subr.bf16.mxu1 %v7068_v57  ;;  %v7114_v57 = vcombine.high %v2363_v47, %v2367_v51  ;;  %v7282_v60 = vadd.f32 %v8456_v31, %v2386_v14  ;;  %v7455_v31 = vld [vmem:[%s8723_s7 + $0x80] sm:$0xff]   ;;  %v7482_v12 = vld [vmem:[%s8723_s7 + $0x38] sm:$0xff]   ;;  %v7489_v14 = vld [vmem:[%s8723_s7 + $0x1c8] sm:$0xff]  }
 0x4c5   : > { %v7486_v47 = vld [vmem:[%s8723_s7 + $0x100] sm:$0xff]  }
 0x4c6   : > { %5441 = vmatpush1.bf16.msra.mxu0 %v7065_v54  ;;  %v7453_v54 = vld [vmem:[%s8723_s7 + $0xc0] sm:$0xff]  }
 0x4c7   : > { %5605 = vmatpush1.bf16.msra.mxu1 %v7067_v9  ;;  %5442 = vmatprep.subr.bf16.mxu0 %v7074_v62  ;;  %v5628_v9 = vmax.f32 %v7280_v58, 0.0  ;;  %v5630_v62 = vmax.f32 %v7282_v60, 0.0  ;;  %v7494_v58 = vld [vmem:[%s8723_s7 + $0x110] sm:$0xff]  }
 0x4c8   : > { %5606 = vmatprep.subr.bf16.mxu1 %v7076_v41  ;;  %v7456_v41 = vld [vmem:[%s8723_s7 + $0x48] sm:$0xff]   ;;  %v7495_v60 = vld [vmem:[%s8723_s7 + $0x190] sm:$0xff]  }
 0x4c9   : > { %v5636_v63 = vpack.c.bf16 %v5628_v9, %v5628_v9  ;;  %v5638_v1 = vpack.c.bf16 %v5630_v62, %v5630_v62  ;;  %v7500_v9 = vld [vmem:[%s8723_s7 + $0x160] sm:$0xff]  }
 0x4ca   : > { %5443 = vmatpush1.bf16.msra.mxu0 %v7073_v3  ;;  %v7459_v3 = vld [vmem:[%s8723_s7 + $0x88] sm:$0xff]   ;;  %v7501_v62 = vld [vmem:[%s8723_s7 + $0x1e0] sm:$0xff]  }
 0x4cb   : > { %5607 = vmatpush1.bf16.msra.mxu1 %v7075_v5  ;;  %5444 = vmatprep.subr.bf16.mxu0 %v7082_v6  ;;  %v7460_v5 = vld [vmem:[%s8723_s7 + $0x50] sm:$0xff]  }
 0x4cc   : > { %5608 = vmatprep.subr.bf16.mxu1 %v7084_v7  ;;  %v7462_v6 = vld [vmem:[%s8723_s7 + $0x10] sm:$0xff]  }
 0x4cd   : > { %v7463_v7 = vld [vmem:[%s8723_s7 + $0x90] sm:$0xff]  }
 0x4ce   : > { %5445 = vmatpush1.bf16.msra.mxu0 %v7081_v11  ;;  %v7468_v11 = vld [vmem:[%s8723_s7 + $0x60] sm:$0xff]  }
 0x4cf   : > { %5609 = vmatpush1.bf16.msra.mxu1 %v7083_v21  ;;  %5446 = vmatprep.subr.bf16.mxu0 %v7090_v25  ;;  %v7469_v21 = vld [vmem:[%s8723_s7 + $0xe0] sm:$0xff]  }
 0x4d0   : > { %5610 = vmatprep.subr.bf16.mxu1 %v7092_v15  ;;  %v7470_v25 = vld [vmem:[%s8723_s7 + $0x20] sm:$0xff]  }
 0x4d1   : > { %v7471_v15 = vld [vmem:[%s8723_s7 + $0xa0] sm:$0xff]  }
 0x4d2   : > { %5447 = vmatpush1.bf16.msra.mxu0 %v7089_v13  ;;  %v7475_v13 = vld [vmem:[%s8723_s7 + $0xa8] sm:$0xff]  }
 0x4d3   : > { %5611 = vmatpush1.bf16.msra.mxu1 %v7091_v18  ;;  %5448 = vmatprep.subr.bf16.mxu0 %v7098_v19  ;;  %v7476_v18 = vld [vmem:[%s8723_s7 + $0x70] sm:$0xff]   ;;  %v2382_v19 = vrot.slane %v8458_v39, %v1743_v37  ;;  %v7480_v37 = vld [vmem:[%s8723_s7 + $0x78] sm:$0xff]  }
 0x4d4   : > { %5612 = vmatprep.subr.bf16.mxu1 %v7100_v33  ;;  %v7477_v33 = vld [vmem:[%s8723_s7 + $0xf0] sm:$0xff]  }
 0x4d5   : > { %v7281_v24 = vadd.f32 %v8452_v17, %v2382_v19  ;;  %v7484_v17 = vld [vmem:[%s8723_s7 + $0x140] sm:$0xff]  }
 0x4d6   : > { %5449 = vmatpush1.bf16.msra.mxu0 %v7097_v40  ;;  %v5627_v40 = vmax.f32 %v7279_v20, 0.0 }
 0x4d7   : > { %5613 = vmatpush1.bf16.msra.mxu1 %v7099_v43  ;;  %5450 = vmatprep.subr.bf16.mxu0 %v7106_v29  ;;  %v7483_v43 = vld [vmem:[%s8723_s7 + $0xb8] sm:$0xff]   ;;  %v5629_v29 = vmax.f32 %v7281_v24, 0.0 }
 0x4d8   : > { %5614 = vmatprep.subr.bf16.mxu1 %v7108_v44  ;;  %v7485_v44 = vld [vmem:[%s8723_s7 + $0x1c0] sm:$0xff]   ;;  %v5635_v51 = vpack.c.bf16 %v5627_v40, %v5627_v40 }
 0x4d9   : > { %v5637_v0 = vpack.c.bf16 %v5629_v29, %v5629_v29 }
 0x4da   : > { %5451 = vmatpush1.bf16.msra.mxu0 %v7105_v55  ;;  %v7490_v55 = vld [vmem:[%s8723_s7 + $0x108] sm:$0xff]  }
 0x4db   : > { %5615 = vmatpush1.bf16.msra.mxu1 %v7107_v56  ;;  %5452 = vmatprep.subr.bf16.mxu0 %v7114_v57  ;;  %v7491_v56 = vld [vmem:[%s8723_s7 + $0x188] sm:$0xff]   ;;  %v7492_v57 = vld [vmem:[%s8723_s7 + $0x150] sm:$0xff]  }
 0x4dc   : > { %5616 = vmatprep.subr.bf16.mxu1 %v7116_v59  ;;  %v7493_v59 = vld [vmem:[%s8723_s7 + $0x1d0] sm:$0xff]  }
 0x4de   : > { %5453 = vmatpush1.bf16.msra.mxu0 %v7113_v32  ;;  %v7496_v32 = vld [vmem:[%s8723_s7 + $0x158] sm:$0xff]  }
 0x4df   : > { %5617 = vmatpush1.bf16.msra.mxu1 %v7115_v61  ;;  %7187 = vmatprep.subr.bf16.mxu0 %v7452_v38  ;;  %v7497_v61 = vld [vmem:[%s8723_s7 + $0x1d8] sm:$0xff]  }
 0x4e0   : > { %7209 = vmatprep.subr.bf16.mxu1 %v7453_v54  ;;  %v7498_v38 = vld [vmem:[%s8723_s7 + $0x118] sm:$0xff]  }
 0x4e1   : > { %5455 = vmatmul.mubr.bf16.vlgmr.msra.gmra.mrb[4].mxu0 %v8432_v50  ;;  %v7499_v54 = vld [vmem:[%s8723_s7 + $0x198] sm:$0xff]  }
 0x4e2   : > { %5619 = vmatmul.mubr.bf16.vlgmr.msra.gmra.mrb[4].mxu1 %v8432_v50  ;;  %7188 = vmatpush3.bf16.msra.mxu0 %v7454_v23  ;;  %v7461_v50 = vld [vmem:[%s8723_s7 + $0xd0] sm:$0xff]   ;;  %v7502_v23 = vld [vmem:[%s8723_s7 + $0x120] sm:$0xff]  }
 0x4e3   : > { %6194 = vmatprep.mubr.bf16.mxu0 %v5636_v63  ;;  %7210 = vmatpush3.bf16.msra.mxu1 %v7455_v31  ;;  %v7503_v31 = vld [vmem:[%s8723_s7 + $0x1a0] sm:$0xff]   ;;  %v7505_v63 = vld [vmem:[%s8723_s7 + $0x1e8] sm:$0xff]  }
 0x4e4   : > { %6234 = vmatprep.mubr.bf16.mxu1 %v5638_v1  ;;  %7189 = vmatprep.subr.bf16.mxu0 %v7456_v41  ;;  %v7504_v41 = vld [vmem:[%s8723_s7 + $0x168] sm:$0xff]  }
 0x4e5   : > { %7211 = vmatprep.subr.bf16.mxu1 %v7457_v16  ;;  %v7506_v16 = vld [vmem:[%s8723_s7 + $0x128] sm:$0xff]  }
 0x4e6   : > { %7190 = vmatpush3.bf16.msra.mxu0 %v7458_v2  ;;  %v7507_v1 = vld [vmem:[%s8723_s7 + $0x1a8] sm:$0xff]   ;;  %v7508_v2 = vld [vmem:[%s8723_s7 + $0x170] sm:$0xff]  }
 0x4e7   : > { %7212 = vmatpush3.bf16.msra.mxu1 %v7459_v3  ;;  %7191 = vmatprep.subr.bf16.mxu0 %v7460_v5  ;;  %v7509_v3 = vld [vmem:[%s8723_s7 + $0x1f0] sm:$0xff]  }
 0x4e8   : > { %7213 = vmatprep.subr.bf16.mxu1 %v7461_v50  ;;  %v7510_v5 = vld [vmem:[%s8723_s7 + $0x130] sm:$0xff]  }
 0x4e9   : > { %v7511_v50 = vld [vmem:[%s8723_s7 + $0x1b0] sm:$0xff]  }
 0x4ea   : > { %7192 = vmatpush3.bf16.msra.mxu0 %v7462_v6  ;;  %v7512_v6 = vld [vmem:[%s8723_s7 + $0x178] sm:$0xff]  }
 0x4eb   : > { %7214 = vmatpush3.bf16.msra.mxu1 %v7463_v7  ;;  %7193 = vmatprep.subr.bf16.mxu0 %v7464_v8  ;;  %v7513_v7 = vld [vmem:[%s8723_s7 + $0x1f8] sm:$0xff]  }
 0x4ec   : > { %7215 = vmatprep.subr.bf16.mxu1 %v7465_v42  ;;  %v7514_v8 = vld [vmem:[%s8723_s7 + $0x138] sm:$0xff]  }
 0x4ed   : > { %v7515_v42 = vld [vmem:[%s8723_s7 + $0x1b8] sm:$0xff]  }
 0x4ee   : > { %7194 = vmatpush3.bf16.msra.mxu0 %v7466_v10  ;;  %v2390_v10 = vrot.slane %v8458_v39, %v1751_v45 }
 0x4ef   : > { %7216 = vmatpush3.bf16.msra.mxu1 %v7467_v4  ;;  %7195 = vmatprep.subr.bf16.mxu0 %v7468_v11  ;;  %v2398_v4 = vrot.slane %v8458_v39, %v1759_v48  ;;  %v2394_v11 = vrot.slane %v8458_v39, %v1755_v46 }
 0x4f0   : > { %7217 = vmatprep.subr.bf16.mxu1 %v7469_v21  ;;  %v2402_v21 = vrot.slane %v8458_v39, %v1763_v49 }
 0x4f2   : > { %7196 = vmatpush3.bf16.msra.mxu0 %v7470_v25 }
 0x4f3   : > { %7218 = vmatpush3.bf16.msra.mxu1 %v7471_v15  ;;  %7197 = vmatprep.subr.bf16.mxu0 %v7472_v26 }
 0x4f4   : > { %7219 = vmatprep.subr.bf16.mxu1 %v7473_v28 }
 0x4f6   : > { %7198 = vmatpush3.bf16.msra.mxu0 %v7474_v34 }
 0x4f7   : > { %7220 = vmatpush3.bf16.msra.mxu1 %v7475_v13  ;;  %7199 = vmatprep.subr.bf16.mxu0 %v7476_v18 }
 0x4f8   : > { %7221 = vmatprep.subr.bf16.mxu1 %v7477_v33 }
 0x4fa   : > { %7200 = vmatpush3.bf16.msra.mxu0 %v7478_v30 }
 0x4fb   : > { %7222 = vmatpush3.bf16.msra.mxu1 %v7479_v22  ;;  %7201 = vmatprep.subr.bf16.mxu0 %v7480_v37 }
 0x4fc   : > { %7223 = vmatprep.subr.bf16.mxu1 %v7481_v36 }
 0x4fe   : > { %7202 = vmatpush3.bf16.msra.mxu0 %v7482_v12  ;;  %v7117_v12 = vld [vmem:[#allocation13] ss:$0 sm:$0xff] }
 0x4ff   : > { %7224 = vmatpush3.bf16.msra.mxu1 %v7483_v43  ;;  %7231 = vmatprep.subr.bf16.mxu0 %v7484_v17 }
 0x500   : > { %7253 = vmatprep.subr.bf16.mxu1 %v7485_v44 }
 0x501   : > { %6195 = vmatmul.mubr.bf16.vlgmr.msra.gmra.mrb[8].mxu0 %v5635_v51 }
 0x502   : > { %6235 = vmatmul.mubr.bf16.vlgmr.msra.gmra.mrb[8].mxu1 %v5637_v0  ;;  %7232 = vmatpush3.bf16.msra.mxu0 %v7486_v47 }
 0x503   : > { %7254 = vmatpush3.bf16.msra.mxu1 %v7487_v52  ;;  %7233 = vmatprep.subr.bf16.mxu0 %v7488_v53 }
 0x504   : > { %7255 = vmatprep.subr.bf16.mxu1 %v7489_v14 }
 0x506   : > { %7234 = vmatpush3.bf16.msra.mxu0 %v7490_v55 }
 0x507   : > { %7256 = vmatpush3.bf16.msra.mxu1 %v7491_v56  ;;  %7235 = vmatprep.subr.bf16.mxu0 %v7492_v57 }
 0x508   : > { %7257 = vmatprep.subr.bf16.mxu1 %v7493_v59 }
 0x50a   : > { %7236 = vmatpush3.bf16.msra.mxu0 %v7494_v58 }
 0x50b   : > { %7258 = vmatpush3.bf16.msra.mxu1 %v7495_v60  ;;  %7237 = vmatprep.subr.bf16.mxu0 %v7496_v32 }
 0x50c   : > { %7259 = vmatprep.subr.bf16.mxu1 %v7497_v61 }
 0x50e   : > { %7238 = vmatpush3.bf16.msra.mxu0 %v7498_v38 }
 0x50f   : > { %7260 = vmatpush3.bf16.msra.mxu1 %v7499_v54  ;;  %7239 = vmatprep.subr.bf16.mxu0 %v7500_v9 }
 0x510   : > { %7261 = vmatprep.subr.bf16.mxu1 %v7501_v62 }
 0x512   : > { %7240 = vmatpush3.bf16.msra.mxu0 %v7502_v23 }
 0x513   : > { %7262 = vmatpush3.bf16.msra.mxu1 %v7503_v31  ;;  %7241 = vmatprep.subr.bf16.mxu0 %v7504_v41 }
 0x514   : > { %7263 = vmatprep.subr.bf16.mxu1 %v7505_v63 }
 0x516   : > { %7242 = vmatpush3.bf16.msra.mxu0 %v7506_v16 }
 0x517   : > { %7264 = vmatpush3.bf16.msra.mxu1 %v7507_v1  ;;  %7243 = vmatprep.subr.bf16.mxu0 %v7508_v2 }
 0x518   : > { %7265 = vmatprep.subr.bf16.mxu1 %v7509_v3 }
 0x51a   : > { %7244 = vmatpush3.bf16.msra.mxu0 %v7510_v5 }
 0x51b   : > { %7266 = vmatpush3.bf16.msra.mxu1 %v7511_v50  ;;  %7245 = vmatprep.subr.bf16.mxu0 %v7512_v6 }
 0x51c   : > { %7267 = vmatprep.subr.bf16.mxu1 %v7513_v7 }
 0x51e   : > { %7246 = vmatpush3.bf16.msra.mxu0 %v7514_v8 }
 0x51f   : > { %7268 = vmatpush3.bf16.msra.mxu1 %v7515_v42 }
 0x5b4   : > { %v5456_v25 = vpop.f32.mrb[4].mxu0 }
 0x5b5   : > { %v7283_v15 = vadd.f32 %v5456_v25, %v2390_v10  ;;  %v5620_v26 = vpop.f32.mrb[4].mxu1  ;;  %v5458_v28 = vpop.f32.mrb[5].mxu0 }
 0x5b6   : > { %v7285_v34 = vadd.f32 %v5620_v26, %v2398_v4  ;;  %v7284_v35 = vadd.f32 %v5458_v28, %v2394_v11  ;;  %v5622_v13 = vpop.f32.mrb[5].mxu1  ;;  %v5460_v45 = vpop.f32.mrb[6].mxu0 }
 0x5b7   : > { %v5631_v18 = vmax.f32 %v7283_v15, 0.0  ;;  %v7286_v19 = vadd.f32 %v5622_v13, %v2402_v21  ;;  %v5624_v33 = vpop.f32.mrb[6].mxu1  ;;  %v5461_v48 = vpop.f32.mrb[7].mxu0 }
 0x5b8   : > { %v5633_v30 = vmax.f32 %v7285_v34, 0.0  ;;  %v5632_v20 = vmax.f32 %v7284_v35, 0.0  ;;  %v5625_v22 = vpop.f32.mrb[7].mxu1 }
 0x5b9   : > { %v5634_v46 = vmax.f32 %v7286_v19, 0.0  ;;  %v5639_v27 = vpack.c.bf16 %v5631_v18, %v5631_v18 }
 0x5ba   : > { %v5640_v37 = vpack.c.bf16 %v5632_v20, %v5632_v20  ;;  %v5641_v49 = vpack.c.bf16 %v5633_v30, %v5633_v30 }
 0x5bb   : > { %v5642_v24 = vpack.c.bf16 %v5634_v46, %v5634_v46 }
 0x5bc   : > { %6274 = vmatprep.mubr.bf16.mxu0 %v5640_v37 }
 0x5bd   : > { %6314 = vmatprep.mubr.bf16.mxu1 %v5642_v24  ;;  %6275 = vmatmul.mubr.bf16.vlgmr.msra.gmra.mrb[12].mxu0 %v5639_v27 }
 0x5be   : > { %6315 = vmatmul.mubr.bf16.vlgmr.msra.gmra.mrb[12].mxu1 %v5641_v49 }
 0x5d4   : > { %v7203_v39 = vpop.f32.mrb[8].mxu0 }
 0x5d5   : > { %v7225_v36 = vpop.f32.mrb[8].mxu1  ;;  %v7204_v40 = vpop.f32.mrb[9].mxu0 }
 0x5d6   : > { %v7205_v43 = vadd.f32 %v7204_v40, %v7203_v39  ;;  %v7226_v17 = vpop.f32.mrb[9].mxu1  ;;  %v7206_v29 = vpop.f32.mrb[10].mxu0 }
 0x5d7   : > { %v7227_v44 = vadd.f32 %v7226_v17, %v7225_v36  ;;  %v7228_v47 = vpop.f32.mrb[10].mxu1  ;;  %v7207_v51 = vpop.f32.mrb[11].mxu0 }
 0x5d8   : > { %v6197_v52 = vadd.f32 %v7205_v43, %v7117_v12  ;;  %v7229_v53 = vpop.f32.mrb[11].mxu1 }
 0x5da   : > { %v6237_v0 = vadd.f32 %v7227_v44, %v6197_v52 }
 0x690   : > { %v7247_v14 = vpop.f32.mrb[12].mxu0 }
 0x691   : > { %v7269_v55 = vpop.f32.mrb[12].mxu1  ;;  %v7248_v56 = vpop.f32.mrb[13].mxu0 }
 0x692   : > { %v7249_v57 = vadd.f32 %v7248_v56, %v7247_v14  ;;  %v7270_v59 = vpop.f32.mrb[13].mxu1  ;;  %v7250_v58 = vpop.f32.mrb[14].mxu0 }
 0x693   : > { %v7271_v60 = vadd.f32 %v7270_v59, %v7269_v55  ;;  %v7272_v32 = vpop.f32.mrb[14].mxu1  ;;  %v7251_v61 = vpop.f32.mrb[15].mxu0 }
 0x694   : > { %v6277_v38 = vadd.f32 %v7249_v57, %v6237_v0  ;;  %v7273_v54 = vpop.f32.mrb[15].mxu1 }
 0x696   : > { %v6317_v9 = vadd.f32 %v7271_v60, %v6277_v38 }
 0x698   : > { %6323 = vst.msk [vmem:[#allocation15] sm:$0x3] %vm6322_vm4, %v6317_v9 }
 0x699 PF: > { %p7401_p13 = scmp.eq.s32.totalorder %s7886_s15, 5  ;;  %s7814_s25 = smov [#allocation15]  }
 0x69a   : > { %s6331_s9 = sshll.u32 %s7814_s25, 4  ;;  %s6332_s9 = int_to_ptr.vmem [resolvable:$true] %s6331_s9 }
 0x69b   : > { %s7714_s23 = scalar_lea.vmem %s6332_s9, 32  ;;  %p7721_p1 = scmp.lt.s32.totalorder %s6332_s9, %s6332_s9 }
 0x69c   : > { %p7715_p3 = scmp.ne.s32.totalorder %s6332_s9, %s7714_s23  ;;  %p7722_p4 = scmp.lt.s32.totalorder %s7714_s23, %s7714_s23 }
 0x69e   : > { %p7716_p11 = pnand %p7715_p3, %p7401_p13  ;;  %p7723_p6 = por %p7722_p4, %p7721_p1 }
 0x6a0   : > { %p7717_p0 = pneg %p7716_p11 }
 0x6a2   : > { %p7724_p2 = pnand %p7723_p6, %p7717_p0 }
 0x6a4   : > { %7727 = shalt.err (!%p7724_p2)
}
 0x6a5   : > { %s8752_s28 = sld [smem:[#allocation25_spill]] }
 0x6ab   : > { %s7728_s20 = scalar_lea.hbm %s8752_s28, 32 }
 0x6ac   : > { %p7729_p5 = scmp.ne.s32.totalorder %s8752_s28, %s7728_s20  ;;  %p7734_p12 = scmp.lt.u32.totalorder %s7728_s20, %s8752_s28 }
 0x6ae   : > { %p7730_p9 = pnand %p7729_p5, %p7401_p13 }
 0x6b0   : > { %p7731_p10 = pneg %p7730_p9 }
 0x6b2   : > { %p7736_p7 = pnand %p7734_p12, %p7731_p10 }
 0x6b4   : > { %7739 = shalt.err (!%p7736_p7)
}
 0x6b5   : > { %7362 = dma.vmem_to_hbm [thread:$0]  (%p7401_p13), %s6332_s9, 32, %s8752_s28, [#allocation5]  }
 0x6b6   : > { %7781 = dma.done.wait (%p7401_p13), [#allocation5], 32  }
 0x6b7   : > { %7783 = vsyncadd (%p7401_p13), [#allocation5], 4294967264 }
 0x6b8 PF: > { %p21_p8 = scmp.ge.s32.totalorder %s8043_s27, 8   ;;  %s8753_s30 = smov %s7790_s10 }
 0x6b9   : > { %s8754_s10 = smov %s7794_s11  ;;  %s8755_s11 = smov %s8055_s21 }
 0x6ba   : > { %s8756_s12 = smov %s8043_s27  ;;  %23 = sbr.rel (!%p21_p8) target bundleno = 10 (0xa), region = 128 }
 0x6c1   :  { %6344 = vsyncpa [#allocation4], 1 }
 0x6c2   :  { %6346 = vsyncpa [#allocation4 + $0x1], 1 }
 0x6c3   :  { %6347 = vsyncpa [#allocation7], 1 }
 0x6c4   :  { %6348 = vsyncpa [#allocation11], 1 }
 0x6c5   :  { %6349 = vsyncpa [#allocation14], 1 }
 0x6c6   :  { %6350 = vsyncpa [#allocation5], 1 }
 0x6c7   :  { %6352 = vsyncpa [#allocation5 + $0x1], 1 }

</bundles_post_ra>
